<compile_context>
chip_gen: v7x
topology: tpu7x:2x2x1
jax: 0.10.0
libtpu: 0.0.40
codegen_flags: <defaults>
</compile_context>

<pallas_src>
import math
from functools import partial

import numpy as np
import jax
import jax.numpy as jnp
from jax import lax
from jax.experimental import pallas as pl
from jax.experimental.pallas import tpu as pltpu


# ----------------------------- in-kernel building blocks -----------------------------

def _mha_block(x, in_w_t, in_b, out_w_t, out_b, attn_bias, num_heads):
    """nn.MultiheadAttention self-attention (batch_first, no padding mask, eval) over
    ALL rows of the block at once.  Sequence structure is imposed by `attn_bias`
    (0 within a sequence, -1e30 across sequences).
    x: (M, D); in_w_t: (D, 3D); in_b: (1, 3D); out_w_t: (D, D); out_b: (1, D);
    attn_bias: (M, M).  Returns (M, D) float32."""
    M, D = x.shape
    hd = D // num_heads
    scale = 1.0 / math.sqrt(hd)

    qkv = jnp.dot(x, in_w_t, preferred_element_type=jnp.float32) + in_b      # (M, 3D)
    q = qkv[:, 0:D]
    k = qkv[:, D:2 * D]
    v = qkv[:, 2 * D:3 * D]

    # Per-head loop (few heads); each head is one full-block masked attention.
    # Summing per-head out-projections == concat-heads-then-project.
    out = jnp.zeros((M, D), jnp.float32)
    for h in range(num_heads):
        sl = slice(h * hd, (h + 1) * hd)
        s = lax.dot_general(q[:, sl] * scale, k[:, sl],
                            (((1,), (1,)), ((), ())),
                            preferred_element_type=jnp.float32)              # (M, M)
        s = s + attn_bias
        s = s - jnp.max(s, axis=-1, keepdims=True)
        p = jnp.exp(s)
        p = p * pl.reciprocal(jnp.sum(p, axis=-1, keepdims=True), approx=True)
        oh = jnp.dot(p, v[:, sl], preferred_element_type=jnp.float32)        # (M, hd)
        out = out + jnp.dot(oh, out_w_t[sl, :], preferred_element_type=jnp.float32)
    return out + out_b


def _additive_attention(h, vw_w_t, vw_b, qw_row, grp, sel):
    """AdditiveWordAttention with its nn.Softmax(dim=1) semantics.
    h: (M, D).  grp: (M, M) 0/1 'same softmax group' matrix (the PyTorch dim=1 groups).
    sel: (S, M) 0/1 'rows contributing to output s' matrix.
    Returns (S, D) = sel @ (softmax_weights * h)."""
    tmp = jnp.tanh(jnp.dot(h, vw_w_t, preferred_element_type=jnp.float32) + vw_b)  # (M, A_pad)
    # lin_q as a VPU multiply + lane reduction (qw_row is (1, A_pad), zero padded).
    aw = jnp.sum(tmp * qw_row, axis=-1, keepdims=True)                              # (M, 1)
    aw = aw - jnp.max(aw, axis=0, keepdims=True)      # global shift: constant per group
    e = jnp.exp(aw)
    denom = jnp.dot(grp, e, preferred_element_type=jnp.float32)                     # (M, 1)
    w = e * pl.reciprocal(denom, approx=True)
    return jnp.dot(sel, w * h, preferred_element_type=jnp.float32)                  # (S, D)


# ------------------------------------ fused kernel ------------------------------------

def _click_predictor_kernel(xb_ref, xc_ref, *refs, news_heads, user_heads):
    """One batch block (TB batch elements):
       xb_ref: (TB*Nb*L, D) browsed token embeddings
       xc_ref: (TB*Nc*L, D) candidate token embeddings
       -> y_ref: (TB, NC_PAD) lane-dense click scores (zero padded past Nc)."""
    y_ref = refs[-1]
    vals = [r[...] for r in refs[:-1]]
    w_nu = vals[0:7]      # userEncoder.news_encoder (browsed titles)
    w_nc = vals[7:14]     # ClickPredictor.news_encoder (candidate titles)
    w_u = vals[14:21]     # userEncoder.multi_head_att + add_news_att
    (bias_b, grp_b, sel_b,
     bias_c, grp_c, sel_c,
     bias_u, grp_u, sel_u,
     cand_mask, fold) = vals[21:32]

    # Browsed-news encoder: (TB*Nb*L, D) -> (TB*Nb, D)
    hb = _mha_block(xb_ref[...], w_nu[0], w_nu[1], w_nu[2], w_nu[3], bias_b, news_heads)
    rb = _additive_attention(hb, w_nu[4], w_nu[5], w_nu[6], grp_b, sel_b)

    # Candidate-news encoder: (TB*Nc*L, D) -> (TB*Nc, D)
    hc = _mha_block(xc_ref[...], w_nc[0], w_nc[1], w_nc[2], w_nc[3], bias_c, news_heads)
    rc = _additive_attention(hc, w_nc[4], w_nc[5], w_nc[6], grp_c, sel_c)

    # User encoder over browsed-news representations: (TB*Nb, D) -> (TB, D)
    hu = _mha_block(rb, w_u[0], w_u[1], w_u[2], w_u[3], bias_u, user_heads)
    u = _additive_attention(hu, w_u[4], w_u[5], w_u[6], grp_u, sel_u)

    # Click scores y[b, c] = <u[b], rc[b*Nc + c]>, folded into a lane-dense slab.
    full = lax.dot_general(u, rc, (((1,), (1,)), ((), ())),
                           preferred_element_type=jnp.float32)        # (TB, TB*Nc)
    y_ref[...] = jnp.dot(full * cand_mask, fold, preferred_element_type=jnp.float32)


# --------------------------- host-side packing / constant masks -----------------------

def _pack_attn_params(mha, add):
    """Transpose PyTorch-layout weights (x @ W form) and zero-pad the additive dim to a
    lane-aligned multiple of 128."""
    in_w_t = jnp.asarray(mha['in_w']).T            # (D, 3D)
    in_b = jnp.asarray(mha['in_b'])[None, :]       # (1, 3D)
    out_w_t = jnp.asarray(mha['out_w']).T          # (D, D)
    out_b = jnp.asarray(mha['out_b'])[None, :]     # (1, D)

    vw_w_t = jnp.asarray(add['vw_w']).T            # (D, A)
    a_dim = vw_w_t.shape[1]
    a_pad = ((a_dim + 127) // 128) * 128
    pad = a_pad - a_dim
    vw_w_t = jnp.pad(vw_w_t, ((0, 0), (0, pad)))                    # (D, A_pad)
    vw_b = jnp.pad(jnp.asarray(add['vw_b']), (0, pad))[None, :]     # (1, A_pad)
    qw_row = jnp.pad(jnp.asarray(add['q_w'])[0], (0, pad))[None, :] # (1, A_pad)
    return (in_w_t, in_b, out_w_t, out_b, vw_w_t, vw_b, qw_row)


def _news_masks(tb, n, seq_len):
    """Masks for one news encoder block with rows ordered (b, n, l)."""
    m = tb * n * seq_len
    i = np.arange(m)
    b = i // (n * seq_len)
    t = i // seq_len                    # flat title id = b*n + title
    l = i % seq_len
    same_title = (t[:, None] == t[None, :])
    attn_bias = np.where(same_title, 0.0, -1e30).astype(np.float32)            # (M, M)
    # nn.Softmax(dim=1): normalise ACROSS TITLES for fixed (batch, token position).
    same_grp = ((b[:, None] == b[None, :]) &
                (l[:, None] == l[None, :])).astype(np.float32)                 # (M, M)
    sel = (t[None, :] == np.arange(tb * n)[:, None]).astype(np.float32)        # (S, M)
    return jnp.asarray(attn_bias), jnp.asarray(same_grp), jnp.asarray(sel)


def _user_masks(tb, nb):
    """Masks for the user encoder block with rows ordered (b, n)."""
    m = tb * nb
    b = np.arange(m) // nb
    same_b = (b[:, None] == b[None, :])
    attn_bias = np.where(same_b, 0.0, -1e30).astype(np.float32)                # (Mb, Mb)
    grp = same_b.astype(np.float32)                                            # (Mb, Mb)
    sel = (b[None, :] == np.arange(tb)[:, None]).astype(np.float32)            # (TB, Mb)
    return jnp.asarray(attn_bias), jnp.asarray(grp), jnp.asarray(sel)


def _score_masks(tb, nc, nc_pad):
    """Select each batch element's own candidates and fold them into a lane-dense slab."""
    j = np.arange(tb * nc)
    cand_mask = (j[None, :] // nc == np.arange(tb)[:, None]).astype(np.float32)  # (TB, Mc)
    fold = (j[:, None] % nc == np.arange(nc_pad)[None, :]).astype(np.float32)    # (Mc, NC_PAD)
    return jnp.asarray(cand_mask), jnp.asarray(fold)


def _full_spec(arr):
    return pl.BlockSpec(arr.shape, lambda g: (0,) * arr.ndim)


# ------------------------------------ Python wrapper -----------------------------------

def click_predictor_pallas(browsed_emb, cand_emb, params, news_heads, user_heads,
                           block_b=None):
    """browsed_emb: (B, Nb, L, D) token embeddings, cand_emb: (B, Nc, L, D)
    -> click scores (B, Nc)."""
    B, Nb, L, D = browsed_emb.shape
    _, Nc, Lc, Dc = cand_emb.shape
    assert (Lc, Dc) == (L, D)

    TB = B if block_b is None else block_b     # batch elements per grid step
    assert B % TB == 0
    nc_pad = max(128, ((Nc + 127) // 128) * 128)   # lane-dense score output

    xb = browsed_emb.reshape(B * Nb * L, D)
    xc = cand_emb.reshape(B * Nc * L, D)

    w_nu = _pack_attn_params(params['news_user_mha'], params['news_user_add'])
    w_nc = _pack_attn_params(params['news_cand_mha'], params['news_cand_add'])
    w_u = _pack_attn_params(params['user_mha'], params['user_add'])
    weights = w_nu + w_nc + w_u

    bias_b, grp_b, sel_b = _news_masks(TB, Nb, L)
    bias_c, grp_c, sel_c = _news_masks(TB, Nc, L)
    bias_u, grp_u, sel_u = _user_masks(TB, Nb)
    cand_mask, fold = _score_masks(TB, Nc, nc_pad)
    masks = (bias_b, grp_b, sel_b, bias_c, grp_c, sel_c,
             bias_u, grp_u, sel_u, cand_mask, fold)

    kernel = partial(_click_predictor_kernel,
                     news_heads=news_heads, user_heads=user_heads)

    mb_rows = TB * Nb * L
    mc_rows = TB * Nc * L
    in_specs = ([pl.BlockSpec((mb_rows, D), lambda g: (g, 0)),
                 pl.BlockSpec((mc_rows, D), lambda g: (g, 0))]
                + [_full_spec(a) for a in weights + masks])

    y_pad = pl.pallas_call(
        kernel,
        out_shape=jax.ShapeDtypeStruct((B, nc_pad), jnp.float32),
        grid=(B // TB,),
        in_specs=in_specs,
        out_specs=pl.BlockSpec((TB, nc_pad), lambda g: (g, 0)),
        compiler_params=pltpu.CompilerParams(
            dimension_semantics=("parallel",)),    # v7x: split batch over both TCs
    )(xb, xc, *weights, *masks)
    return y_pad[:, :Nc]


# ------------------------------ pure-JAX reference ----------------------------

def _mha_ref(x, p, num_heads):
    *lead, L, D = x.shape
    lead = tuple(lead)
    hd = D // num_heads
    qkv = x @ p['in_w'].T + p['in_b']
    q, k, v = jnp.split(qkv, 3, axis=-1)

    def heads(t):
        t = t.reshape(lead + (L, num_heads, hd))
        return jnp.moveaxis(t, -2, -3)

    qh, kh, vh = heads(q), heads(k), heads(v)
    s = (qh / math.sqrt(hd)) @ jnp.swapaxes(kh, -1, -2)
    a = jax.nn.softmax(s, axis=-1)
    o = a @ vh
    o = jnp.moveaxis(o, -3, -2).reshape(lead + (L, D))
    return o @ p['out_w'].T + p['out_b']


def _additive_ref(h, p):
    tmp = jnp.tanh(h @ p['vw_w'].T + p['vw_b'])
    aw = tmp @ p['q_w'].T
    aw = jax.nn.softmax(aw, axis=1)            # dim=1, exactly as in the PyTorch code
    r = jnp.swapaxes(aw, -1, -2) @ h
    return jnp.squeeze(r, axis=-2)


def ref_click_predictor(browsed, cand, params, news_heads, user_heads):
    def news_ref(x, mha_p, add_p):
        h = _mha_ref(x, mha_p, news_heads)
        return _additive_ref(h, add_p)

    r_b = news_ref(browsed, params['news_user_mha'], params['news_user_add'])   # (B, Nb, D)
    h_u = _mha_ref(r_b, params['user_mha'], user_heads)                          # (B, Nb, D)
    u = _additive_ref(h_u, params['user_add'])                                   # (B, D)
    r_c = news_ref(cand, params['news_cand_mha'], params['news_cand_add'])       # (B, Nc, D)
    return jnp.einsum('bd,bcd->bc', u, r_c)


# ------------------------------ parameter init --------------------------------

def init_mha_params(key, d):
    k1, k2, k3, k4 = jax.random.split(key, 4)
    return {
        'in_w': 0.1 * jax.random.normal(k1, (3 * d, d), jnp.float32),
        'in_b': 0.1 * jax.random.normal(k2, (3 * d,), jnp.float32),
        'out_w': 0.1 * jax.random.normal(k3, (d, d), jnp.float32),
        'out_b': 0.1 * jax.random.normal(k4, (d,), jnp.float32),
    }


def init_additive_params(key, d, a=200):   # additive_vector_dim defaults to 200
    k1, k2, k3 = jax.random.split(key, 3)
    return {
        'vw_w': 0.1 * jax.random.normal(k1, (a, d), jnp.float32),
        'vw_b': 0.1 * jax.random.normal(k2, (a,), jnp.float32),
        'q_w': 0.1 * jax.random.normal(k3, (1, a), jnp.float32),
    }


# ------------------------------------ main -------------------------------------

if __name__ == "__main__":
    # Small shapes consistent with the forward pass:
    #   emb_dimension = news_head_count * head_vector_size = user_head_count * head_vector_size
    B, N_BROWSED, N_CAND, L = 2, 4, 3, 8
    NEWS_HEADS = 4
    USER_HEADS = 4
    HEAD_VEC = 8
    D = NEWS_HEADS * HEAD_VEC  # 32

    key = jax.random.PRNGKey(0)
    keys = jax.random.split(key, 8)

    browsed_emb = jax.random.normal(keys[0], (B, N_BROWSED, L, D), jnp.float32)
    cand_emb = jax.random.normal(keys[1], (B, N_CAND, L, D), jnp.float32)

    # userEncoder.news_encoder and ClickPredictor.news_encoder are DISTINCT modules
    # in the PyTorch code, hence two separate news-encoder parameter sets.
    params = {
        'news_user_mha': init_mha_params(keys[2], D),
        'news_user_add': init_additive_params(keys[3], D),
        'news_cand_mha': init_mha_params(keys[4], D),
        'news_cand_add': init_additive_params(keys[5], D),
        'user_mha': init_mha_params(keys[6], D),
        'user_add': init_additive_params(keys[7], D),
    }

    y = click_predictor_pallas(browsed_emb, cand_emb, params, NEWS_HEADS, USER_HEADS)
    y = jax.block_until_ready(y)

    y_ref = ref_click_predictor(browsed_emb, cand_emb, params, NEWS_HEADS, USER_HEADS)
    assert y.shape == (B, N_CAND), y.shape
    # Tolerance slightly loosened vs. a pure f32 reference: the kernel uses the EUP
    # approximate reciprocal for softmax denominators and matmul-based segment sums.
    assert jnp.allclose(y, y_ref, atol=5e-3, rtol=5e-3), (y, y_ref)
    print("KERNEL_OK")
</pallas_src>

<mosaic_0001>
module attributes {stable_mosaic.version = 11 : i64} {
  func.func @_click_predictor_kernel(%arg0: i32, %arg1: memref<64x32xf32, #tpu.memory_space<vmem>>, %arg2: memref<48x32xf32, #tpu.memory_space<vmem>>, %arg3: memref<32x96xf32, #tpu.memory_space<vmem>>, %arg4: memref<1x96xf32, #tpu.memory_space<vmem>>, %arg5: memref<32x32xf32, #tpu.memory_space<vmem>>, %arg6: memref<1x32xf32, #tpu.memory_space<vmem>>, %arg7: memref<32x256xf32, #tpu.memory_space<vmem>>, %arg8: memref<1x256xf32, #tpu.memory_space<vmem>>, %arg9: memref<1x256xf32, #tpu.memory_space<vmem>>, %arg10: memref<32x96xf32, #tpu.memory_space<vmem>>, %arg11: memref<1x96xf32, #tpu.memory_space<vmem>>, %arg12: memref<32x32xf32, #tpu.memory_space<vmem>>, %arg13: memref<1x32xf32, #tpu.memory_space<vmem>>, %arg14: memref<32x256xf32, #tpu.memory_space<vmem>>, %arg15: memref<1x256xf32, #tpu.memory_space<vmem>>, %arg16: memref<1x256xf32, #tpu.memory_space<vmem>>, %arg17: memref<32x96xf32, #tpu.memory_space<vmem>>, %arg18: memref<1x96xf32, #tpu.memory_space<vmem>>, %arg19: memref<32x32xf32, #tpu.memory_space<vmem>>, %arg20: memref<1x32xf32, #tpu.memory_space<vmem>>, %arg21: memref<32x256xf32, #tpu.memory_space<vmem>>, %arg22: memref<1x256xf32, #tpu.memory_space<vmem>>, %arg23: memref<1x256xf32, #tpu.memory_space<vmem>>, %arg24: memref<64x64xf32, #tpu.memory_space<vmem>>, %arg25: memref<64x64xf32, #tpu.memory_space<vmem>>, %arg26: memref<8x64xf32, #tpu.memory_space<vmem>>, %arg27: memref<48x48xf32, #tpu.memory_space<vmem>>, %arg28: memref<48x48xf32, #tpu.memory_space<vmem>>, %arg29: memref<6x48xf32, #tpu.memory_space<vmem>>, %arg30: memref<8x8xf32, #tpu.memory_space<vmem>>, %arg31: memref<8x8xf32, #tpu.memory_space<vmem>>, %arg32: memref<2x8xf32, #tpu.memory_space<vmem>>, %arg33: memref<2x6xf32, #tpu.memory_space<vmem>>, %arg34: memref<6x128xf32, #tpu.memory_space<vmem>>, %arg35: memref<2x128xf32, #tpu.memory_space<vmem>>) attributes {dimension_semantics = [#tpu.dimension_semantics<parallel>], iteration_bounds = array<i64: 1>, scalar_prefetch = 0 : i64, scratch_operands = 0 : i64, tpu.core_type = #tpu.core_type<tc>, window_params = [{transform_indices = @transform_0, window_bounds = array<i64: 64, 32>}, {transform_indices = @transform_1, window_bounds = array<i64: 48, 32>}, {pipeline_mode = #tpu.pipeline_mode<synchronous>, transform_indices = @transform_2, window_bounds = array<i64: 32, 96>}, {pipeline_mode = #tpu.pipeline_mode<synchronous>, transform_indices = @transform_3, window_bounds = array<i64: 1, 96>}, {pipeline_mode = #tpu.pipeline_mode<synchronous>, transform_indices = @transform_4, window_bounds = array<i64: 32, 32>}, {pipeline_mode = #tpu.pipeline_mode<synchronous>, transform_indices = @transform_5, window_bounds = array<i64: 1, 32>}, {pipeline_mode = #tpu.pipeline_mode<synchronous>, transform_indices = @transform_6, window_bounds = array<i64: 32, 256>}, {pipeline_mode = #tpu.pipeline_mode<synchronous>, transform_indices = @transform_7, window_bounds = array<i64: 1, 256>}, {pipeline_mode = #tpu.pipeline_mode<synchronous>, transform_indices = @transform_8, window_bounds = array<i64: 1, 256>}, {pipeline_mode = #tpu.pipeline_mode<synchronous>, transform_indices = @transform_9, window_bounds = array<i64: 32, 96>}, {pipeline_mode = #tpu.pipeline_mode<synchronous>, transform_indices = @transform_10, window_bounds = array<i64: 1, 96>}, {pipeline_mode = #tpu.pipeline_mode<synchronous>, transform_indices = @transform_11, window_bounds = array<i64: 32, 32>}, {pipeline_mode = #tpu.pipeline_mode<synchronous>, transform_indices = @transform_12, window_bounds = array<i64: 1, 32>}, {pipeline_mode = #tpu.pipeline_mode<synchronous>, transform_indices = @transform_13, window_bounds = array<i64: 32, 256>}, {pipeline_mode = #tpu.pipeline_mode<synchronous>, transform_indices = @transform_14, window_bounds = array<i64: 1, 256>}, {pipeline_mode = #tpu.pipeline_mode<synchronous>, transform_indices = @transform_15, window_bounds = array<i64: 1, 256>}, {pipeline_mode = #tpu.pipeline_mode<synchronous>, transform_indices = @transform_16, window_bounds = array<i64: 32, 96>}, {pipeline_mode = #tpu.pipeline_mode<synchronous>, transform_indices = @transform_17, window_bounds = array<i64: 1, 96>}, {pipeline_mode = #tpu.pipeline_mode<synchronous>, transform_indices = @transform_18, window_bounds = array<i64: 32, 32>}, {pipeline_mode = #tpu.pipeline_mode<synchronous>, transform_indices = @transform_19, window_bounds = array<i64: 1, 32>}, {pipeline_mode = #tpu.pipeline_mode<synchronous>, transform_indices = @transform_20, window_bounds = array<i64: 32, 256>}, {pipeline_mode = #tpu.pipeline_mode<synchronous>, transform_indices = @transform_21, window_bounds = array<i64: 1, 256>}, {pipeline_mode = #tpu.pipeline_mode<synchronous>, transform_indices = @transform_22, window_bounds = array<i64: 1, 256>}, {pipeline_mode = #tpu.pipeline_mode<synchronous>, transform_indices = @transform_23, window_bounds = array<i64: 64, 64>}, {pipeline_mode = #tpu.pipeline_mode<synchronous>, transform_indices = @transform_24, window_bounds = array<i64: 64, 64>}, {pipeline_mode = #tpu.pipeline_mode<synchronous>, transform_indices = @transform_25, window_bounds = array<i64: 8, 64>}, {pipeline_mode = #tpu.pipeline_mode<synchronous>, transform_indices = @transform_26, window_bounds = array<i64: 48, 48>}, {pipeline_mode = #tpu.pipeline_mode<synchronous>, transform_indices = @transform_27, window_bounds = array<i64: 48, 48>}, {pipeline_mode = #tpu.pipeline_mode<synchronous>, transform_indices = @transform_28, window_bounds = array<i64: 6, 48>}, {pipeline_mode = #tpu.pipeline_mode<synchronous>, transform_indices = @transform_29, window_bounds = array<i64: 8, 8>}, {pipeline_mode = #tpu.pipeline_mode<synchronous>, transform_indices = @transform_30, window_bounds = array<i64: 8, 8>}, {pipeline_mode = #tpu.pipeline_mode<synchronous>, transform_indices = @transform_31, window_bounds = array<i64: 2, 8>}, {pipeline_mode = #tpu.pipeline_mode<synchronous>, transform_indices = @transform_32, window_bounds = array<i64: 2, 6>}, {pipeline_mode = #tpu.pipeline_mode<synchronous>, transform_indices = @transform_33, window_bounds = array<i64: 6, 128>}, {transform_indices = @transform_34, window_bounds = array<i64: 2, 128>}]} {
    %c0 = arith.constant 0 : index
    %c0_0 = arith.constant 0 : index
    %0 = vector.load %arg3[%c0, %c0_0] : memref<32x96xf32, #tpu.memory_space<vmem>>, vector<32x96xf32>
    %c0_1 = arith.constant 0 : index
    %c0_2 = arith.constant 0 : index
    %1 = vector.load %arg4[%c0_1, %c0_2] : memref<1x96xf32, #tpu.memory_space<vmem>>, vector<1x96xf32>
    %c0_3 = arith.constant 0 : index
    %c0_4 = arith.constant 0 : index
    %2 = vector.load %arg5[%c0_3, %c0_4] : memref<32x32xf32, #tpu.memory_space<vmem>>, vector<32x32xf32>
    %c0_5 = arith.constant 0 : index
    %c0_6 = arith.constant 0 : index
    %3 = vector.load %arg6[%c0_5, %c0_6] : memref<1x32xf32, #tpu.memory_space<vmem>>, vector<1x32xf32>
    %c0_7 = arith.constant 0 : index
    %c0_8 = arith.constant 0 : index
    %4 = vector.load %arg7[%c0_7, %c0_8] : memref<32x256xf32, #tpu.memory_space<vmem>>, vector<32x256xf32>
    %c0_9 = arith.constant 0 : index
    %c0_10 = arith.constant 0 : index
    %5 = vector.load %arg8[%c0_9, %c0_10] : memref<1x256xf32, #tpu.memory_space<vmem>>, vector<1x256xf32>
    %c0_11 = arith.constant 0 : index
    %c0_12 = arith.constant 0 : index
    %6 = vector.load %arg9[%c0_11, %c0_12] : memref<1x256xf32, #tpu.memory_space<vmem>>, vector<1x256xf32>
    %c0_13 = arith.constant 0 : index
    %c0_14 = arith.constant 0 : index
    %7 = vector.load %arg10[%c0_13, %c0_14] : memref<32x96xf32, #tpu.memory_space<vmem>>, vector<32x96xf32>
    %c0_15 = arith.constant 0 : index
    %c0_16 = arith.constant 0 : index
    %8 = vector.load %arg11[%c0_15, %c0_16] : memref<1x96xf32, #tpu.memory_space<vmem>>, vector<1x96xf32>
    %c0_17 = arith.constant 0 : index
    %c0_18 = arith.constant 0 : index
    %9 = vector.load %arg12[%c0_17, %c0_18] : memref<32x32xf32, #tpu.memory_space<vmem>>, vector<32x32xf32>
    %c0_19 = arith.constant 0 : index
    %c0_20 = arith.constant 0 : index
    %10 = vector.load %arg13[%c0_19, %c0_20] : memref<1x32xf32, #tpu.memory_space<vmem>>, vector<1x32xf32>
    %c0_21 = arith.constant 0 : index
    %c0_22 = arith.constant 0 : index
    %11 = vector.load %arg14[%c0_21, %c0_22] : memref<32x256xf32, #tpu.memory_space<vmem>>, vector<32x256xf32>
    %c0_23 = arith.constant 0 : index
    %c0_24 = arith.constant 0 : index
    %12 = vector.load %arg15[%c0_23, %c0_24] : memref<1x256xf32, #tpu.memory_space<vmem>>, vector<1x256xf32>
    %c0_25 = arith.constant 0 : index
    %c0_26 = arith.constant 0 : index
    %13 = vector.load %arg16[%c0_25, %c0_26] : memref<1x256xf32, #tpu.memory_space<vmem>>, vector<1x256xf32>
    %c0_27 = arith.constant 0 : index
    %c0_28 = arith.constant 0 : index
    %14 = vector.load %arg17[%c0_27, %c0_28] : memref<32x96xf32, #tpu.memory_space<vmem>>, vector<32x96xf32>
    %c0_29 = arith.constant 0 : index
    %c0_30 = arith.constant 0 : index
    %15 = vector.load %arg18[%c0_29, %c0_30] : memref<1x96xf32, #tpu.memory_space<vmem>>, vector<1x96xf32>
    %c0_31 = arith.constant 0 : index
    %c0_32 = arith.constant 0 : index
    %16 = vector.load %arg19[%c0_31, %c0_32] : memref<32x32xf32, #tpu.memory_space<vmem>>, vector<32x32xf32>
    %c0_33 = arith.constant 0 : index
    %c0_34 = arith.constant 0 : index
    %17 = vector.load %arg20[%c0_33, %c0_34] : memref<1x32xf32, #tpu.memory_space<vmem>>, vector<1x32xf32>
    %c0_35 = arith.constant 0 : index
    %c0_36 = arith.constant 0 : index
    %18 = vector.load %arg21[%c0_35, %c0_36] : memref<32x256xf32, #tpu.memory_space<vmem>>, vector<32x256xf32>
    %c0_37 = arith.constant 0 : index
    %c0_38 = arith.constant 0 : index
    %19 = vector.load %arg22[%c0_37, %c0_38] : memref<1x256xf32, #tpu.memory_space<vmem>>, vector<1x256xf32>
    %c0_39 = arith.constant 0 : index
    %c0_40 = arith.constant 0 : index
    %20 = vector.load %arg23[%c0_39, %c0_40] : memref<1x256xf32, #tpu.memory_space<vmem>>, vector<1x256xf32>
    %c0_41 = arith.constant 0 : index
    %c0_42 = arith.constant 0 : index
    %21 = vector.load %arg24[%c0_41, %c0_42] : memref<64x64xf32, #tpu.memory_space<vmem>>, vector<64x64xf32>
    %c0_43 = arith.constant 0 : index
    %c0_44 = arith.constant 0 : index
    %22 = vector.load %arg25[%c0_43, %c0_44] : memref<64x64xf32, #tpu.memory_space<vmem>>, vector<64x64xf32>
    %c0_45 = arith.constant 0 : index
    %c0_46 = arith.constant 0 : index
    %23 = vector.load %arg26[%c0_45, %c0_46] : memref<8x64xf32, #tpu.memory_space<vmem>>, vector<8x64xf32>
    %c0_47 = arith.constant 0 : index
    %c0_48 = arith.constant 0 : index
    %24 = vector.load %arg27[%c0_47, %c0_48] : memref<48x48xf32, #tpu.memory_space<vmem>>, vector<48x48xf32>
    %c0_49 = arith.constant 0 : index
    %c0_50 = arith.constant 0 : index
    %25 = vector.load %arg28[%c0_49, %c0_50] : memref<48x48xf32, #tpu.memory_space<vmem>>, vector<48x48xf32>
    %c0_51 = arith.constant 0 : index
    %c0_52 = arith.constant 0 : index
    %26 = vector.load %arg29[%c0_51, %c0_52] : memref<6x48xf32, #tpu.memory_space<vmem>>, vector<6x48xf32>
    %c0_53 = arith.constant 0 : index
    %c0_54 = arith.constant 0 : index
    %27 = vector.load %arg30[%c0_53, %c0_54] : memref<8x8xf32, #tpu.memory_space<vmem>>, vector<8x8xf32>
    %c0_55 = arith.constant 0 : index
    %c0_56 = arith.constant 0 : index
    %28 = vector.load %arg31[%c0_55, %c0_56] : memref<8x8xf32, #tpu.memory_space<vmem>>, vector<8x8xf32>
    %c0_57 = arith.constant 0 : index
    %c0_58 = arith.constant 0 : index
    %29 = vector.load %arg32[%c0_57, %c0_58] : memref<2x8xf32, #tpu.memory_space<vmem>>, vector<2x8xf32>
    %c0_59 = arith.constant 0 : index
    %c0_60 = arith.constant 0 : index
    %30 = vector.load %arg33[%c0_59, %c0_60] : memref<2x6xf32, #tpu.memory_space<vmem>>, vector<2x6xf32>
    %c0_61 = arith.constant 0 : index
    %c0_62 = arith.constant 0 : index
    %31 = vector.load %arg34[%c0_61, %c0_62] : memref<6x128xf32, #tpu.memory_space<vmem>>, vector<6x128xf32>
    %c0_63 = arith.constant 0 : index
    %c0_64 = arith.constant 0 : index
    %32 = vector.load %arg1[%c0_63, %c0_64] : memref<64x32xf32, #tpu.memory_space<vmem>>, vector<64x32xf32>
    %cst = arith.constant dense<0.000000e+00> : vector<64x96xf32>
    %33 = tpu.matmul %32, %0, %cst {dimension_numbers = #tpu.dot_dimension_numbers<[1], [0], [0], [1], [0, 0, 1, 1], [], []>} : vector<64x32xf32>, vector<32x96xf32>, vector<64x96xf32> -> vector<64x96xf32>
    %34 = vector.broadcast %1 : vector<1x96xf32> to vector<64x96xf32>
    %35 = arith.addf %33, %34 : vector<64x96xf32>
    %36 = vector.extract_strided_slice %35 {offsets = [0, 0], sizes = [64, 32], strides = [1, 1]} : vector<64x96xf32> to vector<64x32xf32>
    %37 = vector.extract_strided_slice %35 {offsets = [0, 32], sizes = [64, 32], strides = [1, 1]} : vector<64x96xf32> to vector<64x32xf32>
    %38 = vector.extract_strided_slice %35 {offsets = [0, 64], sizes = [64, 32], strides = [1, 1]} : vector<64x96xf32> to vector<64x32xf32>
    %cst_65 = arith.constant 0.000000e+00 : f32
    %39 = vector.broadcast %cst_65 : f32 to vector<64x32xf32>
    %40 = vector.extract_strided_slice %36 {offsets = [0, 0], sizes = [64, 8], strides = [1, 1]} : vector<64x32xf32> to vector<64x8xf32>
    %cst_66 = arith.constant 0.353553385 : f32
    %41 = vector.broadcast %cst_66 : f32 to vector<64x8xf32>
    %42 = arith.mulf %40, %41 : vector<64x8xf32>
    %43 = vector.extract_strided_slice %37 {offsets = [0, 0], sizes = [64, 8], strides = [1, 1]} : vector<64x32xf32> to vector<64x8xf32>
    %cst_67 = arith.constant dense<0.000000e+00> : vector<64x64xf32>
    %44 = tpu.matmul %42, %43, %cst_67 {dimension_numbers = #tpu.dot_dimension_numbers<[1], [1], [0], [0], [0, 0, 1, 0], [], []>} : vector<64x8xf32>, vector<64x8xf32>, vector<64x64xf32> -> vector<64x64xf32>
    %45 = arith.addf %44, %21 : vector<64x64xf32>
    %cst_68 = arith.constant dense<0xFF800000> : vector<64xf32>
    %46 = vector.multi_reduction <maximumf>, %45, %cst_68 [1] : vector<64x64xf32> to vector<64xf32>
    %47 = vector.shape_cast %46 : vector<64xf32> to vector<64x1xf32>
    %48 = vector.broadcast %47 : vector<64x1xf32> to vector<64x64xf32>
    %49 = arith.subf %45, %48 : vector<64x64xf32>
    %50 = math.exp %49 : vector<64x64xf32>
    %cst_69 = arith.constant dense<0.000000e+00> : vector<64xf32>
    %51 = vector.multi_reduction <add>, %50, %cst_69 [1] : vector<64x64xf32> to vector<64xf32>
    %52 = vector.shape_cast %51 : vector<64xf32> to vector<64x1xf32>
    %53 = tpu.reciprocal %52 {approx = true} : vector<64x1xf32> -> vector<64x1xf32>
    %54 = vector.broadcast %53 : vector<64x1xf32> to vector<64x64xf32>
    %55 = arith.mulf %50, %54 : vector<64x64xf32>
    %56 = vector.extract_strided_slice %38 {offsets = [0, 0], sizes = [64, 8], strides = [1, 1]} : vector<64x32xf32> to vector<64x8xf32>
    %cst_70 = arith.constant dense<0.000000e+00> : vector<64x8xf32>
    %57 = tpu.matmul %55, %56, %cst_70 {dimension_numbers = #tpu.dot_dimension_numbers<[1], [0], [0], [1], [0, 0, 1, 1], [], []>} : vector<64x64xf32>, vector<64x8xf32>, vector<64x8xf32> -> vector<64x8xf32>
    %58 = vector.extract_strided_slice %2 {offsets = [0, 0], sizes = [8, 32], strides = [1, 1]} : vector<32x32xf32> to vector<8x32xf32>
    %cst_71 = arith.constant dense<0.000000e+00> : vector<64x32xf32>
    %59 = tpu.matmul %57, %58, %cst_71 {dimension_numbers = #tpu.dot_dimension_numbers<[1], [0], [0], [1], [0, 0, 1, 1], [], []>} : vector<64x8xf32>, vector<8x32xf32>, vector<64x32xf32> -> vector<64x32xf32>
    %60 = arith.addf %39, %59 : vector<64x32xf32>
    %61 = vector.extract_strided_slice %36 {offsets = [0, 8], sizes = [64, 8], strides = [1, 1]} : vector<64x32xf32> to vector<64x8xf32>
    %cst_72 = arith.constant 0.353553385 : f32
    %62 = vector.broadcast %cst_72 : f32 to vector<64x8xf32>
    %63 = arith.mulf %61, %62 : vector<64x8xf32>
    %64 = vector.extract_strided_slice %37 {offsets = [0, 8], sizes = [64, 8], strides = [1, 1]} : vector<64x32xf32> to vector<64x8xf32>
    %cst_73 = arith.constant dense<0.000000e+00> : vector<64x64xf32>
    %65 = tpu.matmul %63, %64, %cst_73 {dimension_numbers = #tpu.dot_dimension_numbers<[1], [1], [0], [0], [0, 0, 1, 0], [], []>} : vector<64x8xf32>, vector<64x8xf32>, vector<64x64xf32> -> vector<64x64xf32>
    %66 = arith.addf %65, %21 : vector<64x64xf32>
    %cst_74 = arith.constant dense<0xFF800000> : vector<64xf32>
    %67 = vector.multi_reduction <maximumf>, %66, %cst_74 [1] : vector<64x64xf32> to vector<64xf32>
    %68 = vector.shape_cast %67 : vector<64xf32> to vector<64x1xf32>
    %69 = vector.broadcast %68 : vector<64x1xf32> to vector<64x64xf32>
    %70 = arith.subf %66, %69 : vector<64x64xf32>
    %71 = math.exp %70 : vector<64x64xf32>
    %cst_75 = arith.constant dense<0.000000e+00> : vector<64xf32>
    %72 = vector.multi_reduction <add>, %71, %cst_75 [1] : vector<64x64xf32> to vector<64xf32>
    %73 = vector.shape_cast %72 : vector<64xf32> to vector<64x1xf32>
    %74 = tpu.reciprocal %73 {approx = true} : vector<64x1xf32> -> vector<64x1xf32>
    %75 = vector.broadcast %74 : vector<64x1xf32> to vector<64x64xf32>
    %76 = arith.mulf %71, %75 : vector<64x64xf32>
    %77 = vector.extract_strided_slice %38 {offsets = [0, 8], sizes = [64, 8], strides = [1, 1]} : vector<64x32xf32> to vector<64x8xf32>
    %cst_76 = arith.constant dense<0.000000e+00> : vector<64x8xf32>
    %78 = tpu.matmul %76, %77, %cst_76 {dimension_numbers = #tpu.dot_dimension_numbers<[1], [0], [0], [1], [0, 0, 1, 1], [], []>} : vector<64x64xf32>, vector<64x8xf32>, vector<64x8xf32> -> vector<64x8xf32>
    %79 = vector.extract_strided_slice %2 {offsets = [8, 0], sizes = [8, 32], strides = [1, 1]} : vector<32x32xf32> to vector<8x32xf32>
    %cst_77 = arith.constant dense<0.000000e+00> : vector<64x32xf32>
    %80 = tpu.matmul %78, %79, %cst_77 {dimension_numbers = #tpu.dot_dimension_numbers<[1], [0], [0], [1], [0, 0, 1, 1], [], []>} : vector<64x8xf32>, vector<8x32xf32>, vector<64x32xf32> -> vector<64x32xf32>
    %81 = arith.addf %60, %80 : vector<64x32xf32>
    %82 = vector.extract_strided_slice %36 {offsets = [0, 16], sizes = [64, 8], strides = [1, 1]} : vector<64x32xf32> to vector<64x8xf32>
    %cst_78 = arith.constant 0.353553385 : f32
    %83 = vector.broadcast %cst_78 : f32 to vector<64x8xf32>
    %84 = arith.mulf %82, %83 : vector<64x8xf32>
    %85 = vector.extract_strided_slice %37 {offsets = [0, 16], sizes = [64, 8], strides = [1, 1]} : vector<64x32xf32> to vector<64x8xf32>
    %cst_79 = arith.constant dense<0.000000e+00> : vector<64x64xf32>
    %86 = tpu.matmul %84, %85, %cst_79 {dimension_numbers = #tpu.dot_dimension_numbers<[1], [1], [0], [0], [0, 0, 1, 0], [], []>} : vector<64x8xf32>, vector<64x8xf32>, vector<64x64xf32> -> vector<64x64xf32>
    %87 = arith.addf %86, %21 : vector<64x64xf32>
    %cst_80 = arith.constant dense<0xFF800000> : vector<64xf32>
    %88 = vector.multi_reduction <maximumf>, %87, %cst_80 [1] : vector<64x64xf32> to vector<64xf32>
    %89 = vector.shape_cast %88 : vector<64xf32> to vector<64x1xf32>
    %90 = vector.broadcast %89 : vector<64x1xf32> to vector<64x64xf32>
    %91 = arith.subf %87, %90 : vector<64x64xf32>
    %92 = math.exp %91 : vector<64x64xf32>
    %cst_81 = arith.constant dense<0.000000e+00> : vector<64xf32>
    %93 = vector.multi_reduction <add>, %92, %cst_81 [1] : vector<64x64xf32> to vector<64xf32>
    %94 = vector.shape_cast %93 : vector<64xf32> to vector<64x1xf32>
    %95 = tpu.reciprocal %94 {approx = true} : vector<64x1xf32> -> vector<64x1xf32>
    %96 = vector.broadcast %95 : vector<64x1xf32> to vector<64x64xf32>
    %97 = arith.mulf %92, %96 : vector<64x64xf32>
    %98 = vector.extract_strided_slice %38 {offsets = [0, 16], sizes = [64, 8], strides = [1, 1]} : vector<64x32xf32> to vector<64x8xf32>
    %cst_82 = arith.constant dense<0.000000e+00> : vector<64x8xf32>
    %99 = tpu.matmul %97, %98, %cst_82 {dimension_numbers = #tpu.dot_dimension_numbers<[1], [0], [0], [1], [0, 0, 1, 1], [], []>} : vector<64x64xf32>, vector<64x8xf32>, vector<64x8xf32> -> vector<64x8xf32>
    %100 = vector.extract_strided_slice %2 {offsets = [16, 0], sizes = [8, 32], strides = [1, 1]} : vector<32x32xf32> to vector<8x32xf32>
    %cst_83 = arith.constant dense<0.000000e+00> : vector<64x32xf32>
    %101 = tpu.matmul %99, %100, %cst_83 {dimension_numbers = #tpu.dot_dimension_numbers<[1], [0], [0], [1], [0, 0, 1, 1], [], []>} : vector<64x8xf32>, vector<8x32xf32>, vector<64x32xf32> -> vector<64x32xf32>
    %102 = arith.addf %81, %101 : vector<64x32xf32>
    %103 = vector.extract_strided_slice %36 {offsets = [0, 24], sizes = [64, 8], strides = [1, 1]} : vector<64x32xf32> to vector<64x8xf32>
    %cst_84 = arith.constant 0.353553385 : f32
    %104 = vector.broadcast %cst_84 : f32 to vector<64x8xf32>
    %105 = arith.mulf %103, %104 : vector<64x8xf32>
    %106 = vector.extract_strided_slice %37 {offsets = [0, 24], sizes = [64, 8], strides = [1, 1]} : vector<64x32xf32> to vector<64x8xf32>
    %cst_85 = arith.constant dense<0.000000e+00> : vector<64x64xf32>
    %107 = tpu.matmul %105, %106, %cst_85 {dimension_numbers = #tpu.dot_dimension_numbers<[1], [1], [0], [0], [0, 0, 1, 0], [], []>} : vector<64x8xf32>, vector<64x8xf32>, vector<64x64xf32> -> vector<64x64xf32>
    %108 = arith.addf %107, %21 : vector<64x64xf32>
    %cst_86 = arith.constant dense<0xFF800000> : vector<64xf32>
    %109 = vector.multi_reduction <maximumf>, %108, %cst_86 [1] : vector<64x64xf32> to vector<64xf32>
    %110 = vector.shape_cast %109 : vector<64xf32> to vector<64x1xf32>
    %111 = vector.broadcast %110 : vector<64x1xf32> to vector<64x64xf32>
    %112 = arith.subf %108, %111 : vector<64x64xf32>
    %113 = math.exp %112 : vector<64x64xf32>
    %cst_87 = arith.constant dense<0.000000e+00> : vector<64xf32>
    %114 = vector.multi_reduction <add>, %113, %cst_87 [1] : vector<64x64xf32> to vector<64xf32>
    %115 = vector.shape_cast %114 : vector<64xf32> to vector<64x1xf32>
    %116 = tpu.reciprocal %115 {approx = true} : vector<64x1xf32> -> vector<64x1xf32>
    %117 = vector.broadcast %116 : vector<64x1xf32> to vector<64x64xf32>
    %118 = arith.mulf %113, %117 : vector<64x64xf32>
    %119 = vector.extract_strided_slice %38 {offsets = [0, 24], sizes = [64, 8], strides = [1, 1]} : vector<64x32xf32> to vector<64x8xf32>
    %cst_88 = arith.constant dense<0.000000e+00> : vector<64x8xf32>
    %120 = tpu.matmul %118, %119, %cst_88 {dimension_numbers = #tpu.dot_dimension_numbers<[1], [0], [0], [1], [0, 0, 1, 1], [], []>} : vector<64x64xf32>, vector<64x8xf32>, vector<64x8xf32> -> vector<64x8xf32>
    %121 = vector.extract_strided_slice %2 {offsets = [24, 0], sizes = [8, 32], strides = [1, 1]} : vector<32x32xf32> to vector<8x32xf32>
    %cst_89 = arith.constant dense<0.000000e+00> : vector<64x32xf32>
    %122 = tpu.matmul %120, %121, %cst_89 {dimension_numbers = #tpu.dot_dimension_numbers<[1], [0], [0], [1], [0, 0, 1, 1], [], []>} : vector<64x8xf32>, vector<8x32xf32>, vector<64x32xf32> -> vector<64x32xf32>
    %123 = arith.addf %102, %122 : vector<64x32xf32>
    %124 = vector.broadcast %3 : vector<1x32xf32> to vector<64x32xf32>
    %125 = arith.addf %123, %124 : vector<64x32xf32>
    %cst_90 = arith.constant dense<0.000000e+00> : vector<64x256xf32>
    %126 = tpu.matmul %125, %4, %cst_90 {dimension_numbers = #tpu.dot_dimension_numbers<[1], [0], [0], [1], [0, 0, 1, 1], [], []>} : vector<64x32xf32>, vector<32x256xf32>, vector<64x256xf32> -> vector<64x256xf32>
    %127 = vector.broadcast %5 : vector<1x256xf32> to vector<64x256xf32>
    %128 = arith.addf %126, %127 : vector<64x256xf32>
    %129 = math.tanh %128 : vector<64x256xf32>
    %130 = vector.broadcast %6 : vector<1x256xf32> to vector<64x256xf32>
    %131 = arith.mulf %129, %130 : vector<64x256xf32>
    %cst_91 = arith.constant dense<0.000000e+00> : vector<64xf32>
    %132 = vector.multi_reduction <add>, %131, %cst_91 [1] : vector<64x256xf32> to vector<64xf32>
    %133 = vector.shape_cast %132 : vector<64xf32> to vector<64x1xf32>
    %cst_92 = arith.constant dense<0xFF800000> : vector<1xf32>
    %134 = vector.multi_reduction <maximumf>, %133, %cst_92 [0] : vector<64x1xf32> to vector<1xf32>
    %135 = vector.shape_cast %134 : vector<1xf32> to vector<1x1xf32>
    %136 = vector.broadcast %135 : vector<1x1xf32> to vector<64x1xf32>
    %137 = arith.subf %133, %136 : vector<64x1xf32>
    %138 = math.exp %137 : vector<64x1xf32>
    %cst_93 = arith.constant dense<0.000000e+00> : vector<64x1xf32>
    %139 = tpu.matmul %22, %138, %cst_93 {dimension_numbers = #tpu.dot_dimension_numbers<[1], [0], [0], [1], [0, 0, 1, 1], [], []>} : vector<64x64xf32>, vector<64x1xf32>, vector<64x1xf32> -> vector<64x1xf32>
    %140 = tpu.reciprocal %139 {approx = true} : vector<64x1xf32> -> vector<64x1xf32>
    %141 = arith.mulf %138, %140 : vector<64x1xf32>
    %142 = vector.broadcast %141 : vector<64x1xf32> to vector<64x32xf32>
    %143 = arith.mulf %142, %125 : vector<64x32xf32>
    %cst_94 = arith.constant dense<0.000000e+00> : vector<8x32xf32>
    %144 = tpu.matmul %23, %143, %cst_94 {dimension_numbers = #tpu.dot_dimension_numbers<[1], [0], [0], [1], [0, 0, 1, 1], [], []>} : vector<8x64xf32>, vector<64x32xf32>, vector<8x32xf32> -> vector<8x32xf32>
    %c0_95 = arith.constant 0 : index
    %c0_96 = arith.constant 0 : index
    %145 = vector.load %arg2[%c0_95, %c0_96] : memref<48x32xf32, #tpu.memory_space<vmem>>, vector<48x32xf32>
    %cst_97 = arith.constant dense<0.000000e+00> : vector<48x96xf32>
    %146 = tpu.matmul %145, %7, %cst_97 {dimension_numbers = #tpu.dot_dimension_numbers<[1], [0], [0], [1], [0, 0, 1, 1], [], []>} : vector<48x32xf32>, vector<32x96xf32>, vector<48x96xf32> -> vector<48x96xf32>
    %147 = vector.broadcast %8 : vector<1x96xf32> to vector<48x96xf32>
    %148 = arith.addf %146, %147 : vector<48x96xf32>
    %149 = vector.extract_strided_slice %148 {offsets = [0, 0], sizes = [48, 32], strides = [1, 1]} : vector<48x96xf32> to vector<48x32xf32>
    %150 = vector.extract_strided_slice %148 {offsets = [0, 32], sizes = [48, 32], strides = [1, 1]} : vector<48x96xf32> to vector<48x32xf32>
    %151 = vector.extract_strided_slice %148 {offsets = [0, 64], sizes = [48, 32], strides = [1, 1]} : vector<48x96xf32> to vector<48x32xf32>
    %cst_98 = arith.constant 0.000000e+00 : f32
    %152 = vector.broadcast %cst_98 : f32 to vector<48x32xf32>
    %153 = vector.extract_strided_slice %149 {offsets = [0, 0], sizes = [48, 8], strides = [1, 1]} : vector<48x32xf32> to vector<48x8xf32>
    %cst_99 = arith.constant 0.353553385 : f32
    %154 = vector.broadcast %cst_99 : f32 to vector<48x8xf32>
    %155 = arith.mulf %153, %154 : vector<48x8xf32>
    %156 = vector.extract_strided_slice %150 {offsets = [0, 0], sizes = [48, 8], strides = [1, 1]} : vector<48x32xf32> to vector<48x8xf32>
    %cst_100 = arith.constant dense<0.000000e+00> : vector<48x48xf32>
    %157 = tpu.matmul %155, %156, %cst_100 {dimension_numbers = #tpu.dot_dimension_numbers<[1], [1], [0], [0], [0, 0, 1, 0], [], []>} : vector<48x8xf32>, vector<48x8xf32>, vector<48x48xf32> -> vector<48x48xf32>
    %158 = arith.addf %157, %24 : vector<48x48xf32>
    %cst_101 = arith.constant dense<0xFF800000> : vector<48xf32>
    %159 = vector.multi_reduction <maximumf>, %158, %cst_101 [1] : vector<48x48xf32> to vector<48xf32>
    %160 = vector.shape_cast %159 : vector<48xf32> to vector<48x1xf32>
    %161 = vector.broadcast %160 : vector<48x1xf32> to vector<48x48xf32>
    %162 = arith.subf %158, %161 : vector<48x48xf32>
    %163 = math.exp %162 : vector<48x48xf32>
    %cst_102 = arith.constant dense<0.000000e+00> : vector<48xf32>
    %164 = vector.multi_reduction <add>, %163, %cst_102 [1] : vector<48x48xf32> to vector<48xf32>
    %165 = vector.shape_cast %164 : vector<48xf32> to vector<48x1xf32>
    %166 = tpu.reciprocal %165 {approx = true} : vector<48x1xf32> -> vector<48x1xf32>
    %167 = vector.broadcast %166 : vector<48x1xf32> to vector<48x48xf32>
    %168 = arith.mulf %163, %167 : vector<48x48xf32>
    %169 = vector.extract_strided_slice %151 {offsets = [0, 0], sizes = [48, 8], strides = [1, 1]} : vector<48x32xf32> to vector<48x8xf32>
    %cst_103 = arith.constant dense<0.000000e+00> : vector<48x8xf32>
    %170 = tpu.matmul %168, %169, %cst_103 {dimension_numbers = #tpu.dot_dimension_numbers<[1], [0], [0], [1], [0, 0, 1, 1], [], []>} : vector<48x48xf32>, vector<48x8xf32>, vector<48x8xf32> -> vector<48x8xf32>
    %171 = vector.extract_strided_slice %9 {offsets = [0, 0], sizes = [8, 32], strides = [1, 1]} : vector<32x32xf32> to vector<8x32xf32>
    %cst_104 = arith.constant dense<0.000000e+00> : vector<48x32xf32>
    %172 = tpu.matmul %170, %171, %cst_104 {dimension_numbers = #tpu.dot_dimension_numbers<[1], [0], [0], [1], [0, 0, 1, 1], [], []>} : vector<48x8xf32>, vector<8x32xf32>, vector<48x32xf32> -> vector<48x32xf32>
    %173 = arith.addf %152, %172 : vector<48x32xf32>
    %174 = vector.extract_strided_slice %149 {offsets = [0, 8], sizes = [48, 8], strides = [1, 1]} : vector<48x32xf32> to vector<48x8xf32>
    %cst_105 = arith.constant 0.353553385 : f32
    %175 = vector.broadcast %cst_105 : f32 to vector<48x8xf32>
    %176 = arith.mulf %174, %175 : vector<48x8xf32>
    %177 = vector.extract_strided_slice %150 {offsets = [0, 8], sizes = [48, 8], strides = [1, 1]} : vector<48x32xf32> to vector<48x8xf32>
    %cst_106 = arith.constant dense<0.000000e+00> : vector<48x48xf32>
    %178 = tpu.matmul %176, %177, %cst_106 {dimension_numbers = #tpu.dot_dimension_numbers<[1], [1], [0], [0], [0, 0, 1, 0], [], []>} : vector<48x8xf32>, vector<48x8xf32>, vector<48x48xf32> -> vector<48x48xf32>
    %179 = arith.addf %178, %24 : vector<48x48xf32>
    %cst_107 = arith.constant dense<0xFF800000> : vector<48xf32>
    %180 = vector.multi_reduction <maximumf>, %179, %cst_107 [1] : vector<48x48xf32> to vector<48xf32>
    %181 = vector.shape_cast %180 : vector<48xf32> to vector<48x1xf32>
    %182 = vector.broadcast %181 : vector<48x1xf32> to vector<48x48xf32>
    %183 = arith.subf %179, %182 : vector<48x48xf32>
    %184 = math.exp %183 : vector<48x48xf32>
    %cst_108 = arith.constant dense<0.000000e+00> : vector<48xf32>
    %185 = vector.multi_reduction <add>, %184, %cst_108 [1] : vector<48x48xf32> to vector<48xf32>
    %186 = vector.shape_cast %185 : vector<48xf32> to vector<48x1xf32>
    %187 = tpu.reciprocal %186 {approx = true} : vector<48x1xf32> -> vector<48x1xf32>
    %188 = vector.broadcast %187 : vector<48x1xf32> to vector<48x48xf32>
    %189 = arith.mulf %184, %188 : vector<48x48xf32>
    %190 = vector.extract_strided_slice %151 {offsets = [0, 8], sizes = [48, 8], strides = [1, 1]} : vector<48x32xf32> to vector<48x8xf32>
    %cst_109 = arith.constant dense<0.000000e+00> : vector<48x8xf32>
    %191 = tpu.matmul %189, %190, %cst_109 {dimension_numbers = #tpu.dot_dimension_numbers<[1], [0], [0], [1], [0, 0, 1, 1], [], []>} : vector<48x48xf32>, vector<48x8xf32>, vector<48x8xf32> -> vector<48x8xf32>
    %192 = vector.extract_strided_slice %9 {offsets = [8, 0], sizes = [8, 32], strides = [1, 1]} : vector<32x32xf32> to vector<8x32xf32>
    %cst_110 = arith.constant dense<0.000000e+00> : vector<48x32xf32>
    %193 = tpu.matmul %191, %192, %cst_110 {dimension_numbers = #tpu.dot_dimension_numbers<[1], [0], [0], [1], [0, 0, 1, 1], [], []>} : vector<48x8xf32>, vector<8x32xf32>, vector<48x32xf32> -> vector<48x32xf32>
    %194 = arith.addf %173, %193 : vector<48x32xf32>
    %195 = vector.extract_strided_slice %149 {offsets = [0, 16], sizes = [48, 8], strides = [1, 1]} : vector<48x32xf32> to vector<48x8xf32>
    %cst_111 = arith.constant 0.353553385 : f32
    %196 = vector.broadcast %cst_111 : f32 to vector<48x8xf32>
    %197 = arith.mulf %195, %196 : vector<48x8xf32>
    %198 = vector.extract_strided_slice %150 {offsets = [0, 16], sizes = [48, 8], strides = [1, 1]} : vector<48x32xf32> to vector<48x8xf32>
    %cst_112 = arith.constant dense<0.000000e+00> : vector<48x48xf32>
    %199 = tpu.matmul %197, %198, %cst_112 {dimension_numbers = #tpu.dot_dimension_numbers<[1], [1], [0], [0], [0, 0, 1, 0], [], []>} : vector<48x8xf32>, vector<48x8xf32>, vector<48x48xf32> -> vector<48x48xf32>
    %200 = arith.addf %199, %24 : vector<48x48xf32>
    %cst_113 = arith.constant dense<0xFF800000> : vector<48xf32>
    %201 = vector.multi_reduction <maximumf>, %200, %cst_113 [1] : vector<48x48xf32> to vector<48xf32>
    %202 = vector.shape_cast %201 : vector<48xf32> to vector<48x1xf32>
    %203 = vector.broadcast %202 : vector<48x1xf32> to vector<48x48xf32>
    %204 = arith.subf %200, %203 : vector<48x48xf32>
    %205 = math.exp %204 : vector<48x48xf32>
    %cst_114 = arith.constant dense<0.000000e+00> : vector<48xf32>
    %206 = vector.multi_reduction <add>, %205, %cst_114 [1] : vector<48x48xf32> to vector<48xf32>
    %207 = vector.shape_cast %206 : vector<48xf32> to vector<48x1xf32>
    %208 = tpu.reciprocal %207 {approx = true} : vector<48x1xf32> -> vector<48x1xf32>
    %209 = vector.broadcast %208 : vector<48x1xf32> to vector<48x48xf32>
    %210 = arith.mulf %205, %209 : vector<48x48xf32>
    %211 = vector.extract_strided_slice %151 {offsets = [0, 16], sizes = [48, 8], strides = [1, 1]} : vector<48x32xf32> to vector<48x8xf32>
    %cst_115 = arith.constant dense<0.000000e+00> : vector<48x8xf32>
    %212 = tpu.matmul %210, %211, %cst_115 {dimension_numbers = #tpu.dot_dimension_numbers<[1], [0], [0], [1], [0, 0, 1, 1], [], []>} : vector<48x48xf32>, vector<48x8xf32>, vector<48x8xf32> -> vector<48x8xf32>
    %213 = vector.extract_strided_slice %9 {offsets = [16, 0], sizes = [8, 32], strides = [1, 1]} : vector<32x32xf32> to vector<8x32xf32>
    %cst_116 = arith.constant dense<0.000000e+00> : vector<48x32xf32>
    %214 = tpu.matmul %212, %213, %cst_116 {dimension_numbers = #tpu.dot_dimension_numbers<[1], [0], [0], [1], [0, 0, 1, 1], [], []>} : vector<48x8xf32>, vector<8x32xf32>, vector<48x32xf32> -> vector<48x32xf32>
    %215 = arith.addf %194, %214 : vector<48x32xf32>
    %216 = vector.extract_strided_slice %149 {offsets = [0, 24], sizes = [48, 8], strides = [1, 1]} : vector<48x32xf32> to vector<48x8xf32>
    %cst_117 = arith.constant 0.353553385 : f32
    %217 = vector.broadcast %cst_117 : f32 to vector<48x8xf32>
    %218 = arith.mulf %216, %217 : vector<48x8xf32>
    %219 = vector.extract_strided_slice %150 {offsets = [0, 24], sizes = [48, 8], strides = [1, 1]} : vector<48x32xf32> to vector<48x8xf32>
    %cst_118 = arith.constant dense<0.000000e+00> : vector<48x48xf32>
    %220 = tpu.matmul %218, %219, %cst_118 {dimension_numbers = #tpu.dot_dimension_numbers<[1], [1], [0], [0], [0, 0, 1, 0], [], []>} : vector<48x8xf32>, vector<48x8xf32>, vector<48x48xf32> -> vector<48x48xf32>
    %221 = arith.addf %220, %24 : vector<48x48xf32>
    %cst_119 = arith.constant dense<0xFF800000> : vector<48xf32>
    %222 = vector.multi_reduction <maximumf>, %221, %cst_119 [1] : vector<48x48xf32> to vector<48xf32>
    %223 = vector.shape_cast %222 : vector<48xf32> to vector<48x1xf32>
    %224 = vector.broadcast %223 : vector<48x1xf32> to vector<48x48xf32>
    %225 = arith.subf %221, %224 : vector<48x48xf32>
    %226 = math.exp %225 : vector<48x48xf32>
    %cst_120 = arith.constant dense<0.000000e+00> : vector<48xf32>
    %227 = vector.multi_reduction <add>, %226, %cst_120 [1] : vector<48x48xf32> to vector<48xf32>
    %228 = vector.shape_cast %227 : vector<48xf32> to vector<48x1xf32>
    %229 = tpu.reciprocal %228 {approx = true} : vector<48x1xf32> -> vector<48x1xf32>
    %230 = vector.broadcast %229 : vector<48x1xf32> to vector<48x48xf32>
    %231 = arith.mulf %226, %230 : vector<48x48xf32>
    %232 = vector.extract_strided_slice %151 {offsets = [0, 24], sizes = [48, 8], strides = [1, 1]} : vector<48x32xf32> to vector<48x8xf32>
    %cst_121 = arith.constant dense<0.000000e+00> : vector<48x8xf32>
    %233 = tpu.matmul %231, %232, %cst_121 {dimension_numbers = #tpu.dot_dimension_numbers<[1], [0], [0], [1], [0, 0, 1, 1], [], []>} : vector<48x48xf32>, vector<48x8xf32>, vector<48x8xf32> -> vector<48x8xf32>
    %234 = vector.extract_strided_slice %9 {offsets = [24, 0], sizes = [8, 32], strides = [1, 1]} : vector<32x32xf32> to vector<8x32xf32>
    %cst_122 = arith.constant dense<0.000000e+00> : vector<48x32xf32>
    %235 = tpu.matmul %233, %234, %cst_122 {dimension_numbers = #tpu.dot_dimension_numbers<[1], [0], [0], [1], [0, 0, 1, 1], [], []>} : vector<48x8xf32>, vector<8x32xf32>, vector<48x32xf32> -> vector<48x32xf32>
    %236 = arith.addf %215, %235 : vector<48x32xf32>
    %237 = vector.broadcast %10 : vector<1x32xf32> to vector<48x32xf32>
    %238 = arith.addf %236, %237 : vector<48x32xf32>
    %cst_123 = arith.constant dense<0.000000e+00> : vector<48x256xf32>
    %239 = tpu.matmul %238, %11, %cst_123 {dimension_numbers = #tpu.dot_dimension_numbers<[1], [0], [0], [1], [0, 0, 1, 1], [], []>} : vector<48x32xf32>, vector<32x256xf32>, vector<48x256xf32> -> vector<48x256xf32>
    %240 = vector.broadcast %12 : vector<1x256xf32> to vector<48x256xf32>
    %241 = arith.addf %239, %240 : vector<48x256xf32>
    %242 = math.tanh %241 : vector<48x256xf32>
    %243 = vector.broadcast %13 : vector<1x256xf32> to vector<48x256xf32>
    %244 = arith.mulf %242, %243 : vector<48x256xf32>
    %cst_124 = arith.constant dense<0.000000e+00> : vector<48xf32>
    %245 = vector.multi_reduction <add>, %244, %cst_124 [1] : vector<48x256xf32> to vector<48xf32>
    %246 = vector.shape_cast %245 : vector<48xf32> to vector<48x1xf32>
    %cst_125 = arith.constant dense<0xFF800000> : vector<1xf32>
    %247 = vector.multi_reduction <maximumf>, %246, %cst_125 [0] : vector<48x1xf32> to vector<1xf32>
    %248 = vector.shape_cast %247 : vector<1xf32> to vector<1x1xf32>
    %249 = vector.broadcast %248 : vector<1x1xf32> to vector<48x1xf32>
    %250 = arith.subf %246, %249 : vector<48x1xf32>
    %251 = math.exp %250 : vector<48x1xf32>
    %cst_126 = arith.constant dense<0.000000e+00> : vector<48x1xf32>
    %252 = tpu.matmul %25, %251, %cst_126 {dimension_numbers = #tpu.dot_dimension_numbers<[1], [0], [0], [1], [0, 0, 1, 1], [], []>} : vector<48x48xf32>, vector<48x1xf32>, vector<48x1xf32> -> vector<48x1xf32>
    %253 = tpu.reciprocal %252 {approx = true} : vector<48x1xf32> -> vector<48x1xf32>
    %254 = arith.mulf %251, %253 : vector<48x1xf32>
    %255 = vector.broadcast %254 : vector<48x1xf32> to vector<48x32xf32>
    %256 = arith.mulf %255, %238 : vector<48x32xf32>
    %cst_127 = arith.constant dense<0.000000e+00> : vector<6x32xf32>
    %257 = tpu.matmul %26, %256, %cst_127 {dimension_numbers = #tpu.dot_dimension_numbers<[1], [0], [0], [1], [0, 0, 1, 1], [], []>} : vector<6x48xf32>, vector<48x32xf32>, vector<6x32xf32> -> vector<6x32xf32>
    %cst_128 = arith.constant dense<0.000000e+00> : vector<8x96xf32>
    %258 = tpu.matmul %144, %14, %cst_128 {dimension_numbers = #tpu.dot_dimension_numbers<[1], [0], [0], [1], [0, 0, 1, 1], [], []>} : vector<8x32xf32>, vector<32x96xf32>, vector<8x96xf32> -> vector<8x96xf32>
    %259 = vector.broadcast %15 : vector<1x96xf32> to vector<8x96xf32>
    %260 = arith.addf %258, %259 : vector<8x96xf32>
    %261 = vector.extract_strided_slice %260 {offsets = [0, 0], sizes = [8, 32], strides = [1, 1]} : vector<8x96xf32> to vector<8x32xf32>
    %262 = vector.extract_strided_slice %260 {offsets = [0, 32], sizes = [8, 32], strides = [1, 1]} : vector<8x96xf32> to vector<8x32xf32>
    %263 = vector.extract_strided_slice %260 {offsets = [0, 64], sizes = [8, 32], strides = [1, 1]} : vector<8x96xf32> to vector<8x32xf32>
    %cst_129 = arith.constant 0.000000e+00 : f32
    %264 = vector.broadcast %cst_129 : f32 to vector<8x32xf32>
    %265 = vector.extract_strided_slice %261 {offsets = [0, 0], sizes = [8, 8], strides = [1, 1]} : vector<8x32xf32> to vector<8x8xf32>
    %cst_130 = arith.constant 0.353553385 : f32
    %266 = vector.broadcast %cst_130 : f32 to vector<8x8xf32>
    %267 = arith.mulf %265, %266 : vector<8x8xf32>
    %268 = vector.extract_strided_slice %262 {offsets = [0, 0], sizes = [8, 8], strides = [1, 1]} : vector<8x32xf32> to vector<8x8xf32>
    %cst_131 = arith.constant dense<0.000000e+00> : vector<8x8xf32>
    %269 = tpu.matmul %267, %268, %cst_131 {dimension_numbers = #tpu.dot_dimension_numbers<[1], [1], [0], [0], [0, 0, 1, 0], [], []>} : vector<8x8xf32>, vector<8x8xf32>, vector<8x8xf32> -> vector<8x8xf32>
    %270 = arith.addf %269, %27 : vector<8x8xf32>
    %cst_132 = arith.constant dense<0xFF800000> : vector<8xf32>
    %271 = vector.multi_reduction <maximumf>, %270, %cst_132 [1] : vector<8x8xf32> to vector<8xf32>
    %272 = vector.shape_cast %271 : vector<8xf32> to vector<8x1xf32>
    %273 = vector.broadcast %272 : vector<8x1xf32> to vector<8x8xf32>
    %274 = arith.subf %270, %273 : vector<8x8xf32>
    %275 = math.exp %274 : vector<8x8xf32>
    %cst_133 = arith.constant dense<0.000000e+00> : vector<8xf32>
    %276 = vector.multi_reduction <add>, %275, %cst_133 [1] : vector<8x8xf32> to vector<8xf32>
    %277 = vector.shape_cast %276 : vector<8xf32> to vector<8x1xf32>
    %278 = tpu.reciprocal %277 {approx = true} : vector<8x1xf32> -> vector<8x1xf32>
    %279 = vector.broadcast %278 : vector<8x1xf32> to vector<8x8xf32>
    %280 = arith.mulf %275, %279 : vector<8x8xf32>
    %281 = vector.extract_strided_slice %263 {offsets = [0, 0], sizes = [8, 8], strides = [1, 1]} : vector<8x32xf32> to vector<8x8xf32>
    %cst_134 = arith.constant dense<0.000000e+00> : vector<8x8xf32>
    %282 = tpu.matmul %280, %281, %cst_134 {dimension_numbers = #tpu.dot_dimension_numbers<[1], [0], [0], [1], [0, 0, 1, 1], [], []>} : vector<8x8xf32>, vector<8x8xf32>, vector<8x8xf32> -> vector<8x8xf32>
    %283 = vector.extract_strided_slice %16 {offsets = [0, 0], sizes = [8, 32], strides = [1, 1]} : vector<32x32xf32> to vector<8x32xf32>
    %cst_135 = arith.constant dense<0.000000e+00> : vector<8x32xf32>
    %284 = tpu.matmul %282, %283, %cst_135 {dimension_numbers = #tpu.dot_dimension_numbers<[1], [0], [0], [1], [0, 0, 1, 1], [], []>} : vector<8x8xf32>, vector<8x32xf32>, vector<8x32xf32> -> vector<8x32xf32>
    %285 = arith.addf %264, %284 : vector<8x32xf32>
    %286 = vector.extract_strided_slice %261 {offsets = [0, 8], sizes = [8, 8], strides = [1, 1]} : vector<8x32xf32> to vector<8x8xf32>
    %cst_136 = arith.constant 0.353553385 : f32
    %287 = vector.broadcast %cst_136 : f32 to vector<8x8xf32>
    %288 = arith.mulf %286, %287 : vector<8x8xf32>
    %289 = vector.extract_strided_slice %262 {offsets = [0, 8], sizes = [8, 8], strides = [1, 1]} : vector<8x32xf32> to vector<8x8xf32>
    %cst_137 = arith.constant dense<0.000000e+00> : vector<8x8xf32>
    %290 = tpu.matmul %288, %289, %cst_137 {dimension_numbers = #tpu.dot_dimension_numbers<[1], [1], [0], [0], [0, 0, 1, 0], [], []>} : vector<8x8xf32>, vector<8x8xf32>, vector<8x8xf32> -> vector<8x8xf32>
    %291 = arith.addf %290, %27 : vector<8x8xf32>
    %cst_138 = arith.constant dense<0xFF800000> : vector<8xf32>
    %292 = vector.multi_reduction <maximumf>, %291, %cst_138 [1] : vector<8x8xf32> to vector<8xf32>
    %293 = vector.shape_cast %292 : vector<8xf32> to vector<8x1xf32>
    %294 = vector.broadcast %293 : vector<8x1xf32> to vector<8x8xf32>
    %295 = arith.subf %291, %294 : vector<8x8xf32>
    %296 = math.exp %295 : vector<8x8xf32>
    %cst_139 = arith.constant dense<0.000000e+00> : vector<8xf32>
    %297 = vector.multi_reduction <add>, %296, %cst_139 [1] : vector<8x8xf32> to vector<8xf32>
    %298 = vector.shape_cast %297 : vector<8xf32> to vector<8x1xf32>
    %299 = tpu.reciprocal %298 {approx = true} : vector<8x1xf32> -> vector<8x1xf32>
    %300 = vector.broadcast %299 : vector<8x1xf32> to vector<8x8xf32>
    %301 = arith.mulf %296, %300 : vector<8x8xf32>
    %302 = vector.extract_strided_slice %263 {offsets = [0, 8], sizes = [8, 8], strides = [1, 1]} : vector<8x32xf32> to vector<8x8xf32>
    %cst_140 = arith.constant dense<0.000000e+00> : vector<8x8xf32>
    %303 = tpu.matmul %301, %302, %cst_140 {dimension_numbers = #tpu.dot_dimension_numbers<[1], [0], [0], [1], [0, 0, 1, 1], [], []>} : vector<8x8xf32>, vector<8x8xf32>, vector<8x8xf32> -> vector<8x8xf32>
    %304 = vector.extract_strided_slice %16 {offsets = [8, 0], sizes = [8, 32], strides = [1, 1]} : vector<32x32xf32> to vector<8x32xf32>
    %cst_141 = arith.constant dense<0.000000e+00> : vector<8x32xf32>
    %305 = tpu.matmul %303, %304, %cst_141 {dimension_numbers = #tpu.dot_dimension_numbers<[1], [0], [0], [1], [0, 0, 1, 1], [], []>} : vector<8x8xf32>, vector<8x32xf32>, vector<8x32xf32> -> vector<8x32xf32>
    %306 = arith.addf %285, %305 : vector<8x32xf32>
    %307 = vector.extract_strided_slice %261 {offsets = [0, 16], sizes = [8, 8], strides = [1, 1]} : vector<8x32xf32> to vector<8x8xf32>
    %cst_142 = arith.constant 0.353553385 : f32
    %308 = vector.broadcast %cst_142 : f32 to vector<8x8xf32>
    %309 = arith.mulf %307, %308 : vector<8x8xf32>
    %310 = vector.extract_strided_slice %262 {offsets = [0, 16], sizes = [8, 8], strides = [1, 1]} : vector<8x32xf32> to vector<8x8xf32>
    %cst_143 = arith.constant dense<0.000000e+00> : vector<8x8xf32>
    %311 = tpu.matmul %309, %310, %cst_143 {dimension_numbers = #tpu.dot_dimension_numbers<[1], [1], [0], [0], [0, 0, 1, 0], [], []>} : vector<8x8xf32>, vector<8x8xf32>, vector<8x8xf32> -> vector<8x8xf32>
    %312 = arith.addf %311, %27 : vector<8x8xf32>
    %cst_144 = arith.constant dense<0xFF800000> : vector<8xf32>
    %313 = vector.multi_reduction <maximumf>, %312, %cst_144 [1] : vector<8x8xf32> to vector<8xf32>
    %314 = vector.shape_cast %313 : vector<8xf32> to vector<8x1xf32>
    %315 = vector.broadcast %314 : vector<8x1xf32> to vector<8x8xf32>
    %316 = arith.subf %312, %315 : vector<8x8xf32>
    %317 = math.exp %316 : vector<8x8xf32>
    %cst_145 = arith.constant dense<0.000000e+00> : vector<8xf32>
    %318 = vector.multi_reduction <add>, %317, %cst_145 [1] : vector<8x8xf32> to vector<8xf32>
    %319 = vector.shape_cast %318 : vector<8xf32> to vector<8x1xf32>
    %320 = tpu.reciprocal %319 {approx = true} : vector<8x1xf32> -> vector<8x1xf32>
    %321 = vector.broadcast %320 : vector<8x1xf32> to vector<8x8xf32>
    %322 = arith.mulf %317, %321 : vector<8x8xf32>
    %323 = vector.extract_strided_slice %263 {offsets = [0, 16], sizes = [8, 8], strides = [1, 1]} : vector<8x32xf32> to vector<8x8xf32>
    %cst_146 = arith.constant dense<0.000000e+00> : vector<8x8xf32>
    %324 = tpu.matmul %322, %323, %cst_146 {dimension_numbers = #tpu.dot_dimension_numbers<[1], [0], [0], [1], [0, 0, 1, 1], [], []>} : vector<8x8xf32>, vector<8x8xf32>, vector<8x8xf32> -> vector<8x8xf32>
    %325 = vector.extract_strided_slice %16 {offsets = [16, 0], sizes = [8, 32], strides = [1, 1]} : vector<32x32xf32> to vector<8x32xf32>
    %cst_147 = arith.constant dense<0.000000e+00> : vector<8x32xf32>
    %326 = tpu.matmul %324, %325, %cst_147 {dimension_numbers = #tpu.dot_dimension_numbers<[1], [0], [0], [1], [0, 0, 1, 1], [], []>} : vector<8x8xf32>, vector<8x32xf32>, vector<8x32xf32> -> vector<8x32xf32>
    %327 = arith.addf %306, %326 : vector<8x32xf32>
    %328 = vector.extract_strided_slice %261 {offsets = [0, 24], sizes = [8, 8], strides = [1, 1]} : vector<8x32xf32> to vector<8x8xf32>
    %cst_148 = arith.constant 0.353553385 : f32
    %329 = vector.broadcast %cst_148 : f32 to vector<8x8xf32>
    %330 = arith.mulf %328, %329 : vector<8x8xf32>
    %331 = vector.extract_strided_slice %262 {offsets = [0, 24], sizes = [8, 8], strides = [1, 1]} : vector<8x32xf32> to vector<8x8xf32>
    %cst_149 = arith.constant dense<0.000000e+00> : vector<8x8xf32>
    %332 = tpu.matmul %330, %331, %cst_149 {dimension_numbers = #tpu.dot_dimension_numbers<[1], [1], [0], [0], [0, 0, 1, 0], [], []>} : vector<8x8xf32>, vector<8x8xf32>, vector<8x8xf32> -> vector<8x8xf32>
    %333 = arith.addf %332, %27 : vector<8x8xf32>
    %cst_150 = arith.constant dense<0xFF800000> : vector<8xf32>
    %334 = vector.multi_reduction <maximumf>, %333, %cst_150 [1] : vector<8x8xf32> to vector<8xf32>
    %335 = vector.shape_cast %334 : vector<8xf32> to vector<8x1xf32>
    %336 = vector.broadcast %335 : vector<8x1xf32> to vector<8x8xf32>
    %337 = arith.subf %333, %336 : vector<8x8xf32>
    %338 = math.exp %337 : vector<8x8xf32>
    %cst_151 = arith.constant dense<0.000000e+00> : vector<8xf32>
    %339 = vector.multi_reduction <add>, %338, %cst_151 [1] : vector<8x8xf32> to vector<8xf32>
    %340 = vector.shape_cast %339 : vector<8xf32> to vector<8x1xf32>
    %341 = tpu.reciprocal %340 {approx = true} : vector<8x1xf32> -> vector<8x1xf32>
    %342 = vector.broadcast %341 : vector<8x1xf32> to vector<8x8xf32>
    %343 = arith.mulf %338, %342 : vector<8x8xf32>
    %344 = vector.extract_strided_slice %263 {offsets = [0, 24], sizes = [8, 8], strides = [1, 1]} : vector<8x32xf32> to vector<8x8xf32>
    %cst_152 = arith.constant dense<0.000000e+00> : vector<8x8xf32>
    %345 = tpu.matmul %343, %344, %cst_152 {dimension_numbers = #tpu.dot_dimension_numbers<[1], [0], [0], [1], [0, 0, 1, 1], [], []>} : vector<8x8xf32>, vector<8x8xf32>, vector<8x8xf32> -> vector<8x8xf32>
    %346 = vector.extract_strided_slice %16 {offsets = [24, 0], sizes = [8, 32], strides = [1, 1]} : vector<32x32xf32> to vector<8x32xf32>
    %cst_153 = arith.constant dense<0.000000e+00> : vector<8x32xf32>
    %347 = tpu.matmul %345, %346, %cst_153 {dimension_numbers = #tpu.dot_dimension_numbers<[1], [0], [0], [1], [0, 0, 1, 1], [], []>} : vector<8x8xf32>, vector<8x32xf32>, vector<8x32xf32> -> vector<8x32xf32>
    %348 = arith.addf %327, %347 : vector<8x32xf32>
    %349 = vector.broadcast %17 : vector<1x32xf32> to vector<8x32xf32>
    %350 = arith.addf %348, %349 : vector<8x32xf32>
    %cst_154 = arith.constant dense<0.000000e+00> : vector<8x256xf32>
    %351 = tpu.matmul %350, %18, %cst_154 {dimension_numbers = #tpu.dot_dimension_numbers<[1], [0], [0], [1], [0, 0, 1, 1], [], []>} : vector<8x32xf32>, vector<32x256xf32>, vector<8x256xf32> -> vector<8x256xf32>
    %352 = vector.broadcast %19 : vector<1x256xf32> to vector<8x256xf32>
    %353 = arith.addf %351, %352 : vector<8x256xf32>
    %354 = math.tanh %353 : vector<8x256xf32>
    %355 = vector.broadcast %20 : vector<1x256xf32> to vector<8x256xf32>
    %356 = arith.mulf %354, %355 : vector<8x256xf32>
    %cst_155 = arith.constant dense<0.000000e+00> : vector<8xf32>
    %357 = vector.multi_reduction <add>, %356, %cst_155 [1] : vector<8x256xf32> to vector<8xf32>
    %358 = vector.shape_cast %357 : vector<8xf32> to vector<8x1xf32>
    %cst_156 = arith.constant dense<0xFF800000> : vector<1xf32>
    %359 = vector.multi_reduction <maximumf>, %358, %cst_156 [0] : vector<8x1xf32> to vector<1xf32>
    %360 = vector.shape_cast %359 : vector<1xf32> to vector<1x1xf32>
    %361 = vector.broadcast %360 : vector<1x1xf32> to vector<8x1xf32>
    %362 = arith.subf %358, %361 : vector<8x1xf32>
    %363 = math.exp %362 : vector<8x1xf32>
    %cst_157 = arith.constant dense<0.000000e+00> : vector<8x1xf32>
    %364 = tpu.matmul %28, %363, %cst_157 {dimension_numbers = #tpu.dot_dimension_numbers<[1], [0], [0], [1], [0, 0, 1, 1], [], []>} : vector<8x8xf32>, vector<8x1xf32>, vector<8x1xf32> -> vector<8x1xf32>
    %365 = tpu.reciprocal %364 {approx = true} : vector<8x1xf32> -> vector<8x1xf32>
    %366 = arith.mulf %363, %365 : vector<8x1xf32>
    %367 = vector.broadcast %366 : vector<8x1xf32> to vector<8x32xf32>
    %368 = arith.mulf %367, %350 : vector<8x32xf32>
    %cst_158 = arith.constant dense<0.000000e+00> : vector<2x32xf32>
    %369 = tpu.matmul %29, %368, %cst_158 {dimension_numbers = #tpu.dot_dimension_numbers<[1], [0], [0], [1], [0, 0, 1, 1], [], []>} : vector<2x8xf32>, vector<8x32xf32>, vector<2x32xf32> -> vector<2x32xf32>
    %cst_159 = arith.constant dense<0.000000e+00> : vector<2x6xf32>
    %370 = tpu.matmul %369, %257, %cst_159 {dimension_numbers = #tpu.dot_dimension_numbers<[1], [1], [0], [0], [0, 0, 1, 0], [], []>} : vector<2x32xf32>, vector<6x32xf32>, vector<2x6xf32> -> vector<2x6xf32>
    %371 = arith.mulf %370, %30 : vector<2x6xf32>
    %cst_160 = arith.constant dense<0.000000e+00> : vector<2x128xf32>
    %372 = tpu.matmul %371, %31, %cst_160 {dimension_numbers = #tpu.dot_dimension_numbers<[1], [0], [0], [1], [0, 0, 1, 1], [], []>} : vector<2x6xf32>, vector<6x128xf32>, vector<2x128xf32> -> vector<2x128xf32>
    %c0_161 = arith.constant 0 : index
    %c0_162 = arith.constant 0 : index
    %373 = vector.load %arg35[%c0_161, %c0_162] : memref<2x128xf32, #tpu.memory_space<vmem>>, vector<2x128xf32>
    tpu.vector_store %arg35[%c0_161, %c0_162], %372 {strides = array<i32>} : memref<2x128xf32, #tpu.memory_space<vmem>>, vector<2x128xf32>,
    return
  }
  func.func @transform_0(%arg0: i32) -> (i32, i32) {
    %c0_i32 = arith.constant 0 : i32
    %c0_i32_0 = arith.constant 0 : i32
    return %arg0, %c0_i32 : i32, i32
  }
  func.func @transform_1(%arg0: i32) -> (i32, i32) {
    %c0_i32 = arith.constant 0 : i32
    %c0_i32_0 = arith.constant 0 : i32
    return %arg0, %c0_i32 : i32, i32
  }
  func.func @transform_2(%arg0: i32) -> (i32, i32) {
    %c0_i32 = arith.constant 0 : i32
    %c0_i32_0 = arith.constant 0 : i32
    %c0_i32_1 = arith.constant 0 : i32
    return %c0_i32, %c0_i32_0 : i32, i32
  }
  func.func @transform_3(%arg0: i32) -> (i32, i32) {
    %c0_i32 = arith.constant 0 : i32
    %c0_i32_0 = arith.constant 0 : i32
    %c0_i32_1 = arith.constant 0 : i32
    return %c0_i32, %c0_i32_0 : i32, i32
  }
  func.func @transform_4(%arg0: i32) -> (i32, i32) {
    %c0_i32 = arith.constant 0 : i32
    %c0_i32_0 = arith.constant 0 : i32
    %c0_i32_1 = arith.constant 0 : i32
    return %c0_i32, %c0_i32_0 : i32, i32
  }
  func.func @transform_5(%arg0: i32) -> (i32, i32) {
    %c0_i32 = arith.constant 0 : i32
    %c0_i32_0 = arith.constant 0 : i32
    %c0_i32_1 = arith.constant 0 : i32
    return %c0_i32, %c0_i32_0 : i32, i32
  }
  func.func @transform_6(%arg0: i32) -> (i32, i32) {
    %c0_i32 = arith.constant 0 : i32
    %c0_i32_0 = arith.constant 0 : i32
    %c0_i32_1 = arith.constant 0 : i32
    return %c0_i32, %c0_i32_0 : i32, i32
  }
  func.func @transform_7(%arg0: i32) -> (i32, i32) {
    %c0_i32 = arith.constant 0 : i32
    %c0_i32_0 = arith.constant 0 : i32
    %c0_i32_1 = arith.constant 0 : i32
    return %c0_i32, %c0_i32_0 : i32, i32
  }
  func.func @transform_8(%arg0: i32) -> (i32, i32) {
    %c0_i32 = arith.constant 0 : i32
    %c0_i32_0 = arith.constant 0 : i32
    %c0_i32_1 = arith.constant 0 : i32
    return %c0_i32, %c0_i32_0 : i32, i32
  }
  func.func @transform_9(%arg0: i32) -> (i32, i32) {
    %c0_i32 = arith.constant 0 : i32
    %c0_i32_0 = arith.constant 0 : i32
    %c0_i32_1 = arith.constant 0 : i32
    return %c0_i32, %c0_i32_0 : i32, i32
  }
  func.func @transform_10(%arg0: i32) -> (i32, i32) {
    %c0_i32 = arith.constant 0 : i32
    %c0_i32_0 = arith.constant 0 : i32
    %c0_i32_1 = arith.constant 0 : i32
    return %c0_i32, %c0_i32_0 : i32, i32
  }
  func.func @transform_11(%arg0: i32) -> (i32, i32) {
    %c0_i32 = arith.constant 0 : i32
    %c0_i32_0 = arith.constant 0 : i32
    %c0_i32_1 = arith.constant 0 : i32
    return %c0_i32, %c0_i32_0 : i32, i32
  }
  func.func @transform_12(%arg0: i32) -> (i32, i32) {
    %c0_i32 = arith.constant 0 : i32
    %c0_i32_0 = arith.constant 0 : i32
    %c0_i32_1 = arith.constant 0 : i32
    return %c0_i32, %c0_i32_0 : i32, i32
  }
  func.func @transform_13(%arg0: i32) -> (i32, i32) {
    %c0_i32 = arith.constant 0 : i32
    %c0_i32_0 = arith.constant 0 : i32
    %c0_i32_1 = arith.constant 0 : i32
    return %c0_i32, %c0_i32_0 : i32, i32
  }
  func.func @transform_14(%arg0: i32) -> (i32, i32) {
    %c0_i32 = arith.constant 0 : i32
    %c0_i32_0 = arith.constant 0 : i32
    %c0_i32_1 = arith.constant 0 : i32
    return %c0_i32, %c0_i32_0 : i32, i32
  }
  func.func @transform_15(%arg0: i32) -> (i32, i32) {
    %c0_i32 = arith.constant 0 : i32
    %c0_i32_0 = arith.constant 0 : i32
    %c0_i32_1 = arith.constant 0 : i32
    return %c0_i32, %c0_i32_0 : i32, i32
  }
  func.func @transform_16(%arg0: i32) -> (i32, i32) {
    %c0_i32 = arith.constant 0 : i32
    %c0_i32_0 = arith.constant 0 : i32
    %c0_i32_1 = arith.constant 0 : i32
    return %c0_i32, %c0_i32_0 : i32, i32
  }
  func.func @transform_17(%arg0: i32) -> (i32, i32) {
    %c0_i32 = arith.constant 0 : i32
    %c0_i32_0 = arith.constant 0 : i32
    %c0_i32_1 = arith.constant 0 : i32
    return %c0_i32, %c0_i32_0 : i32, i32
  }
  func.func @transform_18(%arg0: i32) -> (i32, i32) {
    %c0_i32 = arith.constant 0 : i32
    %c0_i32_0 = arith.constant 0 : i32
    %c0_i32_1 = arith.constant 0 : i32
    return %c0_i32, %c0_i32_0 : i32, i32
  }
  func.func @transform_19(%arg0: i32) -> (i32, i32) {
    %c0_i32 = arith.constant 0 : i32
    %c0_i32_0 = arith.constant 0 : i32
    %c0_i32_1 = arith.constant 0 : i32
    return %c0_i32, %c0_i32_0 : i32, i32
  }
  func.func @transform_20(%arg0: i32) -> (i32, i32) {
    %c0_i32 = arith.constant 0 : i32
    %c0_i32_0 = arith.constant 0 : i32
    %c0_i32_1 = arith.constant 0 : i32
    return %c0_i32, %c0_i32_0 : i32, i32
  }
  func.func @transform_21(%arg0: i32) -> (i32, i32) {
    %c0_i32 = arith.constant 0 : i32
    %c0_i32_0 = arith.constant 0 : i32
    %c0_i32_1 = arith.constant 0 : i32
    return %c0_i32, %c0_i32_0 : i32, i32
  }
  func.func @transform_22(%arg0: i32) -> (i32, i32) {
    %c0_i32 = arith.constant 0 : i32
    %c0_i32_0 = arith.constant 0 : i32
    %c0_i32_1 = arith.constant 0 : i32
    return %c0_i32, %c0_i32_0 : i32, i32
  }
  func.func @transform_23(%arg0: i32) -> (i32, i32) {
    %c0_i32 = arith.constant 0 : i32
    %c0_i32_0 = arith.constant 0 : i32
    %c0_i32_1 = arith.constant 0 : i32
    return %c0_i32, %c0_i32_0 : i32, i32
  }
  func.func @transform_24(%arg0: i32) -> (i32, i32) {
    %c0_i32 = arith.constant 0 : i32
    %c0_i32_0 = arith.constant 0 : i32
    %c0_i32_1 = arith.constant 0 : i32
    return %c0_i32, %c0_i32_0 : i32, i32
  }
  func.func @transform_25(%arg0: i32) -> (i32, i32) {
    %c0_i32 = arith.constant 0 : i32
    %c0_i32_0 = arith.constant 0 : i32
    %c0_i32_1 = arith.constant 0 : i32
    return %c0_i32, %c0_i32_0 : i32, i32
  }
  func.func @transform_26(%arg0: i32) -> (i32, i32) {
    %c0_i32 = arith.constant 0 : i32
    %c0_i32_0 = arith.constant 0 : i32
    %c0_i32_1 = arith.constant 0 : i32
    return %c0_i32, %c0_i32_0 : i32, i32
  }
  func.func @transform_27(%arg0: i32) -> (i32, i32) {
    %c0_i32 = arith.constant 0 : i32
    %c0_i32_0 = arith.constant 0 : i32
    %c0_i32_1 = arith.constant 0 : i32
    return %c0_i32, %c0_i32_0 : i32, i32
  }
  func.func @transform_28(%arg0: i32) -> (i32, i32) {
    %c0_i32 = arith.constant 0 : i32
    %c0_i32_0 = arith.constant 0 : i32
    %c0_i32_1 = arith.constant 0 : i32
    return %c0_i32, %c0_i32_0 : i32, i32
  }
  func.func @transform_29(%arg0: i32) -> (i32, i32) {
    %c0_i32 = arith.constant 0 : i32
    %c0_i32_0 = arith.constant 0 : i32
    %c0_i32_1 = arith.constant 0 : i32
    return %c0_i32, %c0_i32_0 : i32, i32
  }
  func.func @transform_30(%arg0: i32) -> (i32, i32) {
    %c0_i32 = arith.constant 0 : i32
    %c0_i32_0 = arith.constant 0 : i32
    %c0_i32_1 = arith.constant 0 : i32
    return %c0_i32, %c0_i32_0 : i32, i32
  }
  func.func @transform_31(%arg0: i32) -> (i32, i32) {
    %c0_i32 = arith.constant 0 : i32
    %c0_i32_0 = arith.constant 0 : i32
    %c0_i32_1 = arith.constant 0 : i32
    return %c0_i32, %c0_i32_0 : i32, i32
  }
  func.func @transform_32(%arg0: i32) -> (i32, i32) {
    %c0_i32 = arith.constant 0 : i32
    %c0_i32_0 = arith.constant 0 : i32
    %c0_i32_1 = arith.constant 0 : i32
    return %c0_i32, %c0_i32_0 : i32, i32
  }
  func.func @transform_33(%arg0: i32) -> (i32, i32) {
    %c0_i32 = arith.constant 0 : i32
    %c0_i32_0 = arith.constant 0 : i32
    %c0_i32_1 = arith.constant 0 : i32
    return %c0_i32, %c0_i32_0 : i32, i32
  }
  func.func @transform_34(%arg0: i32) -> (i32, i32) {
    %c0_i32 = arith.constant 0 : i32
    %c0_i32_0 = arith.constant 0 : i32
    return %arg0, %c0_i32 : i32, i32
  }
}

</mosaic_0001>

<bundles_post_ra>
// kernel: tpu_custom_call.1
= control target key start
LH: loop header
LB: loop body
LE: loop exit
PB: predicated region body
PF: predicated region fallthrough
CT: control target
= control target key end

     0   :  { %s10370_s6 = smov 1   ;;  %s10371_s10 = smov 2   ;;  %s12306_s0 = inlined_call_operand.smem [shape: u32[35], index: -1, kind: input, shape index: {}] }
   0x1   :  { %s10452_s5 = sld [smem:[%s12306_s0]]   ;;  %s10372_s14 = smov 3  }
   0x2   :  { %s10457_s9 = sld [smem:[%s12306_s0 + %s10370_s6]]   ;;  %s10373_s18 = smov 4  }
   0x3   :  { %s10462_s13 = sld [smem:[%s12306_s0 + %s10371_s10]]   ;;  %s10374_s22 = smov 5  }
   0x4   :  { %s10467_s17 = sld [smem:[%s12306_s0 + %s10372_s14]]   ;;  %s10375_s26 = smov 6  }
   0x5   :  { %s10472_s21 = sld [smem:[%s12306_s0 + %s10373_s18]]   ;;  %s10376_s30 = smov 7  }
   0x6   :  { %s10477_s25 = sld [smem:[%s12306_s0 + %s10374_s22]]   ;;  %s10377_s4 = smov 8  }
   0x7   :  { %12319 = sst [smem:[#allocation51_spill]] %s10452_s5  ;;  %s10378_s10 = smov 9  }
   0x8   :  { %12320 = sst [smem:[#allocation52_spill]] %s10457_s9  ;;  %s10379_s15 = smov 10  }
   0x9   :  { %s10482_s29 = sld [smem:[%s12306_s0 + %s10375_s26]]   ;;  %s10380_s20 = smov 11  }
   0xa   :  { %12321 = sst [smem:[#allocation53_spill]] %s10467_s17  ;;  %s10381_s26 = smov 12  }
   0xb   :  { %s10487_s3 = sld [smem:[%s12306_s0 + %s10376_s30]]   ;;  %s10382_s1 = smov 13  }
   0xc   :  { %s10492_s8 = sld [smem:[%s12306_s0 + %s10377_s4]]   ;;  %s10383_s7 = smov 14  }
   0xd   :  { %s10497_s14 = sld [smem:[%s12306_s0 + %s10378_s10]]   ;;  %s10385_s22 = smov 16  }
   0xe   :  { %s10502_s19 = sld [smem:[%s12306_s0 + %s10379_s15]]   ;;  %s10384_s15 = smov 15  }
   0xf   :  { %12322 = sst [smem:[#allocation54_spill]] %s10482_s29  ;;  %s10386_s28 = smov 17  }
  0x10   :  { %s10507_s24 = sld [smem:[%s12306_s0 + %s10380_s20]]  }
  0x11   :  { %s10512_s30 = sld [smem:[%s12306_s0 + %s10381_s26]]  }
  0x12   :  { %s10517_s6 = sld [smem:[%s12306_s0 + %s10382_s1]]  }
  0x13   :  { %s10522_s12 = sld [smem:[%s12306_s0 + %s10383_s7]]   ;;  %s10387_s7 = smov 18  }
  0x14   :  { %s10527_s20 = sld [smem:[%s12306_s0 + %s10384_s15]]   ;;  %s10388_s15 = smov 19  }
  0x15   :  { %s10532_s27 = sld [smem:[%s12306_s0 + %s10385_s22]]   ;;  %s10389_s22 = smov 20  }
  0x16   :  { %s10537_s4 = sld [smem:[%s12306_s0 + %s10386_s28]]   ;;  %s10390_s28 = smov 21  }
  0x17   :  { %12323 = sst [smem:[#allocation55_spill]] %s10512_s30 }
  0x18   :  { %12324 = sst [smem:[#allocation56_spill]] %s10517_s6 }
  0x19   :  { %s10542_s6 = sld [smem:[%s12306_s0 + %s10387_s7]]   ;;  %s10391_s7 = smov 22  }
  0x1a   :  { %12325 = sst [smem:[#allocation57_spill]] %s10527_s20 }
  0x1b   :  { %s10547_s9 = sld [smem:[%s12306_s0 + %s10388_s15]]   ;;  %s10392_s15 = smov 23  }
  0x1c   :  { %12326 = sst [smem:[#allocation58_spill]] %s10537_s4 }
  0x1d   :  { %s10552_s29 = sld [smem:[%s12306_s0 + %s10389_s22]]   ;;  %s10393_s22 = smov 24  }
  0x1e   :  { %s10557_s17 = sld [smem:[%s12306_s0 + %s10390_s28]]   ;;  %s10394_s28 = smov 25  }
  0x1f   :  { %s10562_s5 = sld [smem:[%s12306_s0 + %s10391_s7]]   ;;  %s10395_s7 = smov 26  }
  0x20   :  { %s10577_s4 = sld [smem:[%s12306_s0 + %s10394_s28]]   ;;  %s10398_s28 = smov 29  }
  0x21   :  { %12327 = sst [smem:[#allocation59_spill]] %s10547_s9 }
  0x22   :  { %s10567_s9 = sld [smem:[%s12306_s0 + %s10392_s15]]   ;;  %s10396_s15 = smov 27  }
  0x23   :  { %12328 = sst [smem:[#allocation60_spill]] %s10552_s29 }
  0x24   :  { %s10572_s29 = sld [smem:[%s12306_s0 + %s10393_s22]]   ;;  %s10397_s22 = smov 28  }
  0x25   :  { %12329 = sst [smem:[#allocation61_spill]] %s10562_s5 }
  0x26   :  { %12331 = sst [smem:[#allocation63_spill]] %s10577_s4 }
  0x27   :  { %s10582_s5 = sld [smem:[%s12306_s0 + %s10395_s7]]   ;;  %s10399_s7 = smov 30  }
  0x28   :  { %12330 = sst [smem:[#allocation62_spill]] %s10567_s9 }
  0x29   :  { %s10587_s9 = sld [smem:[%s12306_s0 + %s10396_s15]]   ;;  %s10400_s15 = smov 31  }
  0x2a   :  { %s10592_s20 = sld [smem:[%s12306_s0 + %s10397_s22]]   ;;  %s10401_s22 = smov 32  }
  0x2b   :  { %s10597_s4 = sld [smem:[%s12306_s0 + %s10398_s28]]   ;;  %s10402_s28 = smov 33  }
  0x2c   :  { %s10607_s30 = sld [smem:[%s12306_s0 + %s10400_s15]]  }
  0x2d   :  { %12332 = sst [smem:[#allocation64_spill]] %s10582_s5 }
  0x2e   :  { %s10602_s5 = sld [smem:[%s12306_s0 + %s10399_s7]]   ;;  %s10403_s7 = smov 34  }
  0x30   :  { %12333 = sst [smem:[#allocation65_spill]] %s10592_s20 }
  0x31   :  { %12334 = sst [smem:[#allocation66_spill]] %s10597_s4 }
  0x32   :  { %s10612_s20 = sld [smem:[%s12306_s0 + %s10401_s22]]  }
  0x33   :  { %s10617_s4 = sld [smem:[%s12306_s0 + %s10402_s28]]  }
  0x34   :  { %12335 = sst [smem:[#allocation67_spill]] %s10602_s5 }
  0x35   :  { %s10622_s5 = sld [smem:[%s12306_s0 + %s10403_s7]]  }
  0x36   :  { %74 = vsyncpa [#allocation3], 0 }
  0x37   :  { %75 = vsyncpa [#allocation6], 0 }
  0x38   :  { %76 = vsyncpa [#allocation9], 0 }
  0x39   :  { %77 = vsyncpa [#allocation12], 0 }
  0x3a   :  { %78 = vsyncpa [#allocation15], 0 }
  0x3b   :  { %79 = vsyncpa [#allocation18], 0 }
  0x3c   :  { %80 = vsyncpa [#allocation21], 0 }
  0x3d   :  { %81 = vsyncpa [#allocation24], 0 }
  0x3e   :  { %82 = vsyncpa [#allocation27], 0 }
  0x3f   :  { %83 = vsyncpa [#allocation30], 0 }
  0x40   :  { %84 = vsyncpa [#allocation33], 0 }
  0x41   :  { %85 = vsyncpa [#allocation36], 0 }
  0x42   :  { %86 = vsyncpa [#allocation4], 0  ;;  %s10404_s15 = smov [#allocation5]   ;;  %s10405_s0 = smov [#allocation8]  }
  0x43   :  { %s110_s16 = sshll.u32 %s10404_s15, 4  ;;  %s135_s18 = sshll.u32 %s10405_s0, 4  ;;  %s111_s16 = int_to_ptr.vmem [resolvable:$true] %s110_s16  ;;  %s136_s18 = int_to_ptr.vmem [resolvable:$true] %s135_s18 }
  0x44   :  { %s9838_s22 = scalar_lea.hbm %s10472_s21, 512 }
  0x45   :  { %p9839_p0 = scmp.ne.s32.totalorder %s10472_s21, %s9838_s22  ;;  %p9842_p1 = scmp.lt.u32.totalorder %s9838_s22, %s10472_s21 }
  0x47   :  { %p9844_p2 = pnand %p9842_p1, %p9839_p0 }
  0x49   :  { %9847 = shalt.err (!%p9844_p2)
}
  0x4a   :  { %s9848_s23 = scalar_lea.vmem %s111_s16, 512  ;;  %p9853_p4 = scmp.lt.s32.totalorder %s111_s16, %s111_s16 }
  0x4b   :  { %p9849_p3 = scmp.ne.s32.totalorder %s111_s16, %s9848_s23  ;;  %p9854_p5 = scmp.lt.s32.totalorder %s9848_s23, %s9848_s23 }
  0x4d   :  { %p9855_p6 = por %p9854_p5, %p9853_p4 }
  0x4f   :  { %p9856_p7 = pnand %p9855_p6, %p9849_p3 }
  0x51   :  { %9859 = shalt.err (!%p9856_p7)
}
  0x52   :  { %s10406_s26 = smov 128   ;;  %s10407_s28 = smov 8  }
  0x53   :  { %116 = dma.hbm_to_vmem [thread:$0]  %s10472_s21, 512, %s111_s16, [#allocation6], %s10406_s26, %s10406_s26, %s10407_s28  }
  0x54   :  { %s9860_s1 = scalar_lea.hbm %s10487_s3, 32 }
  0x55   :  { %p9861_p8 = scmp.ne.s32.totalorder %s10487_s3, %s9860_s1  ;;  %p9864_p9 = scmp.lt.u32.totalorder %s9860_s1, %s10487_s3 }
  0x57   :  { %p9866_p10 = pnand %p9864_p9, %p9861_p8 }
  0x59   :  { %9869 = shalt.err (!%p9866_p10)
}
  0x5a   :  { %s9870_s2 = scalar_lea.vmem %s136_s18, 32  ;;  %p9875_p12 = scmp.lt.s32.totalorder %s136_s18, %s136_s18 }
  0x5b   :  { %p9871_p11 = scmp.ne.s32.totalorder %s136_s18, %s9870_s2  ;;  %p9876_p13 = scmp.lt.s32.totalorder %s9870_s2, %s9870_s2 }
  0x5d   :  { %p9877_p0 = por %p9876_p13, %p9875_p12 }
  0x5f   :  { %p9878_p1 = pnand %p9877_p0, %p9871_p11 }
  0x61   :  { %9881 = shalt.err (!%p9878_p1)
}
  0x62   :  { %138 = dma.hbm_to_vmem [thread:$0]  %s10487_s3, 32, %s136_s18, [#allocation9]  }
  0x63   :  { %s10408_s7 = smov [#allocation11]   ;;  %s10409_s21 = smov [#allocation14]  }
  0x64   :  { %s154_s10 = sshll.u32 %s10408_s7, 4  ;;  %s176_s11 = sshll.u32 %s10409_s21, 4  ;;  %s155_s10 = int_to_ptr.vmem [resolvable:$true] %s154_s10  ;;  %s10635_s11 = int_to_ptr.vmem [resolvable:$true] %s176_s11 }
  0x65   :  { %s9882_s15 = scalar_lea.hbm %s10497_s14, 512 }
  0x66   :  { %p9883_p2 = scmp.ne.s32.totalorder %s10497_s14, %s9882_s15  ;;  %p9886_p3 = scmp.lt.u32.totalorder %s9882_s15, %s10497_s14 }
  0x68   :  { %p9888_p4 = pnand %p9886_p3, %p9883_p2 }
  0x6a   :  { %9891 = shalt.err (!%p9888_p4)
}
  0x6b   :  { %s9892_s16 = scalar_lea.vmem %s155_s10, 512  ;;  %p9897_p6 = scmp.lt.s32.totalorder %s155_s10, %s155_s10 }
  0x6c   :  { %p9893_p5 = scmp.ne.s32.totalorder %s155_s10, %s9892_s16  ;;  %p9898_p7 = scmp.lt.s32.totalorder %s9892_s16, %s9892_s16 }
  0x6e   :  { %p9899_p8 = por %p9898_p7, %p9897_p6 }
  0x70   :  { %p9900_p9 = pnand %p9899_p8, %p9893_p5 }
  0x72   :  { %9903 = shalt.err (!%p9900_p9)
}
  0x73   :  { %160 = dma.hbm_to_vmem [thread:$0]  %s10497_s14, 512, %s155_s10, [#allocation12], %s10406_s26, %s10406_s26, %s10407_s28  }
  0x74   :  { %s9904_s3 = scalar_lea.hbm %s10507_s24, 512 }
  0x75   :  { %p9905_p10 = scmp.ne.s32.totalorder %s10507_s24, %s9904_s3  ;;  %p9908_p11 = scmp.lt.u32.totalorder %s9904_s3, %s10507_s24 }
  0x77   :  { %p9910_p12 = pnand %p9908_p11, %p9905_p10 }
  0x79   :  { %9913 = shalt.err (!%p9910_p12)
}
  0x7a   :  { %s9914_s0 = scalar_lea.vmem %s10635_s11, 512  ;;  %p9919_p0 = scmp.lt.s32.totalorder %s10635_s11, %s10635_s11 }
  0x7b   :  { %p9915_p13 = scmp.ne.s32.totalorder %s10635_s11, %s9914_s0  ;;  %p9920_p1 = scmp.lt.s32.totalorder %s9914_s0, %s9914_s0 }
  0x7d   :  { %p9921_p2 = por %p9920_p1, %p9919_p0 }
  0x7f   :  { %p9922_p3 = pnand %p9921_p2, %p9915_p13 }
  0x81   :  { %9925 = shalt.err (!%p9922_p3)
}
  0x82   :  { %182 = dma.hbm_to_vmem [thread:$0]  %s10507_s24, 512, %s10635_s11, [#allocation15], %s10406_s26, %s10406_s26, %s10407_s28  }
  0x83   :  { %s10410_s14 = smov [#allocation17]   ;;  %s10411_s22 = smov [#allocation20]  }
  0x84   :  { %s201_s18 = sshll.u32 %s10410_s14, 4  ;;  %s220_s23 = sshll.u32 %s10411_s22, 4  ;;  %s202_s18 = int_to_ptr.vmem [resolvable:$true] %s201_s18  ;;  %s10656_s23 = int_to_ptr.vmem [resolvable:$true] %s220_s23 }
  0x85   :  { %s9926_s1 = scalar_lea.hbm %s10522_s12, 32 }
  0x86   :  { %p9927_p4 = scmp.ne.s32.totalorder %s10522_s12, %s9926_s1  ;;  %p9930_p5 = scmp.lt.u32.totalorder %s9926_s1, %s10522_s12 }
  0x88   :  { %p9932_p6 = pnand %p9930_p5, %p9927_p4 }
  0x8a   :  { %9935 = shalt.err (!%p9932_p6)
}
  0x8b   :  { %s9936_s2 = scalar_lea.vmem %s202_s18, 32  ;;  %p9941_p8 = scmp.lt.s32.totalorder %s202_s18, %s202_s18 }
  0x8c   :  { %p9937_p7 = scmp.ne.s32.totalorder %s202_s18, %s9936_s2  ;;  %p9942_p9 = scmp.lt.s32.totalorder %s9936_s2, %s9936_s2 }
  0x8e   :  { %p9943_p10 = por %p9942_p9, %p9941_p8 }
  0x90   :  { %p9944_p11 = pnand %p9943_p10, %p9937_p7 }
  0x92   :  { %9947 = shalt.err (!%p9944_p11)
}
  0x93   :  { %204 = dma.hbm_to_vmem [thread:$0]  %s10522_s12, 32, %s202_s18, [#allocation18]  }
  0x94   :  { %s9948_s24 = scalar_lea.hbm %s10532_s27, 512 }
  0x95   :  { %p9949_p12 = scmp.ne.s32.totalorder %s10532_s27, %s9948_s24  ;;  %p9952_p13 = scmp.lt.u32.totalorder %s9948_s24, %s10532_s27 }
  0x97   :  { %p9954_p0 = pnand %p9952_p13, %p9949_p12 }
  0x99   :  { %9957 = shalt.err (!%p9954_p0)
}
  0x9a   :  { %s9958_s7 = scalar_lea.vmem %s10656_s23, 512  ;;  %p9963_p2 = scmp.lt.s32.totalorder %s10656_s23, %s10656_s23 }
  0x9b   :  { %p9959_p1 = scmp.ne.s32.totalorder %s10656_s23, %s9958_s7  ;;  %p9964_p3 = scmp.lt.s32.totalorder %s9958_s7, %s9958_s7 }
  0x9d   :  { %p9965_p4 = por %p9964_p3, %p9963_p2 }
  0x9f   :  { %p9966_p5 = pnand %p9965_p4, %p9959_p1 }
  0xa1   :  { %9969 = shalt.err (!%p9966_p5)
}
  0xa2   :  { %226 = dma.hbm_to_vmem [thread:$0]  %s10532_s27, 512, %s10656_s23, [#allocation21], %s10406_s26, %s10406_s26, %s10407_s28  }
  0xa3   :  { %s10412_s12 = smov [#allocation23]   ;;  %s10413_s21 = smov [#allocation26]  }
  0xa4   :  { %s242_s10 = sshll.u32 %s10412_s12, 4  ;;  %s267_s11 = sshll.u32 %s10413_s21, 4  ;;  %s243_s10 = int_to_ptr.vmem [resolvable:$true] %s242_s10  ;;  %s268_s11 = int_to_ptr.vmem [resolvable:$true] %s267_s11 }
  0xa5   :  { %s9970_s15 = scalar_lea.hbm %s10542_s6, 512 }
  0xa6   :  { %p9971_p6 = scmp.ne.s32.totalorder %s10542_s6, %s9970_s15  ;;  %p9974_p7 = scmp.lt.u32.totalorder %s9970_s15, %s10542_s6 }
  0xa8   :  { %p9976_p8 = pnand %p9974_p7, %p9971_p6 }
  0xaa   :  { %9979 = shalt.err (!%p9976_p8)
}
  0xab   :  { %s9980_s16 = scalar_lea.vmem %s243_s10, 512  ;;  %p9985_p10 = scmp.lt.s32.totalorder %s243_s10, %s243_s10 }
  0xac   :  { %p9981_p9 = scmp.ne.s32.totalorder %s243_s10, %s9980_s16  ;;  %p9986_p11 = scmp.lt.s32.totalorder %s9980_s16, %s9980_s16 }
  0xae   :  { %p9987_p12 = por %p9986_p11, %p9985_p10 }
  0xb0   :  { %p9988_p13 = pnand %p9987_p12, %p9981_p9 }
  0xb2   :  { %9991 = shalt.err (!%p9988_p13)
}
  0xb3   :  { %248 = dma.hbm_to_vmem [thread:$0]  %s10542_s6, 512, %s243_s10, [#allocation24], %s10406_s26, %s10406_s26, %s10407_s28  }
  0xb4   :  { %s9992_s27 = scalar_lea.hbm %s10557_s17, 32 }
  0xb5   :  { %p9993_p0 = scmp.ne.s32.totalorder %s10557_s17, %s9992_s27  ;;  %p9996_p1 = scmp.lt.u32.totalorder %s9992_s27, %s10557_s17 }
  0xb7   :  { %p9998_p2 = pnand %p9996_p1, %p9993_p0 }
  0xb9   :  { %10001 = shalt.err (!%p9998_p2)
}
  0xba   :  { %s10002_s3 = scalar_lea.vmem %s268_s11, 32  ;;  %p10007_p4 = scmp.lt.s32.totalorder %s268_s11, %s268_s11 }
  0xbb   :  { %p10003_p3 = scmp.ne.s32.totalorder %s268_s11, %s10002_s3  ;;  %p10008_p5 = scmp.lt.s32.totalorder %s10002_s3, %s10002_s3 }
  0xbd   :  { %p10009_p6 = por %p10008_p5, %p10007_p4 }
  0xbf   :  { %p10010_p7 = pnand %p10009_p6, %p10003_p3 }
  0xc1   :  { %10013 = shalt.err (!%p10010_p7)
}
  0xc2   :  { %270 = dma.hbm_to_vmem [thread:$0]  %s10557_s17, 32, %s268_s11, [#allocation27]  }
  0xc3   :  { %s10414_s0 = smov [#allocation29]   ;;  %s10415_s6 = smov [#allocation32]  }
  0xc4   :  { %s288_s14 = sshll.u32 %s10414_s0, 4  ;;  %s314_s18 = sshll.u32 %s10415_s6, 4  ;;  %s289_s14 = int_to_ptr.vmem [resolvable:$true] %s288_s14  ;;  %s10685_s18 = int_to_ptr.vmem [resolvable:$true] %s314_s18 }
  0xc5   :  { %s10014_s22 = scalar_lea.hbm %s10572_s29, 1024 }
  0xc6   :  { %p10015_p8 = scmp.ne.s32.totalorder %s10572_s29, %s10014_s22  ;;  %p10018_p9 = scmp.lt.u32.totalorder %s10014_s22, %s10572_s29 }
  0xc8   :  { %p10020_p10 = pnand %p10018_p9, %p10015_p8 }
  0xca   :  { %10023 = shalt.err (!%p10020_p10)
}
  0xcb   :  { %s10024_s23 = scalar_lea.vmem %s289_s14, 1024  ;;  %p10029_p12 = scmp.lt.s32.totalorder %s289_s14, %s289_s14 }
  0xcc   :  { %p10025_p11 = scmp.ne.s32.totalorder %s289_s14, %s10024_s23  ;;  %p10030_p13 = scmp.lt.s32.totalorder %s10024_s23, %s10024_s23 }
  0xce   :  { %p10031_p0 = por %p10030_p13, %p10029_p12 }
  0xd0   :  { %p10032_p1 = pnand %p10031_p0, %p10025_p11 }
  0xd2   :  { %10035 = shalt.err (!%p10032_p1)
}
  0xd3   :  { %294 = dma.hbm_to_vmem [thread:$0]  %s10572_s29, 1024, %s289_s14, [#allocation30], %s10406_s26, %s10406_s26, %s10407_s28  }
  0xd4   :  { %s10036_s17 = scalar_lea.hbm %s10587_s9, 768 }
  0xd5   :  { %p10037_p2 = scmp.ne.s32.totalorder %s10587_s9, %s10036_s17  ;;  %p10040_p3 = scmp.lt.u32.totalorder %s10036_s17, %s10587_s9 }
  0xd7   :  { %p10042_p4 = pnand %p10040_p3, %p10037_p2 }
  0xd9   :  { %10045 = shalt.err (!%p10042_p4)
}
  0xda   :  { %s10046_s1 = scalar_lea.vmem %s10685_s18, 768  ;;  %p10051_p6 = scmp.lt.s32.totalorder %s10685_s18, %s10685_s18 }
  0xdb   :  { %p10047_p5 = scmp.ne.s32.totalorder %s10685_s18, %s10046_s1  ;;  %p10052_p7 = scmp.lt.s32.totalorder %s10046_s1, %s10046_s1 }
  0xdd   :  { %p10053_p8 = por %p10052_p7, %p10051_p6 }
  0xdf   :  { %p10054_p9 = pnand %p10053_p8, %p10047_p5 }
  0xe1   :  { %10057 = shalt.err (!%p10054_p9)
}
  0xe2   :  { %320 = dma.hbm_to_vmem [thread:$0]  %s10587_s9, 768, %s10685_s18, [#allocation33], %s10406_s26, %s10406_s26, %s10407_s28  }
  0xe3   :  { %s10416_s29 = smov [#allocation2]   ;;  %s10417_s24 = smov [#allocation7]  }
  0xe4   :  { %s96_s2 = sshll.u32 %s10416_s29, 4  ;;  %s123_s7 = sshll.u32 %s10417_s24, 4  ;;  %s97_s2 = int_to_ptr.vmem [resolvable:$true] %s96_s2  ;;  %s124_s7 = int_to_ptr.vmem [resolvable:$true] %s123_s7 }
  0xe5   :  { %s10058_s12 = scalar_lea.hbm %s10462_s13, 512 }
  0xe6   :  { %p10059_p10 = scmp.ne.s32.totalorder %s10462_s13, %s10058_s12  ;;  %p10062_p11 = scmp.lt.u32.totalorder %s10058_s12, %s10462_s13 }
  0xe8   :  { %p10064_p12 = pnand %p10062_p11, %p10059_p10 }
  0xea   :  { %10067 = shalt.err (!%p10064_p12)
}
  0xeb   :  { %s10068_s10 = scalar_lea.vmem %s97_s2, 512  ;;  %p10073_p0 = scmp.lt.s32.totalorder %s97_s2, %s97_s2 }
  0xec   :  { %p10069_p13 = scmp.ne.s32.totalorder %s97_s2, %s10068_s10  ;;  %p10074_p1 = scmp.lt.s32.totalorder %s10068_s10, %s10068_s10 }
  0xee   :  { %p10075_p2 = por %p10074_p1, %p10073_p0 }
  0xf0   :  { %p10076_p3 = pnand %p10075_p2, %p10069_p13 }
  0xf2   :  { %10079 = shalt.err (!%p10076_p3)
}
  0xf3   :  { %102 = dma.hbm_to_vmem [thread:$0]  %s10462_s13, 512, %s97_s2, [#allocation3], %s10406_s26, %s10406_s26, %s10407_s28  }
  0xf4   :  { %s10080_s9 = scalar_lea.hbm %s10477_s25, 16 }
  0xf5   :  { %p10081_p4 = scmp.ne.s32.totalorder %s10477_s25, %s10080_s9  ;;  %p10084_p5 = scmp.lt.u32.totalorder %s10080_s9, %s10477_s25 }
  0xf7   :  { %p10086_p6 = pnand %p10084_p5, %p10081_p4 }
  0xf9   :  { %10089 = shalt.err (!%p10086_p6)
}
  0xfa   :  { %s10090_s21 = scalar_lea.vmem %s124_s7, 16  ;;  %s10094_s11 = scalar_lea.vmem %s124_s7, 32 }
  0xfb   :  { %p10091_p7 = scmp.ne.s32.totalorder %s124_s7, %s10090_s21  ;;  %p10095_p8 = scmp.lt.s32.totalorder %s124_s7, %s124_s7 }
  0xfc   :  { %p10096_p9 = scmp.lt.s32.totalorder %s10094_s11, %s10090_s21 }
  0xfe   :  { %p10097_p10 = por %p10096_p9, %p10095_p8 }
 0x100   :  { %p10098_p11 = pnand %p10097_p10, %p10091_p7 }
 0x102   :  { %10101 = shalt.err (!%p10098_p11)
}
 0x103   :  { %126 = dma.hbm_to_vmem [thread:$0]  %s10477_s25, 16, %s124_s7, [#allocation6]  }
 0x104   :  { %s10418_s15 = smov [#allocation10]   ;;  %s10419_s16 = smov [#allocation13]  }
 0x105   :  { %s145_s13 = sshll.u32 %s10418_s15, 4  ;;  %s167_s27 = sshll.u32 %s10419_s16, 4  ;;  %s146_s13 = int_to_ptr.vmem [resolvable:$true] %s145_s13  ;;  %s168_s27 = int_to_ptr.vmem [resolvable:$true] %s167_s27 }
 0x106   :  { %s10102_s3 = scalar_lea.hbm %s10492_s8, 32 }
 0x107   :  { %p10103_p12 = scmp.ne.s32.totalorder %s10492_s8, %s10102_s3  ;;  %p10106_p13 = scmp.lt.u32.totalorder %s10102_s3, %s10492_s8 }
 0x109   :  { %p10108_p0 = pnand %p10106_p13, %p10103_p12 }
 0x10b   :  { %10111 = shalt.err (!%p10108_p0)
}
 0x10c   :  { %s10112_s0 = scalar_lea.vmem %s146_s13, 32  ;;  %p10117_p2 = scmp.lt.s32.totalorder %s146_s13, %s146_s13 }
 0x10d   :  { %p10113_p1 = scmp.ne.s32.totalorder %s146_s13, %s10112_s0  ;;  %p10118_p3 = scmp.lt.s32.totalorder %s10112_s0, %s10112_s0 }
 0x10f   :  { %p10119_p4 = por %p10118_p3, %p10117_p2 }
 0x111   :  { %p10120_p5 = pnand %p10119_p4, %p10113_p1 }
 0x113   :  { %10123 = shalt.err (!%p10120_p5)
}
 0x114   :  { %148 = dma.hbm_to_vmem [thread:$0]  %s10492_s8, 32, %s146_s13, [#allocation9]  }
 0x115   :  { %s10124_s25 = scalar_lea.hbm %s10502_s19, 16 }
 0x116   :  { %p10125_p6 = scmp.ne.s32.totalorder %s10502_s19, %s10124_s25  ;;  %p10128_p7 = scmp.lt.u32.totalorder %s10124_s25, %s10502_s19 }
 0x118   :  { %p10130_p8 = pnand %p10128_p7, %p10125_p6 }
 0x11a   :  { %10133 = shalt.err (!%p10130_p8)
}
 0x11b   :  { %s10134_s14 = scalar_lea.vmem %s168_s27, 16  ;;  %s10138_s6 = scalar_lea.vmem %s168_s27, 32 }
 0x11c   :  { %p10135_p9 = scmp.ne.s32.totalorder %s168_s27, %s10134_s14  ;;  %p10139_p10 = scmp.lt.s32.totalorder %s168_s27, %s168_s27 }
 0x11d   :  { %p10140_p11 = scmp.lt.s32.totalorder %s10138_s6, %s10134_s14 }
 0x11f   :  { %p10141_p12 = por %p10140_p11, %p10139_p10 }
 0x121   :  { %p10142_p13 = pnand %p10141_p12, %p10135_p9 }
 0x123   :  { %10145 = shalt.err (!%p10142_p13)
}
 0x124   :  { %s12336_s18 = sld [smem:[#allocation55_spill]]  ;;  %s10420_s22 = smov [#allocation16]  }
 0x125   :  { %170 = dma.hbm_to_vmem [thread:$0]  %s10502_s19, 16, %s168_s27, [#allocation12]  }
 0x126   :  { %s189_s8 = sshll.u32 %s10420_s22, 4  ;;  %s10421_s23 = smov [#allocation19]   ;;  %s190_s8 = int_to_ptr.vmem [resolvable:$true] %s189_s8 }
 0x127   :  { %s211_s17 = sshll.u32 %s10421_s23, 4  ;;  %s212_s17 = int_to_ptr.vmem [resolvable:$true] %s211_s17 }
 0x12a   :  { %s10146_s1 = scalar_lea.hbm %s12336_s18, 16 }
 0x12b   :  { %p10147_p0 = scmp.ne.s32.totalorder %s12336_s18, %s10146_s1  ;;  %p10150_p1 = scmp.lt.u32.totalorder %s10146_s1, %s12336_s18 }
 0x12d   :  { %p10152_p2 = pnand %p10150_p1, %p10147_p0 }
 0x12f   :  { %10155 = shalt.err (!%p10152_p2)
}
 0x130   :  { %s10156_s29 = scalar_lea.vmem %s190_s8, 16  ;;  %s10160_s2 = scalar_lea.vmem %s190_s8, 32 }
 0x131   :  { %p10157_p3 = scmp.ne.s32.totalorder %s190_s8, %s10156_s29  ;;  %p10161_p4 = scmp.lt.s32.totalorder %s190_s8, %s190_s8 }
 0x132   :  { %p10162_p5 = scmp.lt.s32.totalorder %s10160_s2, %s10156_s29 }
 0x134   :  { %p10163_p6 = por %p10162_p5, %p10161_p4 }
 0x136   :  { %p10164_p7 = pnand %p10163_p6, %p10157_p3 }
 0x138   :  { %10167 = shalt.err (!%p10164_p7)
}
 0x139   :  { %s12337_s19 = sld [smem:[#allocation57_spill]] }
 0x13a   :  { %192 = dma.hbm_to_vmem [thread:$0]  %s12336_s18, 16, %s190_s8, [#allocation15]  }
 0x13f   :  { %s10168_s24 = scalar_lea.hbm %s12337_s19, 32 }
 0x140   :  { %p10169_p8 = scmp.ne.s32.totalorder %s12337_s19, %s10168_s24  ;;  %p10172_p9 = scmp.lt.u32.totalorder %s10168_s24, %s12337_s19 }
 0x142   :  { %p10174_p10 = pnand %p10172_p9, %p10169_p8 }
 0x144   :  { %10177 = shalt.err (!%p10174_p10)
}
 0x145   :  { %s10178_s7 = scalar_lea.vmem %s212_s17, 32  ;;  %p10183_p12 = scmp.lt.s32.totalorder %s212_s17, %s212_s17 }
 0x146   :  { %p10179_p11 = scmp.ne.s32.totalorder %s212_s17, %s10178_s7  ;;  %p10184_p13 = scmp.lt.s32.totalorder %s10178_s7, %s10178_s7 }
 0x148   :  { %p10185_p0 = por %p10184_p13, %p10183_p12 }
 0x14a   :  { %p10186_p1 = pnand %p10185_p0, %p10179_p11 }
 0x14c   :  { %10189 = shalt.err (!%p10186_p1)
}
 0x14d   :  { %s12338_s12 = sld [smem:[#allocation58_spill]]  ;;  %s10422_s10 = smov [#allocation22]  }
 0x14e   :  { %214 = dma.hbm_to_vmem [thread:$0]  %s12337_s19, 32, %s212_s17, [#allocation18]  }
 0x14f   :  { %s233_s9 = sshll.u32 %s10422_s10, 4  ;;  %s10423_s21 = smov [#allocation25]   ;;  %s234_s9 = int_to_ptr.vmem [resolvable:$true] %s233_s9 }
 0x150   :  { %s255_s11 = sshll.u32 %s10423_s21, 4  ;;  %s256_s11 = int_to_ptr.vmem [resolvable:$true] %s255_s11 }
 0x153   :  { %s10190_s15 = scalar_lea.hbm %s12338_s12, 16 }
 0x154   :  { %p10191_p2 = scmp.ne.s32.totalorder %s12338_s12, %s10190_s15  ;;  %p10194_p3 = scmp.lt.u32.totalorder %s10190_s15, %s12338_s12 }
 0x156   :  { %p10196_p4 = pnand %p10194_p3, %p10191_p2 }
 0x158   :  { %10199 = shalt.err (!%p10196_p4)
}
 0x159   :  { %s10200_s13 = scalar_lea.vmem %s234_s9, 16  ;;  %s10204_s16 = scalar_lea.vmem %s234_s9, 32 }
 0x15a   :  { %p10201_p5 = scmp.ne.s32.totalorder %s234_s9, %s10200_s13  ;;  %p10205_p6 = scmp.lt.s32.totalorder %s234_s9, %s234_s9 }
 0x15b   :  { %p10206_p7 = scmp.lt.s32.totalorder %s10204_s16, %s10200_s13 }
 0x15d   :  { %p10207_p8 = por %p10206_p7, %p10205_p6 }
 0x15f   :  { %p10208_p9 = pnand %p10207_p8, %p10201_p5 }
 0x161   :  { %10211 = shalt.err (!%p10208_p9)
}
 0x162   :  { %s12339_s27 = sld [smem:[#allocation59_spill]] }
 0x163   :  { %236 = dma.hbm_to_vmem [thread:$0]  %s12338_s12, 16, %s234_s9, [#allocation21]  }
 0x168   :  { %s10212_s3 = scalar_lea.hbm %s12339_s27, 16 }
 0x169   :  { %p10213_p10 = scmp.ne.s32.totalorder %s12339_s27, %s10212_s3  ;;  %p10216_p11 = scmp.lt.u32.totalorder %s10212_s3, %s12339_s27 }
 0x16b   :  { %p10218_p12 = pnand %p10216_p11, %p10213_p10 }
 0x16d   :  { %10221 = shalt.err (!%p10218_p12)
}
 0x16e   :  { %s10222_s0 = scalar_lea.vmem %s256_s11, 16  ;;  %s10226_s25 = scalar_lea.vmem %s256_s11, 32 }
 0x16f   :  { %p10223_p13 = scmp.ne.s32.totalorder %s256_s11, %s10222_s0  ;;  %p10227_p0 = scmp.lt.s32.totalorder %s256_s11, %s256_s11 }
 0x170   :  { %p10228_p1 = scmp.lt.s32.totalorder %s10226_s25, %s10222_s0 }
 0x172   :  { %p10229_p2 = por %p10228_p1, %p10227_p0 }
 0x174   :  { %p10230_p3 = pnand %p10229_p2, %p10223_p13 }
 0x176   :  { %10233 = shalt.err (!%p10230_p3)
}
 0x177   :  { %s12340_s14 = sld [smem:[#allocation61_spill]]  ;;  %s10424_s6 = smov [#allocation28]  }
 0x178   :  { %258 = dma.hbm_to_vmem [thread:$0]  %s12339_s27, 16, %s256_s11, [#allocation24]  }
 0x179   :  { %s277_s18 = sshll.u32 %s10424_s6, 4  ;;  %s10425_s22 = smov [#allocation31]   ;;  %s278_s18 = int_to_ptr.vmem [resolvable:$true] %s277_s18 }
 0x17a   :  { %s302_s8 = sshll.u32 %s10425_s22, 4  ;;  %s10741_s8 = int_to_ptr.vmem [resolvable:$true] %s302_s8 }
 0x17d   :  { %s10234_s23 = scalar_lea.hbm %s12340_s14, 32 }
 0x17e   :  { %p10235_p4 = scmp.ne.s32.totalorder %s12340_s14, %s10234_s23  ;;  %p10238_p5 = scmp.lt.u32.totalorder %s10234_s23, %s12340_s14 }
 0x180   :  { %p10240_p6 = pnand %p10238_p5, %p10235_p4 }
 0x182   :  { %10243 = shalt.err (!%p10240_p6)
}
 0x183   :  { %s10244_s17 = scalar_lea.vmem %s278_s18, 32  ;;  %p10249_p8 = scmp.lt.s32.totalorder %s278_s18, %s278_s18 }
 0x184   :  { %p10245_p7 = scmp.ne.s32.totalorder %s278_s18, %s10244_s17  ;;  %p10250_p9 = scmp.lt.s32.totalorder %s10244_s17, %s10244_s17 }
 0x186   :  { %p10251_p10 = por %p10250_p9, %p10249_p8 }
 0x188   :  { %p10252_p11 = pnand %p10251_p10, %p10245_p7 }
 0x18a   :  { %10255 = shalt.err (!%p10252_p11)
}
 0x18b   :  { %s12341_s1 = sld [smem:[#allocation64_spill]] }
 0x18c   :  { %280 = dma.hbm_to_vmem [thread:$0]  %s12340_s14, 32, %s278_s18, [#allocation27]  }
 0x191   :  { %s10256_s29 = scalar_lea.hbm %s12341_s1, 768 }
 0x192   :  { %p10257_p12 = scmp.ne.s32.totalorder %s12341_s1, %s10256_s29  ;;  %p10260_p13 = scmp.lt.u32.totalorder %s10256_s29, %s12341_s1 }
 0x194   :  { %p10262_p0 = pnand %p10260_p13, %p10257_p12 }
 0x196   :  { %10265 = shalt.err (!%p10262_p0)
}
 0x197   :  { %s10266_s2 = scalar_lea.vmem %s10741_s8, 768  ;;  %p10271_p2 = scmp.lt.s32.totalorder %s10741_s8, %s10741_s8 }
 0x198   :  { %p10267_p1 = scmp.ne.s32.totalorder %s10741_s8, %s10266_s2  ;;  %p10272_p3 = scmp.lt.s32.totalorder %s10266_s2, %s10266_s2 }
 0x19a   :  { %p10273_p4 = por %p10272_p3, %p10271_p2 }
 0x19c   :  { %p10274_p5 = pnand %p10273_p4, %p10267_p1 }
 0x19e   :  { %10277 = shalt.err (!%p10274_p5)
}
 0x19f   :  { %308 = dma.hbm_to_vmem [thread:$0]  %s12341_s1, 768, %s10741_s8, [#allocation30], %s10406_s26, %s10406_s26, %s10407_s28  }
 0x1a0   :  { %s10426_s19 = smov [#allocation34]   ;;  %s10427_s7 = smov [#allocation35]  }
 0x1a1   :  { %s333_s24 = sshll.u32 %s10426_s19, 4  ;;  %s343_s12 = sshll.u32 %s10427_s7, 4  ;;  %s334_s24 = int_to_ptr.vmem [resolvable:$true] %s333_s24  ;;  %s344_s12 = int_to_ptr.vmem [resolvable:$true] %s343_s12 }
 0x1a2   :  { %s10278_s10 = scalar_lea.hbm %s10607_s30, 32 }
 0x1a3   :  { %p10279_p6 = scmp.ne.s32.totalorder %s10607_s30, %s10278_s10  ;;  %p10282_p7 = scmp.lt.u32.totalorder %s10278_s10, %s10607_s30 }
 0x1a5   :  { %p10284_p8 = pnand %p10282_p7, %p10279_p6 }
 0x1a7   :  { %10287 = shalt.err (!%p10284_p8)
}
 0x1a8   :  { %s10288_s9 = scalar_lea.vmem %s334_s24, 32  ;;  %p10293_p10 = scmp.lt.s32.totalorder %s334_s24, %s334_s24 }
 0x1a9   :  { %p10289_p9 = scmp.ne.s32.totalorder %s334_s24, %s10288_s9  ;;  %p10294_p11 = scmp.lt.s32.totalorder %s10288_s9, %s10288_s9 }
 0x1ab   :  { %p10295_p12 = por %p10294_p11, %p10293_p10 }
 0x1ad   :  { %p10296_p13 = pnand %p10295_p12, %p10289_p9 }
 0x1af   :  { %10299 = shalt.err (!%p10296_p13)
}
 0x1b0   :  { %336 = dma.hbm_to_vmem [thread:$0]  %s10607_s30, 32, %s334_s24, [#allocation33]  }
 0x1b1   :  { %s10300_s26 = scalar_lea.hbm %s10612_s20, 32 }
 0x1b2   :  { %p10301_p0 = scmp.ne.s32.totalorder %s10612_s20, %s10300_s26  ;;  %p10304_p1 = scmp.lt.u32.totalorder %s10300_s26, %s10612_s20 }
 0x1b4   :  { %p10306_p2 = pnand %p10304_p1, %p10301_p0 }
 0x1b6   :  { %10309 = shalt.err (!%p10306_p2)
}
 0x1b7   :  { %s10310_s28 = scalar_lea.vmem %s344_s12, 32  ;;  %p10315_p4 = scmp.lt.s32.totalorder %s344_s12, %s344_s12 }
 0x1b8   :  { %p10311_p3 = scmp.ne.s32.totalorder %s344_s12, %s10310_s28  ;;  %p10316_p5 = scmp.lt.s32.totalorder %s10310_s28, %s10310_s28 }
 0x1ba   :  { %p10317_p6 = por %p10316_p5, %p10315_p4 }
 0x1bc   :  { %p10318_p7 = pnand %p10317_p6, %p10311_p3 }
 0x1be   :  { %10321 = shalt.err (!%p10318_p7)
}
 0x1bf   :  { %346 = dma.hbm_to_vmem [thread:$0]  %s10612_s20, 32, %s344_s12, [#allocation36]  }
 0x1c0   :  { %10344 = dma.done.wait [#allocation3], 512  }
 0x1c1   :  { %10345 = vsyncadd [#allocation3], 4294966784 }
 0x1c2   :  { %10346 = dma.done.wait [#allocation6], 528  }
 0x1c3   :  { %10347 = vsyncadd [#allocation6], 4294966768 }
 0x1c4   :  { %10348 = dma.done.wait [#allocation9], 64  }
 0x1c5   :  { %10349 = vsyncadd [#allocation9], 4294967232 }
 0x1c6   :  { %10350 = dma.done.wait [#allocation12], 528  }
 0x1c7   :  { %10351 = vsyncadd [#allocation12], 4294966768 }
 0x1c8   :  { %10352 = dma.done.wait [#allocation15], 528  }
 0x1c9   :  { %10353 = vsyncadd [#allocation15], 4294966768 }
 0x1ca   :  { %10354 = dma.done.wait [#allocation18], 64  }
 0x1cb   :  { %10355 = vsyncadd [#allocation18], 4294967232 }
 0x1cc   :  { %10356 = dma.done.wait [#allocation21], 528  }
 0x1cd   :  { %10357 = vsyncadd [#allocation21], 4294966768 }
 0x1ce   :  { %10358 = dma.done.wait [#allocation24], 528  }
 0x1cf   :  { %10359 = vsyncadd [#allocation24], 4294966768 }
 0x1d0   :  { %10360 = dma.done.wait [#allocation27], 64  }
 0x1d1   :  { %10361 = vsyncadd [#allocation27], 4294967232 }
 0x1d2   :  { %10362 = dma.done.wait [#allocation30], 1792  }
 0x1d3   :  { %10363 = vsyncadd [#allocation30], 4294965504 }
 0x1d4   :  { %10364 = dma.done.wait [#allocation33], 800  }
 0x1d5   :  { %10365 = vsyncadd [#allocation33], 4294966496 }
 0x1d6   :  { %10366 = dma.done.wait [#allocation36], 32  }
 0x1d7   :  { %10367 = vsyncadd [#allocation36], 4294967264  ;;  %s12342_s30 = sld [smem:[#allocation51_spill]]  ;;  %vm524_vm0 = vcmask 261120   ;;  %v415_v0 = vld [vmem:[#allocation2] sm:$0xff]  ;;  %v416_v1 = vld [vmem:[#allocation2 + $0x8] sm:$0xff] }
 0x1d8   :  { %v417_v2 = vld [vmem:[#allocation2 + $0x10] sm:$0xff]  ;;  %v8697_v3 = vpack.c.bf16 %v416_v1, %v415_v0  ;;  %v418_v4 = vld [vmem:[#allocation2 + $0x18] sm:$0xff]  ;;  %s12343_s20 = sld [smem:[#allocation53_spill]]  ;;  %vm686_vm1 = vcmask 64512   ;;  %s10428_s21 = smov 96   ;;  %vm832_vm3 = vcmask 523264  }
 0x1d9   :  { %v8701_v6 = vpack.c.bf16 %v418_v4, %v417_v2  ;;  %vm10806_vm2 = vmpackc.low %vm686_vm1, %vm686_vm1  ;;  %s12346_s11 = sld [smem:[#allocation62_spill]]  ;;  %s10429_s15 = smov 64   ;;  %vm10442_vm4 = vmmov 0   ;;  %vm3642_vm5 = vcmask 392192   ;;  %vm7170_vm6 = vcmask 1045504  }
 0x1da   :  { %8698 = vmatprep.subr.bf16.mxu0 %v8697_v3  ;;  %s10430_s13 = smov 88   ;;  %s10431_s16 = smov 120   ;;  %vm7166_vm7 = vcmask 48128  }
 0x1db   :  { %8700 = vmatpush3.bf16.msra.mxu0 %v8697_v3  ;;  %s10432_s27 = smov 80   ;;  %s10433_s3 = smov 112  }
 0x1dc   :  { %8702 = vmatprep.subr.bf16.mxu0 %v8701_v6  ;;  %s10434_s0 = smov 56   ;;  %s10435_s25 = smov 72  }
 0x1dd   :  { %v510_v5 = vld [vmem:[%s12342_s30] sm:$0xff]  ;;  %v511_v7 = vld [vmem:[%s12342_s30 + $0x8] sm:$0xff]  ;;  %v512_v8 = vld [vmem:[%s12342_s30 + $0x10] sm:$0xff]  ;;  %s10436_s14 = smov 104   ;;  %s10437_s6 = smov 48  }
 0x1de   :  { %8002 = vmatprep.mubr.msk.f32.mxu0 %vm524_vm0, %v510_v5  ;;  %v513_v9 = vld [vmem:[%s12342_s30 + $0x18] sm:$0xff]  ;;  %v514_v10 = vld [vmem:[%s12342_s30 + $0x20] sm:$0xff]  ;;  %v515_v11 = vld [vmem:[%s12342_s30 + $0x28] sm:$0xff]  ;;  %s10438_s18 = smov 40   ;;  %s12347_s22 = sld [smem:[#allocation54_spill]] }
 0x1df   :  { %8704 = vmatpush3.bf16.msra.mxu0 %v8701_v6  ;;  %v516_v12 = vld [vmem:[%s12342_s30 + $0x30] sm:$0xff]  ;;  %v517_v13 = vld [vmem:[%s12342_s30 + $0x38] sm:$0xff]  ;;  %v7305_v14 = vld [vmem:[%s12343_s20] ss:$0 sm:$0xff]  ;;  %s12348_s8 = sld [smem:[#allocation63_spill]]  ;;  %s12349_s23 = sld [smem:[#allocation52_spill]] }
 0x1e0   :  { %v10855_v60 = vld [vmem:[%s12346_s11 + $0x8] sm:$0xff]  ;;  %v10858_v61 = vld [vmem:[%s12346_s11] sm:$0xff]  ;;  %v10863_v2 = vld [vmem:[%s12346_s11 + $0x18] sm:$0xff]  ;;  %s12350_s17 = sld [smem:[#allocation56_spill]]  ;;  %s12351_s1 = sld [smem:[#allocation65_spill]] }
 0x1e1   :  { %s12352_s29 = sld [smem:[#allocation66_spill]]  ;;  %s12353_s2 = sld [smem:[#allocation60_spill]] }
 0x1e2   :  { %8003 = vmatmul.mubr.msk.f32.vlgmr.msra.gmra.mrb[0].mxu0 %vm524_vm0, %v511_v7  ;;  %s12354_s19 = sld [smem:[#allocation67_spill]]  ;;  %s10443_s24 = smov [#allocation37]  }
 0x1e3   :  { %8005 = vmatprep.mubr.msk.f32.mxu0 %vm524_vm0, %v512_v8  ;;  %v10871_v8 = vld [vmem:[%s12346_s11 + $0x10] sm:$0xff]  ;;  %s7251_s7 = sshll.u32 %s10443_s24, 4  ;;  %s7252_s7 = int_to_ptr.vmem [resolvable:$true] %s7251_s7 }
 0x1e4   :  { %s10322_s12 = scalar_lea.vmem %s7252_s7, 32  ;;  %p10327_p9 = scmp.lt.s32.totalorder %s7252_s7, %s7252_s7 }
 0x1e5   :  { %p10323_p8 = scmp.ne.s32.totalorder %s7252_s7, %s10322_s12  ;;  %p10328_p10 = scmp.lt.s32.totalorder %s10322_s12, %s10322_s12 }
 0x1e6   :  { %8006 = vmatmul.mubr.msk.f32.gmra.mrb[2].mxu0 %vm524_vm0, %v513_v9 }
 0x1e7   :  { %8008 = vmatprep.mubr.msk.f32.mxu0 %vm524_vm0, %v514_v10  ;;  %p10329_p11 = por %p10328_p10, %p10327_p9 }
 0x1e9   :  { %p10330_p12 = pnand %p10329_p11, %p10323_p8 }
 0x1ea   :  { %8009 = vmatmul.mubr.msk.f32.gmra.mrb[4].mxu0 %vm524_vm0, %v515_v11 }
 0x1eb   :  { %8011 = vmatprep.mubr.msk.f32.mxu0 %vm524_vm0, %v516_v12  ;;  %v10877_v12 = vld [vmem:[%s12346_s11 + $0x28] sm:$0xff] }
 0x1ee   :  { %8012 = vmatmul.mubr.msk.f32.gmra.mrb[6].mxu0 %vm524_vm0, %v517_v13 }
 0x2b5   :  { %v8004_v15 = vpop.f32.mrb[0].mxu0 }
 0x2b6   :  { %v621_v16 = vadd.f32 %v8004_v15, %v7305_v14  ;;  %v615_v17 = vpop.f32.mrb[1].mxu0 }
 0x2b7   :  { %v616_v18 = vadd.f32 %v7305_v14, %v615_v17  ;;  %v10882_v17 = vld [vmem:[%s12346_s11 + $0x38] sm:$0xff] }
 0x2b8   :  { %v10826_v53 = vmul.f32 0.35355338, %v621_v16 }
 0x2b9   :  { %v10784_v19 = vpack.i.bf16 %v621_v16, %v616_v18  ;;  %v10786_v20 = vmul.f32 0.35355338, %v616_v18  ;;  %v8007_v21 = vpop.f32.mrb[2].mxu0 }
 0x2ba   :  { %v631_v22 = vadd.f32 %v8007_v21, %v7305_v14  ;;  %v625_v23 = vpop.f32.mrb[3].mxu0 }
 0x2bb   :  { %9189 = vrot.lane.b32.xlu0 %v10784_v19, %s10428_s21  ;;  %8030 = vmatprep.mubr.msk.f32.mxu1 %vm686_vm1, %v10786_v20  ;;  %v626_v24 = vadd.f32 %v7305_v14, %v625_v23 }
 0x2bc   :  { %v10834_v55 = vmul.f32 0.35355338, %v631_v22 }
 0x2bd   :  { %v10792_v25 = vpack.i.bf16 %v631_v22, %v626_v24  ;;  %v8010_v26 = vpop.f32.mrb[4].mxu0  ;;  %v10828_v54 = vmul.f32 0.35355338, %v626_v24  ;;  %v10895_v24 = vld [vmem:[%s12346_s11 + $0x20] sm:$0xff] }
 0x2be   :  { %v641_v27 = vadd.f32 %v8010_v26, %v7305_v14  ;;  %v635_v28 = vpop.f32.mrb[5].mxu0 }
 0x2bf   :  { %9194 = vrot.lane.b32.xlu0 %v10792_v25, %s10428_s21  ;;  %v636_v29 = vadd.f32 %v7305_v14, %v635_v28  ;;  %v10902_v28 = vld [vmem:[%s12346_s11 + $0x30] sm:$0xff] }
 0x2c0   :  { %v10842_v57 = vmul.f32 0.35355338, %v641_v27 }
 0x2c1   :  { %v10796_v30 = vpack.i.bf16 %v641_v27, %v636_v29  ;;  %v8013_v31 = vpop.f32.mrb[6].mxu0  ;;  %v10836_v56 = vmul.f32 0.35355338, %v636_v29 }
 0x2c2   :  { %v651_v32 = vadd.f32 %v8013_v31, %v7305_v14  ;;  %v645_v33 = vpop.f32.mrb[7].mxu0 }
 0x2c3   :  { %9199 = vrot.lane.b32.xlu1 %v10796_v30, %s10428_s21  ;;  %v646_v34 = vadd.f32 %v7305_v14, %v645_v33 }
 0x2c4   :  { %v10850_v59 = vmul.f32 0.35355338, %v651_v32 }
 0x2c5   :  { %v10800_v35 = vpack.i.bf16 %v651_v32, %v646_v34  ;;  %v10844_v58 = vmul.f32 0.35355338, %v646_v34 }
 0x2c7   :  { %9204 = vrot.lane.b32.xlu1 %v10800_v35, %s10428_s21 }
 0x32d   :  { %v9190_v36 = vpop.permute.xlu0 %9189 }
 0x32e   :  { %v9192_v37 = vunpack.i.h.bf16 %v9190_v36  ;;  %v9191_v38 = vunpack.i.l.bf16 %v9190_v36 }
 0x330   :  { %v8705_v40 = vpack.c.bf16 %v9192_v37, %v9191_v38 }
 0x331   :  { %v9195_v41 = vpop.permute.xlu0 %9194 }
 0x332   :  { %8707 = vmatprep.subr.msk.bf16.mxu1 %vm10806_vm2, %v8705_v40  ;;  %v9197_v42 = vunpack.i.h.bf16 %v9195_v41  ;;  %v9196_v43 = vunpack.i.l.bf16 %v9195_v41 }
 0x333   :  { %8710 = vmatpush3.bf16.xpose.msk.msra.mxu1 %vm10806_vm2, %v8705_v40 }
 0x334   :  { %v8711_v44 = vpack.c.bf16 %v9197_v42, %v9196_v43 }
 0x335   :  { %v9200_v45 = vpop.permute.xlu1 %9199 }
 0x336   :  { %8713 = vmatprep.subr.msk.bf16.mxu1 %vm10806_vm2, %v8711_v44  ;;  %v9202_v46 = vunpack.i.h.bf16 %v9200_v45  ;;  %v9201_v47 = vunpack.i.l.bf16 %v9200_v45 }
 0x338   :  { %v8717_v48 = vpack.c.bf16 %v9202_v46, %v9201_v47 }
 0x339   :  { %v9205_v49 = vpop.permute.xlu1 %9204 }
 0x33a   :  { %v9207_v50 = vunpack.i.h.bf16 %v9205_v49  ;;  %v9206_v51 = vunpack.i.l.bf16 %v9205_v49 }
 0x33b   :  { %8716 = vmatpush3.bf16.xpose.msk.msra.mxu1 %vm10806_vm2, %v8711_v44 }
 0x33c   :  { %8719 = vmatprep.subr.msk.bf16.mxu1 %vm10806_vm2, %v8717_v48  ;;  %v8723_v52 = vpack.c.bf16 %v9207_v50, %v9206_v51 }
 0x343   :  { %8722 = vmatpush3.bf16.xpose.msk.msra.mxu1 %vm10806_vm2, %v8717_v48 }
 0x344   :  { %8725 = vmatprep.subr.msk.bf16.mxu1 %vm10806_vm2, %v8723_v52 }
 0x34b   :  { %8728 = vmatpush3.bf16.xpose.msk.msra.mxu1 %vm10806_vm2, %v8723_v52 }
 0x352   :  { %8031 = vmatmul.mubr.msk.f32.vlgmr.msra.gmra.mrb[0].mxu1 %vm686_vm1, %v10826_v53 }
 0x353   :  { %8033 = vmatprep.mubr.msk.f32.mxu1 %vm686_vm1, %v10828_v54 }
 0x356   :  { %8034 = vmatmul.mubr.msk.f32.gmra.mrb[2].mxu1 %vm686_vm1, %v10834_v55 }
 0x357   :  { %8036 = vmatprep.mubr.msk.f32.mxu1 %vm686_vm1, %v10836_v56 }
 0x35a   :  { %8037 = vmatmul.mubr.msk.f32.gmra.mrb[4].mxu1 %vm686_vm1, %v10842_v57 }
 0x35b   :  { %8039 = vmatprep.mubr.msk.f32.mxu1 %vm686_vm1, %v10844_v58 }
 0x35e   :  { %8040 = vmatmul.mubr.msk.f32.gmra.mrb[6].mxu1 %vm686_vm1, %v10850_v59 }
 0x425   :  { %v8032_v62 = vpop.f32.mrb[0].mxu1 }
 0x426   :  { %v799_v63 = vadd.f32 %v8032_v62, %v10855_v60  ;;  %v793_v0 = vpop.f32.mrb[1].mxu1 }
 0x427   :  { %v794_v1 = vadd.f32 %v793_v0, %v10858_v61 }
 0x428   :  { %v836_v3 = vsel %vm832_vm3, %v799_v63, -inf }
 0x429   :  { %837 = vmax.xlane.f32.xlu1 %v836_v3  ;;  %v8035_v4 = vpop.f32.mrb[2].mxu1  ;;  %v833_v5 = vsel %vm832_vm3, %v794_v1, -inf }
 0x42a   :  { %v10868_v6 = vadd.f32 %v8035_v4, %v10863_v2  ;;  %v803_v7 = vpop.f32.mrb[3].mxu1  ;;  %834 = vmax.xlane.f32.xlu0 %v833_v5 }
 0x42b   :  { %v804_v10 = vadd.f32 %v803_v7, %v10871_v8 }
 0x42c   :  { %v842_v9 = vsel %vm832_vm3, %v10868_v6, -inf }
 0x42d   :  { %v8038_v11 = vpop.f32.mrb[4].mxu1  ;;  %v839_v16 = vsel %vm832_vm3, %v804_v10, -inf }
 0x42e   :  { %v813_v13 = vpop.f32.mrb[5].mxu1  ;;  %843 = vmax.xlane.f32.xlu0 %v842_v9  ;;  %v819_v14 = vadd.f32 %v8038_v11, %v10877_v12 }
 0x42f   :  { %v814_v26 = vadd.f32 %v813_v13, %v10895_v24 }
 0x430   :  { %v848_v22 = vsel %vm832_vm3, %v819_v14, -inf }
 0x431   :  { %v8041_v15 = vpop.f32.mrb[6].mxu1  ;;  %v845_v27 = vsel %vm832_vm3, %v814_v26, -inf }
 0x432   :  { %v823_v18 = vpop.f32.mrb[7].mxu1  ;;  %840 = vmax.xlane.f32.xlu0 %v839_v16  ;;  %v10885_v21 = vadd.f32 %v8041_v15, %v10882_v17 }
 0x433   :  { %v10905_v29 = vadd.f32 %v823_v18, %v10902_v28 }
 0x434   :  { %v854_v23 = vsel %vm832_vm3, %v10885_v21, -inf }
 0x435   :  { %v851_v31 = vsel %vm832_vm3, %v10905_v29, -inf }
 0x436   :  { %849 = vmax.xlane.f32.xlu0 %v848_v22 }
 0x43a   :  { %9209 = vrot.lane.b32.xlu1 %v10784_v19, %s10429_s15  ;;  %855 = vmax.xlane.f32.xlu0 %v854_v23 }
 0x450   :  { %9214 = vrot.lane.b32.xlu0 %v10792_v25, %s10429_s15 }
 0x45e   :  { %846 = vmax.xlane.f32.xlu1 %v845_v27 }
 0x46f   :  { %9219 = vrot.lane.b32.xlu1 %v10796_v30, %s10429_s15 }
 0x493   :  { %852 = vmax.xlane.f32.xlu1 %v851_v31 }
 0x4a4   :  { %9224 = vrot.lane.b32.xlu1 %v10800_v35, %s10429_s15 }
 0x4b6   :  { %v838_v32 = vpop.xlane.xlu1 %837 }
 0x4b7   :  { %v858_v33 = vsub.f32 %v799_v63, %v838_v32  ;;  %v835_v34 = vpop.xlane.xlu0 %834 }
 0x4b8   :  { %v857_v36 = vsub.f32 %v794_v1, %v835_v34 }
 0x4b9   :  { %v867_v37 = vmul.f32 1.442695, %v858_v33 }
 0x4ba   :  { %v865_v38 = vmul.f32 1.442695, %v857_v36  ;;  %v9210_v40 = vpop.permute.xlu1 %9209 }
 0x4bb   :  { %9470 = vpow2.f32 %v867_v37  ;;  %v9212_v41 = vunpack.i.h.bf16 %v9210_v40  ;;  %v9211_v42 = vunpack.i.l.bf16 %v9210_v40  ;;  %v844_v43 = vpop.xlane.xlu0 %843 }
 0x4bc   :  { %9472 = vpow2.f32 %v865_v38  ;;  %v860_v13 = vsub.f32 %v10868_v6, %v844_v43 }
 0x4bd   :  { %v8729_v44 = vpack.c.bf16 %v9212_v41, %v9211_v42 }
 0x4be   :  { %v871_v15 = vmul.f32 1.442695, %v860_v13 }
 0x4bf   :  { %8730 = vmatprep.subr.bf16.mxu0 %v8729_v44  ;;  %v841_v45 = vpop.xlane.xlu0 %840 }
 0x4c0   :  { %v859_v46 = vsub.f32 %v804_v10, %v841_v45  ;;  %8732 = vmatpush3.bf16.msra.mxu0 %v8729_v44 }
 0x4c2   :  { %v869_v47 = vmul.f32 1.442695, %v859_v46 }
 0x4c3   :  { %v850_v48 = vpop.xlane.xlu0 %849 }
 0x4c4   :  { %9474 = vpow2.f32 %v869_v47  ;;  %v862_v49 = vsub.f32 %v819_v14, %v850_v48 }
 0x4c5   :  { %v10911_v50 = vpop.eup %9470 }
 0x4c6   :  { %v10913_v51 = vpop.eup %9472  ;;  %v875_v52 = vmul.f32 1.442695, %v862_v49  ;;  %v884_v62 = vsel %vm832_vm3, %v10911_v50, 0.0 }
 0x4c7   :  { %885 = vadd.xlane.f32.xlu0 %v884_v62  ;;  %v856_v63 = vpop.xlane.xlu0 %855  ;;  %v881_v0 = vsel %vm832_vm3, %v10913_v51, 0.0 }
 0x4c8   :  { %9476 = vpow2.f32 %v875_v52  ;;  %882 = vadd.xlane.f32.xlu1 %v881_v0  ;;  %v864_v14 = vsub.f32 %v10885_v21, %v856_v63 }
 0x4c9   :  { %9478 = vpow2.f32 %v871_v15 }
 0x4ca   :  { %v879_v22 = vmul.f32 1.442695, %v864_v14 }
 0x4cb   :  { %v9215_v1 = vpop.permute.xlu0 %9214 }
 0x4cc   :  { %v9217_v3 = vunpack.i.h.bf16 %v9215_v1  ;;  %v9216_v4 = vunpack.i.l.bf16 %v9215_v1 }
 0x4ce   :  { %v10919_v5 = vpop.eup %9474  ;;  %v8733_v7 = vpack.c.bf16 %v9217_v3, %v9216_v4 }
 0x4cf   :  { %v887_v9 = vsel %vm832_vm3, %v10919_v5, 0.0 }
 0x4d0   :  { %888 = vadd.xlane.f32.xlu0 %v887_v9  ;;  %8734 = vmatprep.subr.bf16.mxu0 %v8733_v7 }
 0x4d1   :  { %8736 = vmatpush3.bf16.msra.mxu0 %v8733_v7 }
 0x4d2   :  { %v10923_v10 = vpop.eup %9476 }
 0x4d3   :  { %v896_v11 = vsel %vm832_vm3, %v10923_v10, 0.0  ;;  %v10931_v34 = vpop.eup %9478 }
 0x4d4   :  { %897 = vadd.xlane.f32.xlu0 %v896_v11 }
 0x4d9   :  { %9229 = vrot.lane.b32.xlu1 %v10784_v19, %s10430_s13 }
 0x4eb   :  { %v847_v16 = vpop.xlane.xlu1 %846 }
 0x4ec   :  { %v861_v18 = vsub.f32 %v814_v26, %v847_v16  ;;  %v890_v26 = vsel %vm832_vm3, %v10931_v34, 0.0 }
 0x4ee   :  { %v873_v23 = vmul.f32 1.442695, %v861_v18 }
 0x4ef   :  { %v9220_v27 = vpop.permute.xlu1 %9219 }
 0x4f0   :  { %9480 = vpow2.f32 %v873_v23  ;;  %v9222_v31 = vunpack.i.h.bf16 %v9220_v27  ;;  %v9221_v32 = vunpack.i.l.bf16 %v9220_v27 }
 0x4f1   :  { %9482 = vpow2.f32 %v879_v22 }
 0x4f2   :  { %v8737_v33 = vpack.c.bf16 %v9222_v31, %v9221_v32 }
 0x4f4   :  { %8738 = vmatprep.subr.bf16.mxu0 %v8737_v33 }
 0x4f5   :  { %8740 = vmatpush3.bf16.msra.mxu0 %v8737_v33 }
 0x4fa   :  { %v10933_v36 = vpop.eup %9480 }
 0x4fb   :  { %v893_v6 = vsel %vm832_vm3, %v10933_v36, 0.0  ;;  %v10937_v21 = vpop.eup %9482 }
 0x4fc   :  { %894 = vadd.xlane.f32.xlu0 %v893_v6  ;;  %v902_v37 = vsel %vm832_vm3, %v10937_v21, 0.0 }
 0x4fd   :  { %891 = vadd.xlane.f32.xlu1 %v890_v26 }
 0x500   :  { %903 = vadd.xlane.f32.xlu0 %v902_v37 }
 0x50e   :  { %9239 = vrot.lane.b32.xlu1 %v10796_v30, %s10430_s13 }
 0x512   :  { %9244 = vrot.lane.b32.xlu1 %v10800_v35, %s10430_s13 }
 0x516   :  { %1074 = vrot.lane.b32.xlu1 %v10786_v20, %s10431_s16 }
 0x51a   :  { %1076 = vrot.lane.b32.xlu1 %v10826_v53, %s10431_s16 }
 0x51e   :  { %1080 = vrot.lane.b32.xlu1 %v10834_v55, %s10431_s16 }
 0x520   :  { %v853_v38 = vpop.xlane.xlu1 %852 }
 0x521   :  { %v863_v40 = vsub.f32 %v10905_v29, %v853_v38 }
 0x522   :  { %1084 = vrot.lane.b32.xlu1 %v10842_v57, %s10431_s16 }
 0x523   :  { %v877_v41 = vmul.f32 1.442695, %v863_v40 }
 0x524   :  { %v9225_v42 = vpop.permute.xlu1 %9224 }
 0x525   :  { %9484 = vpow2.f32 %v877_v41  ;;  %v9227_v43 = vunpack.i.h.bf16 %v9225_v42  ;;  %v9226_v44 = vunpack.i.l.bf16 %v9225_v42 }
 0x526   :  { %1088 = vrot.lane.b32.xlu1 %v10850_v59, %s10431_s16 }
 0x527   :  { %v8741_v45 = vpack.c.bf16 %v9227_v43, %v9226_v44 }
 0x529   :  { %8742 = vmatprep.subr.bf16.mxu0 %v8741_v45 }
 0x52a   :  { %9254 = vrot.lane.b32.xlu1 %v10792_v25, %s10432_s27  ;;  %8744 = vmatpush3.bf16.msra.mxu0 %v8741_v45 }
 0x52e   :  { %9264 = vrot.lane.b32.xlu1 %v10800_v35, %s10432_s27 }
 0x52f   :  { %v10962_v29 = vpop.eup %9484 }
 0x530   :  { %v899_v46 = vsel %vm832_vm3, %v10962_v29, 0.0 }
 0x531   :  { %900 = vadd.xlane.f32.xlu0 %v899_v46 }
 0x532   :  { %1744 = vrot.lane.b32.xlu1 %v10826_v53, %s10433_s3 }
 0x536   :  { %1748 = vrot.lane.b32.xlu1 %v10834_v55, %s10433_s3 }
 0x53a   :  { %1752 = vrot.lane.b32.xlu1 %v10842_v57, %s10433_s3 }
 0x53e   :  { %1756 = vrot.lane.b32.xlu1 %v10850_v59, %s10433_s3 }
 0x547   :  { %9234 = vrot.lane.b32.xlu0 %v10792_v25, %s10430_s13 }
 0x54b   :  { %1078 = vrot.lane.b32.xlu0 %v10828_v54, %s10431_s16 }
 0x54f   :  { %1082 = vrot.lane.b32.xlu0 %v10836_v56, %s10431_s16 }
 0x553   :  { %1086 = vrot.lane.b32.xlu0 %v10844_v58, %s10431_s16 }
 0x554   :  { %v886_v47 = vpop.xlane.xlu0 %885 }
 0x555   :  { %9486 = vrcp.f32 %v886_v47  ;;  %v883_v48 = vpop.xlane.xlu1 %882 }
 0x556   :  { %9488 = vrcp.f32 %v883_v48 }
 0x557   :  { %9249 = vrot.lane.b32.xlu0 %v10784_v19, %s10432_s27 }
 0x559   :  { %v9230_v49 = vpop.permute.xlu1 %9229 }
 0x55a   :  { %v9232_v52 = vunpack.i.h.bf16 %v9230_v49  ;;  %v9231_v62 = vunpack.i.l.bf16 %v9230_v49 }
 0x55b   :  { %9259 = vrot.lane.b32.xlu0 %v10796_v30, %s10432_s27 }
 0x55c   :  { %v8745_v63 = vpack.c.bf16 %v9232_v52, %v9231_v62 }
 0x55d   :  { %v889_v0 = vpop.xlane.xlu0 %888 }
 0x55e   :  { %9490 = vrcp.f32 %v889_v0  ;;  %8747 = vmatprep.subr.msk.bf16.mxu0 %vm10806_vm2, %v8745_v63 }
 0x55f   :  { %v9487_v1 = vpop.eup %9486  ;;  %1742 = vrot.lane.b32.xlu0 %v10786_v20, %s10433_s3 }
 0x560   :  { %v9489_v3 = vpop.eup %9488  ;;  %v914_v7 = vmul.f32 %v9487_v1, %v10911_v50 }
 0x561   :  { %v913_v4 = vmul.f32 %v9489_v3, %v10913_v51  ;;  %v898_v50 = vpop.xlane.xlu0 %897 }
 0x563   :  { %8058 = vmatprep.mubr.msk.f32.mxu0 %vm832_vm3, %v913_v4  ;;  %1746 = vrot.lane.b32.xlu0 %v10828_v54, %s10433_s3 }
 0x564   :  { %8059 = vmatmul.mubr.msk.f32.vlgmr.msra.gmra.mrb[8].mxu0 %vm832_vm3, %v914_v7 }
 0x565   :  { %8750 = vmatpush3.bf16.xpose.msk.msra.mxu0 %vm10806_vm2, %v8745_v63 }
 0x567   :  { %1750 = vrot.lane.b32.xlu0 %v10836_v56, %s10433_s3 }
 0x568   :  { %v9491_v9 = vpop.eup %9490 }
 0x569   :  { %v915_v11 = vmul.f32 %v9491_v9, %v10919_v5 }
 0x56b   :  { %1754 = vrot.lane.b32.xlu0 %v10844_v58, %s10433_s3  ;;  %8061 = vmatprep.mubr.msk.f32.mxu0 %vm832_vm3, %v915_v11 }
 0x589   :  { %v895_v51 = vpop.xlane.xlu0 %894 }
 0x58a   :  { %9492 = vrcp.f32 %v895_v51  ;;  %v892_v13 = vpop.xlane.xlu1 %891 }
 0x58b   :  { %9494 = vrcp.f32 %v892_v13 }
 0x58c   :  { %9496 = vrcp.f32 %v898_v50 }
 0x58d   :  { %v904_v31 = vpop.xlane.xlu0 %903 }
 0x58e   :  { %v9240_v23 = vpop.permute.xlu1 %9239  ;;  %9498 = vrcp.f32 %v904_v31 }
 0x58f   :  { %v9242_v26 = vunpack.i.h.bf16 %v9240_v23  ;;  %v9241_v37 = vunpack.i.l.bf16 %v9240_v23 }
 0x591   :  { %v8757_v43 = vpack.c.bf16 %v9242_v26, %v9241_v37 }
 0x592   :  { %v9245_v27 = vpop.permute.xlu1 %9244 }
 0x593   :  { %v9247_v47 = vunpack.i.h.bf16 %v9245_v27  ;;  %v9246_v48 = vunpack.i.l.bf16 %v9245_v27 }
 0x594   :  { %v9493_v14 = vpop.eup %9492 }
 0x595   :  { %v9495_v15 = vpop.eup %9494  ;;  %v917_v22 = vmul.f32 %v9493_v14, %v10933_v36  ;;  %v8763_v63 = vpack.c.bf16 %v9247_v47, %v9246_v48 }
 0x596   :  { %v916_v16 = vmul.f32 %v9495_v15, %v10931_v34  ;;  %v9497_v18 = vpop.eup %9496  ;;  %v1075_v32 = vpop.permute.xlu1 %1074 }
 0x597   :  { %v918_v5 = vmul.f32 %v9497_v18, %v10923_v10 }
 0x598   :  { %8062 = vmatmul.mubr.msk.f32.gmra.mrb[10].mxu0 %vm832_vm3, %v916_v16  ;;  %v9499_v10 = vpop.eup %9498 }
 0x599   :  { %8064 = vmatprep.mubr.msk.f32.mxu0 %vm832_vm3, %v917_v22  ;;  %v920_v49 = vmul.f32 %v9499_v10, %v10937_v21 }
 0x59a   :  { %v1077_v6 = vpop.permute.xlu1 %1076 }
 0x59c   :  { %8065 = vmatmul.mubr.msk.f32.gmra.mrb[12].mxu0 %vm832_vm3, %v918_v5 }
 0x59e   :  { %v1081_v41 = vpop.permute.xlu1 %1080 }
 0x5a2   :  { %v1085_v52 = vpop.permute.xlu1 %1084 }
 0x5be   :  { %v901_v33 = vpop.xlane.xlu0 %900 }
 0x5bf   :  { %9500 = vrcp.f32 %v901_v33 }
 0x5c2   :  { %v9235_v34 = vpop.permute.xlu0 %9234 }
 0x5c3   :  { %v9237_v36 = vunpack.i.h.bf16 %v9235_v34  ;;  %v9236_v38 = vunpack.i.l.bf16 %v9235_v34 }
 0x5c5   :  { %v8751_v40 = vpack.c.bf16 %v9237_v36, %v9236_v38 }
 0x5c6   :  { %v1079_v42 = vpop.permute.xlu0 %1078 }
 0x5c7   :  { %8753 = vmatprep.subr.msk.bf16.mxu0 %vm10806_vm2, %v8751_v40 }
 0x5c8   :  { %8756 = vmatpush3.bf16.xpose.msk.msra.mxu0 %vm10806_vm2, %v8751_v40 }
 0x5c9   :  { %v9501_v44 = vpop.eup %9500  ;;  %8759 = vmatprep.subr.msk.bf16.mxu0 %vm10806_vm2, %v8757_v43 }
 0x5ca   :  { %v1083_v45 = vpop.permute.xlu0 %1082  ;;  %v919_v46 = vmul.f32 %v9501_v44, %v10962_v29  ;;  %v1089_v29 = vpop.permute.xlu1 %1088 }
 0x5cc   :  { %8067 = vmatprep.mubr.msk.f32.mxu0 %vm832_vm3, %v919_v46 }
 0x5cd   :  { %8068 = vmatmul.mubr.msk.f32.gmra.mrb[14].mxu0 %vm832_vm3, %v920_v49 }
 0x5ce   :  { %v1087_v62 = vpop.permute.xlu0 %1086  ;;  %8086 = vmatprep.mubr.msk.f32.mxu0 %vm686_vm1, %v1075_v32  ;;  %v9255_v4 = vpop.permute.xlu1 %9254 }
 0x5cf   :  { %v9257_v7 = vunpack.i.h.bf16 %v9255_v4  ;;  %v9256_v9 = vunpack.i.l.bf16 %v9255_v4 }
 0x5d0   :  { %8762 = vmatpush3.bf16.xpose.msk.msra.mxu0 %vm10806_vm2, %v8757_v43 }
 0x5d1   :  { %8765 = vmatprep.subr.msk.bf16.mxu0 %vm10806_vm2, %v8763_v63  ;;  %v8791_v11 = vpack.c.bf16 %v9257_v7, %v9256_v9 }
 0x5d2   :  { %v9250_v0 = vpop.permute.xlu0 %9249  ;;  %v9265_v15 = vpop.permute.xlu1 %9264 }
 0x5d3   :  { %v9252_v1 = vunpack.i.h.bf16 %v9250_v0  ;;  %v9251_v3 = vunpack.i.l.bf16 %v9250_v0  ;;  %v9267_v16 = vunpack.i.h.bf16 %v9265_v15  ;;  %v9266_v18 = vunpack.i.l.bf16 %v9265_v15 }
 0x5d5   :  { %v8785_v21 = vpack.c.bf16 %v9252_v1, %v9251_v3  ;;  %v8803_v5 = vpack.c.bf16 %v9267_v16, %v9266_v18 }
 0x5d6   :  { %v9260_v50 = vpop.permute.xlu0 %9259  ;;  %v1745_v23 = vpop.permute.xlu1 %1744 }
 0x5d7   :  { %v9262_v51 = vunpack.i.h.bf16 %v9260_v50  ;;  %v9261_v13 = vunpack.i.l.bf16 %v9260_v50 }
 0x5d8   :  { %8768 = vmatpush3.bf16.xpose.msk.msra.mxu0 %vm10806_vm2, %v8763_v63 }
 0x5d9   :  { %8787 = vmatprep.subr.msk.bf16.mxu0 %vm10806_vm2, %v8785_v21  ;;  %v8797_v14 = vpack.c.bf16 %v9262_v51, %v9261_v13 }
 0x5da   :  { %v1743_v22 = vpop.permute.xlu0 %1742  ;;  %v1749_v31 = vpop.permute.xlu1 %1748 }
 0x5de   :  { %v1747_v27 = vpop.permute.xlu0 %1746  ;;  %v1753_v33 = vpop.permute.xlu1 %1752 }
 0x5df   :  { %8087 = vmatmul.mubr.msk.f32.vlgmr.msra.gmra.mrb[16].mxu0 %vm686_vm1, %v1077_v6 }
 0x5e0   :  { %8089 = vmatprep.mubr.msk.f32.mxu0 %vm686_vm1, %v1079_v42  ;;  %8790 = vmatpush3.bf16.xpose.msk.msra.mxu0 %vm10806_vm2, %v8785_v21 }
 0x5e1   :  { %8793 = vmatprep.subr.msk.bf16.mxu0 %vm10806_vm2, %v8791_v11 }
 0x5e2   :  { %v1751_v32 = vpop.permute.xlu0 %1750  ;;  %v1757_v34 = vpop.permute.xlu1 %1756 }
 0x5e3   :  { %8090 = vmatmul.mubr.msk.f32.gmra.mrb[18].mxu0 %vm686_vm1, %v1081_v41 }
 0x5e4   :  { %8092 = vmatprep.mubr.msk.f32.mxu0 %vm686_vm1, %v1083_v45 }
 0x5e6   :  { %v1755_v6 = vpop.permute.xlu0 %1754 }
 0x5e7   :  { %8093 = vmatmul.mubr.msk.f32.gmra.mrb[20].mxu0 %vm686_vm1, %v1085_v52 }
 0x5e8   :  { %8095 = vmatprep.mubr.msk.f32.mxu0 %vm686_vm1, %v1087_v62  ;;  %8796 = vmatpush3.bf16.xpose.msk.msra.mxu0 %vm10806_vm2, %v8791_v11 }
 0x5e9   :  { %8799 = vmatprep.subr.msk.bf16.mxu0 %vm10806_vm2, %v8797_v14 }
 0x5eb   :  { %8096 = vmatmul.mubr.msk.f32.gmra.mrb[22].mxu0 %vm686_vm1, %v1089_v29 }
 0x5ec   :  { %8170 = vmatprep.mubr.msk.f32.mxu0 %vm686_vm1, %v1743_v22 }
 0x5f0   :  { %8802 = vmatpush3.bf16.xpose.msk.msra.mxu0 %vm10806_vm2, %v8797_v14 }
 0x5f1   :  { %8805 = vmatprep.subr.msk.bf16.mxu0 %vm10806_vm2, %v8803_v5 }
 0x5f8   :  { %8808 = vmatpush3.bf16.xpose.msk.msra.mxu0 %vm10806_vm2, %v8803_v5 }
 0x5ff   :  { %8171 = vmatmul.mubr.msk.f32.vlgmr.msra.gmra.mrb[24].mxu0 %vm686_vm1, %v1745_v23 }
 0x600   :  { %8173 = vmatprep.mubr.msk.f32.mxu0 %vm686_vm1, %v1747_v27 }
 0x603   :  { %8174 = vmatmul.mubr.msk.f32.gmra.mrb[26].mxu0 %vm686_vm1, %v1749_v31 }
 0x604   :  { %8176 = vmatprep.mubr.msk.f32.mxu0 %vm686_vm1, %v1751_v32 }
 0x607   :  { %8177 = vmatmul.mubr.msk.f32.gmra.mrb[28].mxu0 %vm686_vm1, %v1753_v33 }
 0x608   :  { %8179 = vmatprep.mubr.msk.f32.mxu0 %vm686_vm1, %v1755_v6 }
 0x60b   :  { %8180 = vmatmul.mubr.msk.f32.gmra.mrb[30].mxu0 %vm686_vm1, %v1757_v34 }
 0x637   :  { %v11058_v26 = vpop.f32.mrb[8].mxu0 }
 0x638   :  { %v11060_v37 = vpop.f32.mrb[9].mxu0 }
 0x66b   :  { %v11062_v36 = vpop.f32.mrb[10].mxu0 }
 0x66c   :  { %v11064_v38 = vpop.f32.mrb[11].mxu0 }
 0x66f   :  { %v11066_v40 = vpop.f32.mrb[12].mxu0 }
 0x670   :  { %v11068_v41 = vpop.f32.mrb[13].mxu0 }
 0x6a0   :  { %v11070_v42 = vpop.f32.mrb[14].mxu0 }
 0x6a1   :  { %v11072_v43 = vpop.f32.mrb[15].mxu0 }
 0x6b2   :  { %v8088_v10 = vpop.f32.mrb[16].mxu0 }
 0x6b3   :  { %v1210_v44 = vadd.f32 %v8088_v10, %v10855_v60  ;;  %v1204_v45 = vpop.f32.mrb[17].mxu0 }
 0x6b4   :  { %v1205_v46 = vadd.f32 %v1204_v45, %v10858_v61 }
 0x6b5   :  { %v1246_v47 = vsel %vm832_vm3, %v1210_v44, -inf }
 0x6b6   :  { %1247 = vmax.xlane.f32.xlu1 %v1246_v47  ;;  %v8091_v48 = vpop.f32.mrb[18].mxu0  ;;  %v1243_v49 = vsel %vm832_vm3, %v1205_v46, -inf }
 0x6b7   :  { %v1214_v52 = vpop.f32.mrb[19].mxu0  ;;  %1244 = vmax.xlane.f32.xlu0 %v1243_v49  ;;  %v1220_v63 = vadd.f32 %v8091_v48, %v10863_v2 }
 0x6b8   :  { %v1215_v62 = vadd.f32 %v1214_v52, %v10871_v8 }
 0x6b9   :  { %v1252_v9 = vsel %vm832_vm3, %v1220_v63, -inf }
 0x6ba   :  { %v8094_v29 = vpop.f32.mrb[20].mxu0  ;;  %v1249_v0 = vsel %vm832_vm3, %v1215_v62, -inf }
 0x6bb   :  { %v1224_v1 = vpop.f32.mrb[21].mxu0  ;;  %1250 = vmax.xlane.f32.xlu0 %v1249_v0  ;;  %v1230_v21 = vadd.f32 %v8094_v29, %v10877_v12 }
 0x6bc   :  { %v1225_v3 = vadd.f32 %v1224_v1, %v10895_v24 }
 0x6bd   :  { %v1258_v14 = vsel %vm832_vm3, %v1230_v21, -inf }
 0x6be   :  { %v8097_v4 = vpop.f32.mrb[22].mxu0  ;;  %v1255_v7 = vsel %vm832_vm3, %v1225_v3, -inf }
 0x6bf   :  { %v1234_v11 = vpop.f32.mrb[23].mxu0  ;;  %1256 = vmax.xlane.f32.xlu1 %v1255_v7  ;;  %1253 = vmax.xlane.f32.xlu0 %v1252_v9  ;;  %v1240_v51 = vadd.f32 %v8097_v4, %v10882_v17 }
 0x6c0   :  { %v1235_v50 = vadd.f32 %v1234_v11, %v10902_v28 }
 0x6c1   :  { %v1264_v15 = vsel %vm832_vm3, %v1240_v51, -inf }
 0x6c2   :  { %v1261_v13 = vsel %vm832_vm3, %v1235_v50, -inf }
 0x6c3   :  { %1262 = vmax.xlane.f32.xlu1 %v1261_v13  ;;  %1259 = vmax.xlane.f32.xlu0 %v1258_v14 }
 0x6c7   :  { %1265 = vmax.xlane.f32.xlu0 %v1264_v15 }
 0x6d2   :  { %v11090_v16 = vpop.f32.mrb[24].mxu0 }
 0x6d3   :  { %v11092_v18 = vpop.f32.mrb[25].mxu0 }
 0x6d4   :  { %9269 = vrot.lane.b32.xlu1 %v10784_v19, %s10434_s0 }
 0x6d6   :  { %v11096_v22 = vpop.f32.mrb[26].mxu0 }
 0x6d7   :  { %v11098_v5 = vpop.f32.mrb[27].mxu0 }
 0x6da   :  { %v11100_v23 = vpop.f32.mrb[28].mxu0 }
 0x6db   :  { %v11102_v27 = vpop.f32.mrb[29].mxu0 }
 0x6de   :  { %v11104_v31 = vpop.f32.mrb[30].mxu0 }
 0x6df   :  { %v11106_v32 = vpop.f32.mrb[31].mxu0 }
 0x743   :  { %v1248_v33 = vpop.xlane.xlu1 %1247 }
 0x744   :  { %v1268_v6 = vsub.f32 %v1210_v44, %v1248_v33  ;;  %v1245_v34 = vpop.xlane.xlu0 %1244 }
 0x745   :  { %v1267_v10 = vsub.f32 %v1205_v46, %v1245_v34 }
 0x746   :  { %v1277_v45 = vmul.f32 1.442695, %v1268_v6 }
 0x747   :  { %v1275_v47 = vmul.f32 1.442695, %v1267_v10 }
 0x748   :  { %9502 = vpow2.f32 %v1277_v45  ;;  %v1251_v48 = vpop.xlane.xlu0 %1250 }
 0x749   :  { %9504 = vpow2.f32 %v1275_v47  ;;  %v1269_v49 = vsub.f32 %v1215_v62, %v1251_v48 }
 0x74b   :  { %v1279_v52 = vmul.f32 1.442695, %v1269_v49 }
 0x74c   :  { %v1257_v29 = vpop.xlane.xlu1 %1256  ;;  %v1254_v0 = vpop.xlane.xlu0 %1253 }
 0x74d   :  { %9506 = vpow2.f32 %v1279_v52  ;;  %v1271_v1 = vsub.f32 %v1225_v3, %v1257_v29  ;;  %v1270_v4 = vsub.f32 %v1220_v63, %v1254_v0 }
 0x74f   :  { %v1283_v7 = vmul.f32 1.442695, %v1271_v1  ;;  %v1281_v9 = vmul.f32 1.442695, %v1270_v4 }
 0x750   :  { %v1263_v11 = vpop.xlane.xlu1 %1262  ;;  %v1260_v13 = vpop.xlane.xlu0 %1259 }
 0x751   :  { %9508 = vpow2.f32 %v1283_v7  ;;  %v1272_v44 = vsub.f32 %v1230_v21, %v1260_v13  ;;  %v1273_v33 = vsub.f32 %v1235_v50, %v1263_v11 }
 0x752   :  { %v11108_v14 = vpop.eup %9502  ;;  %9510 = vpow2.f32 %v1281_v9 }
 0x753   :  { %v11110_v46 = vpop.eup %9504  ;;  %v1285_v15 = vmul.f32 1.442695, %v1272_v44  ;;  %v1294_v62 = vsel %vm832_vm3, %v11108_v14, 0.0  ;;  %v1287_v49 = vmul.f32 1.442695, %v1273_v33 }
 0x754   :  { %v9270_v6 = vpop.permute.xlu1 %9269  ;;  %1295 = vadd.xlane.f32.xlu0 %v1294_v62  ;;  %v1266_v3 = vpop.xlane.xlu0 %1265  ;;  %v1291_v63 = vsel %vm832_vm3, %v11110_v46, 0.0 }
 0x755   :  { %v9272_v34 = vunpack.i.h.bf16 %v9270_v6  ;;  %v9271_v10 = vunpack.i.l.bf16 %v9270_v6  ;;  %v1274_v45 = vsub.f32 %v1240_v51, %v1266_v3  ;;  %1292 = vadd.xlane.f32.xlu1 %v1291_v63  ;;  %9512 = vpow2.f32 %v1285_v15 }
 0x757   :  { %v11116_v21 = vpop.eup %9506  ;;  %v1289_v47 = vmul.f32 1.442695, %v1274_v45  ;;  %v8769_v48 = vpack.c.bf16 %v9272_v34, %v9271_v10 }
 0x758   :  { %v1297_v52 = vsel %vm832_vm3, %v11116_v21, 0.0 }
 0x759   :  { %9514 = vpow2.f32 %v1289_v47  ;;  %8770 = vmatprep.subr.bf16.mxu1 %v8769_v48  ;;  %1298 = vadd.xlane.f32.xlu1 %v1297_v52 }
 0x75a   :  { %8772 = vmatpush3.bf16.msra.mxu1 %v8769_v48  ;;  %9516 = vpow2.f32 %v1287_v49 }
 0x75b   :  { %v11120_v50 = vpop.eup %9508 }
 0x75c   :  { %v11122_v29 = vpop.eup %9510  ;;  %v1303_v51 = vsel %vm832_vm3, %v11120_v50, 0.0 }
 0x75d   :  { %1304 = vadd.xlane.f32.xlu1 %v1303_v51  ;;  %v1300_v0 = vsel %vm832_vm3, %v11122_v29, 0.0 }
 0x75e   :  { %1301 = vadd.xlane.f32.xlu0 %v1300_v0 }
 0x75f   :  { %v11128_v1 = vpop.eup %9512 }
 0x760   :  { %v1306_v4 = vsel %vm832_vm3, %v11128_v1, 0.0 }
 0x762   :  { %1307 = vadd.xlane.f32.xlu0 %v1306_v4 }
 0x763   :  { %v11132_v7 = vpop.eup %9514 }
 0x764   :  { %v1312_v9 = vsel %vm832_vm3, %v11132_v7, 0.0  ;;  %v11136_v11 = vpop.eup %9516 }
 0x765   :  { %v1309_v13 = vsel %vm832_vm3, %v11136_v11, 0.0 }
 0x766   :  { %1313 = vadd.xlane.f32.xlu0 %v1312_v9 }
 0x76a   :  { %1310 = vadd.xlane.f32.xlu0 %v1309_v13 }
 0x76e   :  { %9279 = vrot.lane.b32.xlu1 %v10796_v30, %s10434_s0 }
 0x772   :  { %9284 = vrot.lane.b32.xlu1 %v10800_v35, %s10434_s0 }
 0x776   :  { %9289 = vrot.lane.b32.xlu1 %v10784_v19, %s10435_s25 }
 0x77a   :  { %9294 = vrot.lane.b32.xlu1 %v10792_v25, %s10435_s25 }
 0x77e   :  { %9304 = vrot.lane.b32.xlu1 %v10800_v35, %s10435_s25 }
 0x780   :  { %9274 = vrot.lane.b32.xlu0 %v10792_v25, %s10434_s0 }
 0x782   :  { %2291 = vrot.lane.b32.xlu1 %v10826_v53, %s10436_s14  ;;  %v11172_v53 = vadd.f32 %v11090_v16, %v10855_v60  ;;  %v11198_v60 = vadd.f32 %v11096_v22, %v10863_v2  ;;  %v11212_v2 = vadd.f32 %v11104_v31, %v10882_v17 }
 0x784   :  { %9299 = vrot.lane.b32.xlu0 %v10796_v30, %s10435_s25 }
 0x786   :  { %2295 = vrot.lane.b32.xlu1 %v10834_v55, %s10436_s14  ;;  %v1914_v55 = vsel %vm832_vm3, %v11172_v53, -inf }
 0x788   :  { %2289 = vrot.lane.b32.xlu0 %v10786_v20, %s10436_s14  ;;  %v11176_v20 = vadd.f32 %v11092_v18, %v10858_v61  ;;  %v1932_v18 = vsel %vm832_vm3, %v11212_v2, -inf }
 0x78a   :  { %2299 = vrot.lane.b32.xlu1 %v10842_v57, %s10436_s14  ;;  %v1911_v57 = vsel %vm832_vm3, %v11176_v20, -inf }
 0x78c   :  { %2293 = vrot.lane.b32.xlu0 %v10828_v54, %s10436_s14  ;;  %v11180_v54 = vadd.f32 %v11102_v27, %v10895_v24  ;;  %v11206_v24 = vadd.f32 %v11100_v23, %v10877_v12 }
 0x78e   :  { %2303 = vrot.lane.b32.xlu1 %v10850_v59, %s10436_s14  ;;  %v1923_v59 = vsel %vm832_vm3, %v11180_v54, -inf  ;;  %v1926_v16 = vsel %vm832_vm3, %v11206_v24, -inf }
 0x790   :  { %2297 = vrot.lane.b32.xlu0 %v10836_v56, %s10436_s14  ;;  %v11186_v56 = vadd.f32 %v11098_v5, %v10871_v8 }
 0x792   :  { %v1917_v61 = vsel %vm832_vm3, %v11186_v56, -inf }
 0x794   :  { %2301 = vrot.lane.b32.xlu0 %v10844_v58, %s10436_s14  ;;  %v11192_v58 = vadd.f32 %v11106_v32, %v10902_v28  ;;  %v1920_v28 = vsel %vm832_vm3, %v11198_v60, -inf }
 0x796   :  { %v1929_v8 = vsel %vm832_vm3, %v11192_v58, -inf }
 0x7b2   :  { %1915 = vmax.xlane.f32.xlu1 %v1914_v55 }
 0x7b3   :  { %1912 = vmax.xlane.f32.xlu0 %v1911_v57 }
 0x7b6   :  { %1924 = vmax.xlane.f32.xlu1 %v1923_v59 }
 0x7b7   :  { %1918 = vmax.xlane.f32.xlu0 %v1917_v61 }
 0x7ba   :  { %1930 = vmax.xlane.f32.xlu1 %v1929_v8 }
 0x7bb   :  { %1921 = vmax.xlane.f32.xlu0 %v1920_v28 }
 0x7bf   :  { %1927 = vmax.xlane.f32.xlu0 %v1926_v16 }
 0x7c3   :  { %1933 = vmax.xlane.f32.xlu0 %v1932_v18 }
 0x7cb   :  { %9309 = vrot.lane.b32.xlu1 %v10784_v19, %s10437_s6 }
 0x7e1   :  { %v1296_v5 = vpop.xlane.xlu0 %1295 }
 0x7e2   :  { %v1293_v12 = vpop.xlane.xlu1 %1292 }
 0x7e3   :  { %9518 = vrcp.f32 %v1293_v12 }
 0x7e4   :  { %9520 = vrcp.f32 %v1296_v5 }
 0x7e6   :  { %v1299_v22 = vpop.xlane.xlu1 %1298 }
 0x7e7   :  { %9522 = vrcp.f32 %v1299_v22 }
 0x7ea   :  { %v1305_v23 = vpop.xlane.xlu1 %1304 }
 0x7eb   :  { %v1302_v27 = vpop.xlane.xlu0 %1301 }
 0x7ec   :  { %9524 = vrcp.f32 %v1302_v27 }
 0x7ed   :  { %v9519_v17 = vpop.eup %9518  ;;  %9526 = vrcp.f32 %v1305_v23 }
 0x7ee   :  { %v9280_v31 = vpop.permute.xlu1 %9279  ;;  %v1323_v32 = vmul.f32 %v9519_v17, %v11110_v46  ;;  %v9521_v12 = vpop.eup %9520 }
 0x7ef   :  { %v1308_v44 = vpop.xlane.xlu0 %1307  ;;  %v9282_v45 = vunpack.i.h.bf16 %v9280_v31  ;;  %v9281_v47 = vunpack.i.l.bf16 %v9280_v31  ;;  %v1324_v27 = vmul.f32 %v9521_v12, %v11108_v14 }
 0x7f0   :  { %8114 = vmatprep.mubr.msk.f32.mxu1 %vm832_vm3, %v1323_v32  ;;  %9528 = vrcp.f32 %v1308_v44 }
 0x7f1   :  { %v8777_v13 = vpack.c.bf16 %v9282_v45, %v9281_v47  ;;  %v9523_v23 = vpop.eup %9522 }
 0x7f2   :  { %v9285_v15 = vpop.permute.xlu1 %9284  ;;  %v1325_v32 = vmul.f32 %v9523_v23, %v11116_v21 }
 0x7f3   :  { %v1314_v62 = vpop.xlane.xlu0 %1313  ;;  %v9287_v55 = vunpack.i.h.bf16 %v9285_v15  ;;  %v9286_v57 = vunpack.i.l.bf16 %v9285_v15 }
 0x7f5   :  { %v8781_v18 = vpack.c.bf16 %v9287_v55, %v9286_v57 }
 0x7f6   :  { %v9290_v33 = vpop.permute.xlu1 %9289  ;;  %v9525_v17 = vpop.eup %9524 }
 0x7f7   :  { %v9292_v6 = vunpack.i.h.bf16 %v9290_v33  ;;  %v9291_v3 = vunpack.i.l.bf16 %v9290_v33  ;;  %v1311_v63 = vpop.xlane.xlu0 %1310  ;;  %v9527_v15 = vpop.eup %9526  ;;  %v1326_v44 = vmul.f32 %v9525_v17, %v11122_v29 }
 0x7f8   :  { %9530 = vrcp.f32 %v1311_v63  ;;  %v1327_v14 = vmul.f32 %v9527_v15, %v11120_v50 }
 0x7f9   :  { %v8825_v34 = vpack.c.bf16 %v9292_v6, %v9291_v3  ;;  %9532 = vrcp.f32 %v1314_v62 }
 0x7fa   :  { %v9295_v10 = vpop.permute.xlu1 %9294  ;;  %v9529_v62 = vpop.eup %9528 }
 0x7fb   :  { %v9297_v48 = vunpack.i.h.bf16 %v9295_v10  ;;  %v9296_v49 = vunpack.i.l.bf16 %v9295_v10  ;;  %v9275_v52 = vpop.permute.xlu0 %9274  ;;  %8827 = vmatprep.subr.msk.bf16.mxu0 %vm10806_vm2, %v8825_v34  ;;  %v1328_v21 = vmul.f32 %v9529_v62, %v11128_v1  ;;  %v421_v62 = vld [vmem:[#allocation5 + $0x8] sm:$0xff] }
 0x7fc   :  { %v9277_v46 = vunpack.i.h.bf16 %v9275_v52  ;;  %v9276_v51 = vunpack.i.l.bf16 %v9275_v52  ;;  %8830 = vmatpush3.bf16.xpose.msk.msra.mxu0 %vm10806_vm2, %v8825_v34 }
 0x7fd   :  { %v8831_v0 = vpack.c.bf16 %v9297_v48, %v9296_v49 }
 0x7fe   :  { %v8773_v4 = vpack.c.bf16 %v9277_v46, %v9276_v51  ;;  %v9305_v16 = vpop.permute.xlu1 %9304 }
 0x7ff   :  { %v9300_v9 = vpop.permute.xlu0 %9299  ;;  %8833 = vmatprep.subr.msk.bf16.mxu0 %vm10806_vm2, %v8831_v0  ;;  %v9307_v22 = vunpack.i.h.bf16 %v9305_v16  ;;  %v9306_v5 = vunpack.i.l.bf16 %v9305_v16 }
 0x800   :  { %v9302_v59 = vunpack.i.h.bf16 %v9300_v9  ;;  %v9301_v61 = vunpack.i.l.bf16 %v9300_v9  ;;  %8774 = vmatprep.subr.bf16.mxu1 %v8773_v4 }
 0x801   :  { %8776 = vmatpush3.bf16.msra.mxu1 %v8773_v4  ;;  %v8843_v31 = vpack.c.bf16 %v9307_v22, %v9306_v5 }
 0x802   :  { %8778 = vmatprep.subr.bf16.mxu1 %v8777_v13  ;;  %v8837_v8 = vpack.c.bf16 %v9302_v59, %v9301_v61  ;;  %v9531_v33 = vpop.eup %9530  ;;  %v2292_v63 = vpop.permute.xlu1 %2291 }
 0x803   :  { %v2290_v28 = vpop.permute.xlu0 %2289  ;;  %v9533_v6 = vpop.eup %9532  ;;  %v1329_v3 = vmul.f32 %v9531_v33, %v11136_v11 }
 0x804   :  { %8240 = vmatprep.mubr.msk.f32.mxu0 %vm686_vm1, %v2290_v28  ;;  %8836 = vmatpush3.bf16.xpose.msk.msra.mxu0 %vm10806_vm2, %v8831_v0  ;;  %v1330_v50 = vmul.f32 %v9533_v6, %v11132_v7 }
 0x805   :  { %8780 = vmatpush3.bf16.msra.mxu1 %v8777_v13  ;;  %8839 = vmatprep.subr.msk.bf16.mxu0 %vm10806_vm2, %v8837_v8 }
 0x806   :  { %8782 = vmatprep.subr.bf16.mxu1 %v8781_v18  ;;  %v2296_v34 = vpop.permute.xlu1 %2295 }
 0x807   :  { %v2294_v29 = vpop.permute.xlu0 %2293 }
 0x809   :  { %8784 = vmatpush3.bf16.msra.mxu1 %v8781_v18 }
 0x80a   :  { %v2300_v11 = vpop.permute.xlu1 %2299  ;;  %8126 = vmatprep.subr.mxu1 %v421_v62 }
 0x80b   :  { %v2298_v1 = vpop.permute.xlu0 %2297 }
 0x80c   :  { %8115 = vmatmul.mubr.msk.f32.vlgmr.msra.gmra.mrb[8].mxu1 %vm832_vm3, %v1324_v27  ;;  %8842 = vmatpush3.bf16.xpose.msk.msra.mxu0 %vm10806_vm2, %v8837_v8 }
 0x80d   :  { %8117 = vmatprep.mubr.msk.f32.mxu1 %vm832_vm3, %v1325_v32  ;;  %8845 = vmatprep.subr.msk.bf16.mxu0 %vm10806_vm2, %v8843_v31 }
 0x80e   :  { %v2304_v7 = vpop.permute.xlu1 %2303  ;;  %8127 = vmatpush3.msra.mxu1 %v421_v62 }
 0x80f   :  { %v2302_v10 = vpop.permute.xlu0 %2301 }
 0x810   :  { %8118 = vmatmul.mubr.msk.f32.gmra.mrb[10].mxu1 %vm832_vm3, %v1326_v44 }
 0x811   :  { %8120 = vmatprep.mubr.msk.f32.mxu1 %vm832_vm3, %v1327_v14 }
 0x814   :  { %8121 = vmatmul.mubr.msk.f32.gmra.mrb[12].mxu1 %vm832_vm3, %v1328_v21  ;;  %8848 = vmatpush3.bf16.xpose.msk.msra.mxu0 %vm10806_vm2, %v8843_v31  ;;  %v420_v21 = vld [vmem:[#allocation5] sm:$0xff] }
 0x815   :  { %8123 = vmatprep.mubr.msk.f32.mxu1 %vm832_vm3, %v1329_v3  ;;  %8140 = vmatprep.subr.mxu1 %v420_v21 }
 0x818   :  { %8124 = vmatmul.mubr.msk.f32.gmra.mrb[14].mxu1 %vm832_vm3, %v1330_v50 }
 0x81b   :  { %8241 = vmatmul.mubr.msk.f32.vlgmr.msra.gmra.mrb[32].mxu0 %vm686_vm1, %v2292_v63 }
 0x81c   :  { %8243 = vmatprep.mubr.msk.f32.mxu0 %vm686_vm1, %v2294_v29 }
 0x81f   :  { %8244 = vmatmul.mubr.msk.f32.gmra.mrb[34].mxu0 %vm686_vm1, %v2296_v34 }
 0x820   :  { %8246 = vmatprep.mubr.msk.f32.mxu0 %vm686_vm1, %v2298_v1 }
 0x823   :  { %8247 = vmatmul.mubr.msk.f32.gmra.mrb[36].mxu0 %vm686_vm1, %v2300_v11 }
 0x824   :  { %8249 = vmatprep.mubr.msk.f32.mxu0 %vm686_vm1, %v2302_v10 }
 0x827   :  { %8250 = vmatmul.mubr.msk.f32.gmra.mrb[38].mxu0 %vm686_vm1, %v2304_v7 }
 0x83f   :  { %v1916_v45 = vpop.xlane.xlu1 %1915 }
 0x840   :  { %v1936_v47 = vsub.f32 %v11172_v53, %v1916_v45  ;;  %v1913_v48 = vpop.xlane.xlu0 %1912 }
 0x841   :  { %v1935_v49 = vsub.f32 %v11176_v20, %v1913_v48 }
 0x842   :  { %v1945_v52 = vmul.f32 1.442695, %v1936_v47 }
 0x843   :  { %v1943_v46 = vmul.f32 1.442695, %v1935_v49  ;;  %v1925_v51 = vpop.xlane.xlu1 %1924 }
 0x844   :  { %9534 = vpow2.f32 %v1945_v52  ;;  %v1939_v0 = vsub.f32 %v11180_v54, %v1925_v51  ;;  %v1919_v4 = vpop.xlane.xlu0 %1918 }
 0x845   :  { %9536 = vpow2.f32 %v1943_v46  ;;  %v1937_v9 = vsub.f32 %v11186_v56, %v1919_v4 }
 0x846   :  { %v1951_v13 = vmul.f32 1.442695, %v1939_v0 }
 0x847   :  { %v1947_v55 = vmul.f32 1.442695, %v1937_v9  ;;  %v1931_v61 = vpop.xlane.xlu1 %1930 }
 0x848   :  { %v1922_v57 = vpop.xlane.xlu0 %1921  ;;  %v1941_v16 = vsub.f32 %v11192_v58, %v1931_v61 }
 0x849   :  { %9538 = vpow2.f32 %v1947_v55  ;;  %v1938_v59 = vsub.f32 %v11198_v60, %v1922_v57  ;;  %v9830_v55 = vld [vmem:[%s12346_s11 + $0x8] sm:$0xff] }
 0x84a   :  { %9540 = vpow2.f32 %v1951_v13  ;;  %v1955_v5 = vmul.f32 1.442695, %v1941_v16 }
 0x84b   :  { %v1949_v53 = vmul.f32 1.442695, %v1938_v59  ;;  %v9310_v3 = vpop.permute.xlu1 %9309 }
 0x84c   :  { %v1928_v20 = vpop.xlane.xlu0 %1927  ;;  %v9312_v63 = vunpack.i.h.bf16 %v9310_v3  ;;  %v9311_v50 = vunpack.i.l.bf16 %v9310_v3  ;;  %v9835_v3 = vld [vmem:[%s12346_s11 + $0x20] sm:$0xff] }
 0x84d   :  { %9542 = vpow2.f32 %v1949_v53  ;;  %v1940_v8 = vsub.f32 %v11206_v24, %v1928_v20  ;;  %v9831_v53 = vld [vmem:[%s12346_s11] sm:$0xff] }
 0x84e   :  { %v11266_v28 = vpop.eup %9534  ;;  %v8809_v10 = vpack.c.bf16 %v9312_v63, %v9311_v50 }
 0x84f   :  { %v11268_v54 = vpop.eup %9536  ;;  %v1953_v56 = vmul.f32 1.442695, %v1940_v8  ;;  %v1962_v18 = vsel %vm832_vm3, %v11266_v28, 0.0 }
 0x850   :  { %v1934_v12 = vpop.xlane.xlu0 %1933  ;;  %1963 = vadd.xlane.f32.xlu0 %v1962_v18  ;;  %v1959_v60 = vsel %vm832_vm3, %v11268_v54, 0.0 }
 0x851   :  { %9544 = vpow2.f32 %v1953_v56  ;;  %v1942_v22 = vsub.f32 %v11212_v2, %v1934_v12  ;;  %1960 = vadd.xlane.f32.xlu1 %v1959_v60  ;;  %v9832_v56 = vld [vmem:[%s12346_s11 + $0x18] sm:$0xff] }
 0x853   :  { %v11276_v24 = vpop.eup %9538  ;;  %v1957_v23 = vmul.f32 1.442695, %v1942_v22  ;;  %v9833_v22 = vld [vmem:[%s12346_s11 + $0x10] sm:$0xff] }
 0x854   :  { %v1965_v58 = vsel %vm832_vm3, %v11276_v24, 0.0  ;;  %v11280_v27 = vpop.eup %9540 }
 0x855   :  { %9546 = vpow2.f32 %v1957_v23  ;;  %1966 = vadd.xlane.f32.xlu1 %v1965_v58  ;;  %v1971_v31 = vsel %vm832_vm3, %v11280_v27, 0.0 }
 0x856   :  { %9548 = vpow2.f32 %v1955_v5 }
 0x857   :  { %v11282_v17 = vpop.eup %9542 }
 0x858   :  { %v1968_v2 = vsel %vm832_vm3, %v11282_v17, 0.0 }
 0x859   :  { %1972 = vadd.xlane.f32.xlu1 %v1971_v31  ;;  %1969 = vadd.xlane.f32.xlu0 %v1968_v2 }
 0x85b   :  { %v11288_v32 = vpop.eup %9544 }
 0x85c   :  { %v1974_v15 = vsel %vm832_vm3, %v11288_v32, 0.0 }
 0x85d   :  { %1975 = vadd.xlane.f32.xlu0 %v1974_v15 }
 0x85f   :  { %v11292_v44 = vpop.eup %9546 }
 0x860   :  { %v1980_v14 = vsel %vm832_vm3, %v11292_v44, 0.0  ;;  %v11296_v33 = vpop.eup %9548 }
 0x861   :  { %1981 = vadd.xlane.f32.xlu0 %v1980_v14  ;;  %v1977_v6 = vsel %vm832_vm3, %v11296_v33, 0.0 }
 0x865   :  { %1978 = vadd.xlane.f32.xlu0 %v1977_v6 }
 0x86a   :  { %9319 = vrot.lane.b32.xlu1 %v10796_v30, %s10437_s6 }
 0x86e   :  { %9324 = vrot.lane.b32.xlu1 %v10800_v35, %s10437_s6 }
 0x87b   :  { %9314 = vrot.lane.b32.xlu0 %v10792_v25, %s10437_s6 }
 0x8dd   :  { %v1964_v11 = vpop.xlane.xlu0 %1963 }
 0x8de   :  { %v1961_v1 = vpop.xlane.xlu1 %1960 }
 0x8df   :  { %v8116_v29 = vpop.f32.mrb[8].mxu1  ;;  %9550 = vrcp.f32 %v1961_v1 }
 0x8e0   :  { %v1445_v34 = vpop.f32.mrb[9].mxu1  ;;  %9552 = vrcp.f32 %v1964_v11  ;;  %v9836_v11 = vld [vmem:[%s12346_s11 + $0x38] sm:$0xff] }
 0x8e1   :  { %8128 = vmatprep.mubr.msk.f32.mxu1 %vm686_vm1, %v1445_v34 }
 0x8e2   :  { %8129 = vmatmul.mubr.msk.f32.vlgmr.msra.gmra.mrb[16].mxu1 %vm686_vm1, %v8116_v29  ;;  %v1967_v48 = vpop.xlane.xlu1 %1966 }
 0x8e3   :  { %8141 = vmatpush3.msra.mxu1 %v420_v21  ;;  %v8119_v7 = vpop.f32.mrb[10].mxu1  ;;  %9554 = vrcp.f32 %v1967_v48 }
 0x8e4   :  { %8810 = vmatprep.subr.bf16.mxu1 %v8809_v10  ;;  %v1455_v45 = vpop.f32.mrb[11].mxu1 }
 0x8e5   :  { %8131 = vmatprep.mubr.msk.f32.mxu1 %vm686_vm1, %v1455_v45 }
 0x8e6   :  { %v11309_v47 = vpop.xlane.xlu0 %1969  ;;  %8132 = vmatmul.mubr.msk.f32.gmra.mrb[18].mxu1 %vm686_vm1, %v8119_v7  ;;  %v11316_v4 = vpop.xlane.xlu1 %1972 }
 0x8e7   :  { %v8122_v49 = vpop.f32.mrb[12].mxu1  ;;  %9556 = vrcp.f32 %v11309_v47 }
 0x8e8   :  { %v1465_v52 = vpop.f32.mrb[13].mxu1  ;;  %9558 = vrcp.f32 %v11316_v4 }
 0x8e9   :  { %8134 = vmatprep.mubr.msk.f32.mxu1 %vm686_vm1, %v1465_v52  ;;  %v9551_v34 = vpop.eup %9550  ;;  %v9837_v52 = vld [vmem:[%s12346_s11 + $0x30] sm:$0xff] }
 0x8ea   :  { %v11313_v46 = vpop.xlane.xlu0 %1975  ;;  %8135 = vmatmul.mubr.msk.f32.gmra.mrb[20].mxu1 %vm686_vm1, %v8122_v49 }
 0x8eb   :  { %v8125_v51 = vpop.f32.mrb[14].mxu1  ;;  %9560 = vrcp.f32 %v11313_v46 }
 0x8ec   :  { %v1475_v0 = vpop.f32.mrb[15].mxu1 }
 0x8ed   :  { %8137 = vmatprep.mubr.msk.f32.mxu1 %vm686_vm1, %v1475_v0 }
 0x8ee   :  { %v11319_v9 = vpop.xlane.xlu0 %1981  ;;  %8138 = vmatmul.mubr.msk.f32.gmra.mrb[22].mxu1 %vm686_vm1, %v8125_v51  ;;  %v8242_v13 = vpop.f32.mrb[32].mxu0 }
 0x8ef   :  { %8142 = vmatprep.mubr.msk.f32.mxu1 %vm686_vm1, %v11060_v37  ;;  %v11325_v57 = vadd.f32 %v9830_v55, %v8242_v13  ;;  %v2419_v59 = vpop.f32.mrb[33].mxu0  ;;  %v9320_v37 = vpop.permute.xlu1 %9319 }
 0x8f0   :  { %v11328_v61 = vadd.f32 %v9831_v53, %v2419_v59  ;;  %v9322_v21 = vunpack.i.h.bf16 %v9320_v37  ;;  %v9321_v6 = vunpack.i.l.bf16 %v9320_v37 }
 0x8f1   :  { %v2461_v8 = vsel %vm832_vm3, %v11325_v57, -inf }
 0x8f2   :  { %v11330_v20 = vpop.xlane.xlu0 %1978  ;;  %8143 = vmatmul.mubr.msk.f32.vlgmr.msra.gmra.mrb[16].mxu1 %vm686_vm1, %v11058_v26  ;;  %v8245_v16 = vpop.f32.mrb[34].mxu0  ;;  %2462 = vmax.xlane.f32.xlu0 %v2461_v8  ;;  %v2458_v60 = vsel %vm832_vm3, %v11328_v61, -inf }
 0x8f3   :  { %8812 = vmatpush3.bf16.msra.mxu1 %v8809_v10  ;;  %v11337_v18 = vadd.f32 %v9832_v56, %v8245_v16  ;;  %v2429_v12 = vpop.f32.mrb[35].mxu0  ;;  %8145 = vmatprep.mubr.msk.f32.mxu1 %vm686_vm1, %v11064_v38  ;;  %v9834_v38 = vld [vmem:[%s12346_s11 + $0x28] sm:$0xff]  ;;  %9562 = vrcp.f32 %v11330_v20 }
 0x8f4   :  { %v11344_v26 = vadd.f32 %v9833_v22, %v2429_v12  ;;  %2459 = vmax.xlane.f32.xlu1 %v2458_v60  ;;  %9564 = vrcp.f32 %v11319_v9 }
 0x8f5   :  { %v2467_v5 = vsel %vm832_vm3, %v11337_v18, -inf }
 0x8f6   :  { %v9315_v23 = vpop.permute.xlu0 %9314  ;;  %8146 = vmatmul.mubr.msk.f32.gmra.mrb[18].mxu1 %vm686_vm1, %v11062_v36  ;;  %v8248_v58 = vpop.f32.mrb[36].mxu0  ;;  %v2464_v31 = vsel %vm832_vm3, %v11344_v26, -inf  ;;  %2468 = vmax.xlane.f32.xlu0 %v2467_v5 }
 0x8f7   :  { %v9317_v2 = vunpack.i.h.bf16 %v9315_v23  ;;  %v9316_v15 = vunpack.i.l.bf16 %v9315_v23  ;;  %8148 = vmatprep.mubr.msk.f32.mxu1 %vm686_vm1, %v11068_v41  ;;  %v11355_v62 = vadd.f32 %v9834_v38, %v8248_v58  ;;  %v2439_v14 = vpop.f32.mrb[37].mxu0  ;;  %v9325_v36 = vpop.permute.xlu1 %9324 }
 0x8f8   :  { %v11358_v63 = vadd.f32 %v9835_v3, %v2439_v14  ;;  %2465 = vmax.xlane.f32.xlu1 %v2464_v31  ;;  %v9327_v45 = vunpack.i.h.bf16 %v9325_v36  ;;  %v9326_v49 = vunpack.i.l.bf16 %v9325_v36 }
 0x8f9   :  { %v2473_v50 = vsel %vm832_vm3, %v11355_v62, -inf  ;;  %v8813_v29 = vpack.c.bf16 %v9317_v2, %v9316_v15 }
 0x8fa   :  { %8149 = vmatmul.mubr.msk.f32.gmra.mrb[20].mxu1 %vm686_vm1, %v11066_v40  ;;  %v8251_v41 = vpop.f32.mrb[38].mxu0  ;;  %v2470_v1 = vsel %vm832_vm3, %v11358_v63, -inf  ;;  %2474 = vmax.xlane.f32.xlu0 %v2473_v50  ;;  %v8817_v40 = vpack.c.bf16 %v9322_v21, %v9321_v6  ;;  %v8821_v47 = vpack.c.bf16 %v9327_v45, %v9326_v49 }
 0x8fb   :  { %8151 = vmatprep.mubr.msk.f32.mxu1 %vm686_vm1, %v11072_v43  ;;  %v11369_v10 = vadd.f32 %v9836_v11, %v8251_v41  ;;  %v2449_v7 = vpop.f32.mrb[39].mxu0  ;;  %8814 = vmatprep.subr.bf16.mxu1 %v8813_v29  ;;  %v1991_v43 = vmul.f32 %v9551_v34, %v11268_v54  ;;  %v9553_v54 = vpop.eup %9552 }
 0x8fc   :  { %v11372_v48 = vadd.f32 %v9837_v52, %v2449_v7  ;;  %2471 = vmax.xlane.f32.xlu1 %v2470_v1  ;;  %8816 = vmatpush3.bf16.msra.mxu1 %v8813_v29  ;;  %v9555_v4 = vpop.eup %9554 }
 0x8fd   :  { %v2479_v51 = vsel %vm832_vm3, %v11369_v10, -inf  ;;  %8818 = vmatprep.subr.bf16.mxu1 %v8817_v40  ;;  %v9557_v13 = vpop.eup %9556  ;;  %v1993_v55 = vmul.f32 %v9555_v4, %v11276_v24 }
 0x8fe   :  { %8152 = vmatmul.mubr.msk.f32.gmra.mrb[22].mxu1 %vm686_vm1, %v11070_v42  ;;  %v2476_v0 = vsel %vm832_vm3, %v11372_v48, -inf  ;;  %2480 = vmax.xlane.f32.xlu0 %v2479_v51  ;;  %v1992_v42 = vmul.f32 %v9553_v54, %v11266_v28  ;;  %v9559_v59 = vpop.eup %9558  ;;  %v1994_v46 = vmul.f32 %v9557_v13, %v11282_v17  ;;  %v422_v17 = vld [vmem:[#allocation5 + $0x10] sm:$0xff] }
 0x8ff   :  { %8198 = vmatprep.mubr.msk.f32.mxu1 %vm832_vm3, %v1991_v43  ;;  %v9561_v53 = vpop.eup %9560  ;;  %v1995_v20 = vmul.f32 %v9559_v59, %v11280_v27 }
 0x900   :  { %2477 = vmax.xlane.f32.xlu1 %v2476_v0  ;;  %8820 = vmatpush3.bf16.msra.mxu1 %v8817_v40  ;;  %v9563_v8 = vpop.eup %9562  ;;  %v1996_v28 = vmul.f32 %v9561_v53, %v11288_v32 }
 0x901   :  { %8822 = vmatprep.subr.bf16.mxu1 %v8821_v47  ;;  %v9565_v9 = vpop.eup %9564  ;;  %v1997_v24 = vmul.f32 %v9563_v8, %v11296_v33 }
 0x902   :  { %v1998_v27 = vmul.f32 %v9565_v9, %v11292_v44 }
 0x904   :  { %8824 = vmatpush3.bf16.msra.mxu1 %v8821_v47 }
 0x905   :  { %8210 = vmatprep.subr.mxu1 %v422_v17 }
 0x907   :  { %8199 = vmatmul.mubr.msk.f32.vlgmr.msra.gmra.mrb[24].mxu1 %vm832_vm3, %v1992_v42 }
 0x908   :  { %8201 = vmatprep.mubr.msk.f32.mxu1 %vm832_vm3, %v1993_v55  ;;  %8211 = vmatpush3.msra.mxu1 %v422_v17 }
 0x90b   :  { %8202 = vmatmul.mubr.msk.f32.gmra.mrb[26].mxu1 %vm832_vm3, %v1994_v46 }
 0x90c   :  { %8204 = vmatprep.mubr.msk.f32.mxu1 %vm832_vm3, %v1995_v20 }
 0x90f   :  { %8205 = vmatmul.mubr.msk.f32.gmra.mrb[28].mxu1 %vm832_vm3, %v1996_v28 }
 0x910   :  { %8207 = vmatprep.mubr.msk.f32.mxu1 %vm832_vm3, %v1997_v24 }
 0x911   :  { %9329 = vrot.lane.b32.xlu1 %v10784_v19, %s10438_s18 }
 0x913   :  { %8208 = vmatmul.mubr.msk.f32.gmra.mrb[30].mxu1 %vm832_vm3, %v1998_v27 }
 0x914   :  { %9334 = vrot.lane.b32.xlu0 %v10792_v25, %s10438_s18 }
 0x97f   :  { %v2463_v32 = vpop.xlane.xlu0 %2462 }
 0x980   :  { %v2483_v33 = vsub.f32 %v11325_v57, %v2463_v32 }
 0x981   :  { %v2460_v16 = vpop.xlane.xlu1 %2459 }
 0x982   :  { %v2482_v37 = vsub.f32 %v11328_v61, %v2460_v16  ;;  %v2492_v56 = vmul.f32 1.442695, %v2483_v33 }
 0x983   :  { %v2469_v60 = vpop.xlane.xlu0 %2468 }
 0x984   :  { %v2490_v12 = vmul.f32 1.442695, %v2482_v37  ;;  %9566 = vpow2.f32 %v2492_v56  ;;  %v2485_v19 = vsub.f32 %v11337_v18, %v2469_v60 }
 0x985   :  { %v2466_v44 = vpop.xlane.xlu1 %2465 }
 0x986   :  { %9568 = vpow2.f32 %v2490_v12  ;;  %v2484_v22 = vsub.f32 %v11344_v26, %v2466_v44  ;;  %v2496_v5 = vmul.f32 1.442695, %v2485_v19 }
 0x987   :  { %v2475_v25 = vpop.xlane.xlu0 %2474 }
 0x988   :  { %v2494_v23 = vmul.f32 1.442695, %v2484_v22  ;;  %9570 = vpow2.f32 %v2496_v5  ;;  %v2487_v58 = vsub.f32 %v11355_v62, %v2475_v25 }
 0x989   :  { %v2472_v57 = vpop.xlane.xlu1 %2471 }
 0x98a   :  { %9572 = vpow2.f32 %v2494_v23  ;;  %v2486_v61 = vsub.f32 %v11358_v63, %v2472_v57  ;;  %v2500_v31 = vmul.f32 1.442695, %v2487_v58 }
 0x98b   :  { %v2481_v7 = vpop.xlane.xlu0 %2480 }
 0x98c   :  { %v2498_v2 = vmul.f32 1.442695, %v2486_v61  ;;  %9574 = vpow2.f32 %v2500_v31  ;;  %v2489_v45 = vsub.f32 %v11369_v10, %v2481_v7 }
 0x98d   :  { %v2478_v15 = vpop.xlane.xlu1 %2477 }
 0x98e   :  { %9576 = vpow2.f32 %v2498_v2  ;;  %v11411_v18 = vpop.eup %9566  ;;  %v2488_v49 = vsub.f32 %v11372_v48, %v2478_v15  ;;  %v2504_v52 = vmul.f32 1.442695, %v2489_v45 }
 0x98f   :  { %v2509_v26 = vsel %vm832_vm3, %v11411_v18, 0.0 }
 0x990   :  { %v11413_v38 = vpop.eup %9568  ;;  %2510 = vadd.xlane.f32.xlu0 %v2509_v26  ;;  %v2502_v40 = vmul.f32 1.442695, %v2488_v49  ;;  %9578 = vpow2.f32 %v2504_v52 }
 0x991   :  { %v9330_v14 = vpop.permute.xlu1 %9329  ;;  %v2506_v62 = vsel %vm832_vm3, %v11413_v38, 0.0 }
 0x992   :  { %v9332_v21 = vunpack.i.h.bf16 %v9330_v14  ;;  %v9331_v6 = vunpack.i.l.bf16 %v9330_v14  ;;  %2507 = vadd.xlane.f32.xlu1 %v2506_v62  ;;  %v11419_v3 = vpop.eup %9570  ;;  %9580 = vpow2.f32 %v2502_v40 }
 0x993   :  { %v2515_v36 = vsel %vm832_vm3, %v11419_v3, 0.0 }
 0x994   :  { %v11421_v63 = vpop.eup %9572  ;;  %v8849_v50 = vpack.c.bf16 %v9332_v21, %v9331_v6  ;;  %2516 = vadd.xlane.f32.xlu0 %v2515_v36  ;;  %v423_v6 = vld [vmem:[#allocation5 + $0x18] sm:$0xff]  ;;  %v425_v36 = vld [vmem:[%s12347_s22] sm:$0xff] }
 0x995   :  { %v2512_v29 = vsel %vm832_vm3, %v11421_v63, 0.0 }
 0x996   :  { %2513 = vadd.xlane.f32.xlu1 %v2512_v29  ;;  %8850 = vmatprep.subr.bf16.mxu1 %v8849_v50  ;;  %v11427_v34 = vpop.eup %9574  ;;  %v427_v29 = vld [vmem:[%s12347_s22 + $0x10] sm:$0xff] }
 0x997   :  { %v2521_v1 = vsel %vm832_vm3, %v11427_v34, 0.0 }
 0x998   :  { %v11429_v41 = vpop.eup %9576  ;;  %2522 = vadd.xlane.f32.xlu0 %v2521_v1 }
 0x999   :  { %v2518_v11 = vsel %vm832_vm3, %v11429_v41, 0.0 }
 0x99a   :  { %2519 = vadd.xlane.f32.xlu1 %v2518_v11  ;;  %v11441_v51 = vpop.eup %9578 }
 0x99b   :  { %v2527_v0 = vsel %vm832_vm3, %v11441_v51, 0.0 }
 0x99c   :  { %v11443_v43 = vpop.eup %9580 }
 0x9ab   :  { %9339 = vrot.lane.b32.xlu1 %v10796_v30, %s10438_s18  ;;  %v2524_v30 = vsel %vm832_vm3, %v11443_v43, 0.0 }
 0x9ae   :  { %9344 = vrot.lane.b32.xlu0 %v10800_v35, %s10438_s18  ;;  %v9335_v35 = vpop.permute.xlu0 %9334 }
 0x9af   :  { %v9337_v10 = vunpack.i.h.bf16 %v9335_v35  ;;  %v9336_v47 = vunpack.i.l.bf16 %v9335_v35  ;;  %v431_v35 = vld [vmem:[%s12347_s22 + $0x30] sm:$0xff] }
 0x9b1   :  { %v8853_v4 = vpack.c.bf16 %v9337_v10, %v9336_v47  ;;  %v10439_v47 = vmov 0.0  }
 0x9b2   :  { %2949 = vmatprep.mubr.f32.mxu0 %v10439_v47 }
 0x9cd   :  { %2528 = vadd.xlane.f32.xlu0 %v2527_v0 }
 0x9cf   :  { %2525 = vadd.xlane.f32.xlu1 %v2524_v30  ;;  %v429_v30 = vld [vmem:[%s12347_s22 + $0x20] sm:$0xff] }
 0x9d0   :  { %v8871_v10 = vpack.c.bf16 %v431_v35, %v429_v30 }
 0x9da   :  { %v8200_v48 = vpop.f32.mrb[24].mxu1 }
 0x9db   :  { %v2113_v54 = vpop.f32.mrb[25].mxu1 }
 0x9dc   :  { %8212 = vmatprep.mubr.msk.f32.mxu1 %vm686_vm1, %v2113_v54 }
 0x9dd   :  { %8213 = vmatmul.mubr.msk.f32.vlgmr.msra.gmra.mrb[16].mxu1 %vm686_vm1, %v8200_v48  ;;  %v7442_v48 = vld [vmem:[#allocation7] ss:$0 sm:$0xff] }
 0x9de   :  { %8852 = vmatpush3.bf16.msra.mxu1 %v8849_v50  ;;  %v8203_v42 = vpop.f32.mrb[26].mxu1 }
 0x9df   :  { %8854 = vmatprep.subr.bf16.mxu1 %v8853_v4  ;;  %v2123_v13 = vpop.f32.mrb[27].mxu1 }
 0x9e0   :  { %8215 = vmatprep.mubr.msk.f32.mxu1 %vm686_vm1, %v2123_v13 }
 0x9e1   :  { %8216 = vmatmul.mubr.msk.f32.gmra.mrb[18].mxu1 %vm686_vm1, %v8203_v42 }
 0x9e2   :  { %8856 = vmatpush3.bf16.msra.mxu1 %v8853_v4  ;;  %v8206_v55 = vpop.f32.mrb[28].mxu1 }
 0x9e3   :  { %v2133_v59 = vpop.f32.mrb[29].mxu1 }
 0x9e4   :  { %8218 = vmatprep.mubr.msk.f32.mxu1 %vm686_vm1, %v2133_v59 }
 0x9e5   :  { %8219 = vmatmul.mubr.msk.f32.gmra.mrb[20].mxu1 %vm686_vm1, %v8206_v55 }
 0x9e6   :  { %v8209_v46 = vpop.f32.mrb[30].mxu1 }
 0x9e7   :  { %v2143_v53 = vpop.f32.mrb[31].mxu1 }
 0x9e8   :  { %8221 = vmatprep.mubr.msk.f32.mxu1 %vm686_vm1, %v2143_v53 }
 0x9e9   :  { %8222 = vmatmul.mubr.msk.f32.gmra.mrb[22].mxu1 %vm686_vm1, %v8209_v46 }
 0xa1d   :  { %v2511_v20 = vpop.xlane.xlu0 %2510 }
 0xa1f   :  { %v2508_v8 = vpop.xlane.xlu1 %2507 }
 0xa20   :  { %9582 = vrcp.f32 %v2508_v8 }
 0xa21   :  { %v2517_v28 = vpop.xlane.xlu0 %2516  ;;  %9584 = vrcp.f32 %v2511_v20 }
 0xa23   :  { %v2514_v9 = vpop.xlane.xlu1 %2513 }
 0xa24   :  { %9586 = vrcp.f32 %v2514_v9 }
 0xa25   :  { %v2523_v24 = vpop.xlane.xlu0 %2522  ;;  %9588 = vrcp.f32 %v2517_v28 }
 0xa27   :  { %v2520_v27 = vpop.xlane.xlu1 %2519 }
 0xa28   :  { %9590 = vrcp.f32 %v2520_v27 }
 0xa29   :  { %v9345_v32 = vpop.permute.xlu0 %9344  ;;  %9592 = vrcp.f32 %v2523_v24 }
 0xa2a   :  { %v9583_v17 = vpop.eup %9582  ;;  %v9347_v37 = vunpack.i.h.bf16 %v9345_v32  ;;  %v9346_v56 = vunpack.i.l.bf16 %v9345_v32 }
 0xa2b   :  { %v9340_v33 = vpop.permute.xlu1 %9339  ;;  %v2538_v16 = vmul.f32 %v9583_v17, %v11413_v38  ;;  %v9585_v22 = vpop.eup %9584 }
 0xa2c   :  { %v9342_v12 = vunpack.i.h.bf16 %v9340_v33  ;;  %v9341_v60 = vunpack.i.l.bf16 %v9340_v33  ;;  %v8861_v44 = vpack.c.bf16 %v9347_v37, %v9346_v56  ;;  %v2539_v23 = vmul.f32 %v9585_v22, %v11411_v18  ;;  %v433_v56 = vld [vmem:[#allocation8] sm:$0x3] }
 0xa2d   :  { %8268 = vmatprep.mubr.msk.f32.mxu1 %vm832_vm3, %v2538_v16  ;;  %v2851_v33 = vlaneseq }
 0xa2e   :  { %v8857_v19 = vpack.c.bf16 %v9342_v12, %v9341_v60  ;;  %v9587_v5 = vpop.eup %9586 }
 0xa2f   :  { %v9589_v25 = vpop.eup %9588  ;;  %v2540_v58 = vmul.f32 %v9587_v5, %v11421_v63  ;;  %v428_v63 = vld [vmem:[%s12347_s22 + $0x18] sm:$0xff]  ;;  %v2852_v16 = vshrl.u32 %v2851_v33, 7 }
 0xa30   :  { %8858 = vmatprep.subr.bf16.mxu1 %v8857_v19  ;;  %v2541_v61 = vmul.f32 %v9589_v25, %v11419_v3  ;;  %v426_v3 = vld [vmem:[%s12347_s22 + $0x8] sm:$0xff] }
 0xa31   :  { %8860 = vmatpush3.bf16.msra.mxu1 %v8857_v19  ;;  %v8865_v50 = vpack.c.bf16 %v428_v63, %v426_v3  ;;  %v11529_v37 = vsub.s32 0, %v2852_v16  ;;  %v11531_v12 = vsub.s32 1, %v2852_v16 }
 0xa32   :  { %8862 = vmatprep.subr.bf16.mxu1 %v8861_v44  ;;  %v9591_v57 = vpop.eup %9590 }
 0xa33   :  { %v9593_v31 = vpop.eup %9592  ;;  %v2542_v2 = vmul.f32 %v9591_v57, %v11429_v41  ;;  %8866 = vmatprep.subr.bf16.mxu0 %v8865_v50  ;;  %v11534_v60 = vrot.slane %v433_v56, %v11529_v37  ;;  %v11537_v19 = vrot.slane %v433_v56, %v11531_v12 }
 0xa34   :  { %v2543_v15 = vmul.f32 %v9593_v31, %v11427_v34  ;;  %v8867_v34 = vpack.c.bf16 %v427_v29, %v425_v36  ;;  %v434_v31 = vld [vmem:[#allocation10] sm:$0x3] }
 0xa35   :  { %8864 = vmatpush3.bf16.msra.mxu1 %v8861_v44 }
 0xa36   :  { %8280 = vmatprep.subr.mxu1 %v423_v6  ;;  %8868 = vmatpush1.bf16.msra.mxu0 %v8867_v34 }
 0xa38   :  { %8269 = vmatmul.mubr.msk.f32.vlgmr.msra.gmra.mrb[32].mxu1 %vm832_vm3, %v2539_v23 }
 0xa39   :  { %8271 = vmatprep.mubr.msk.f32.mxu1 %vm832_vm3, %v2540_v58  ;;  %8281 = vmatpush3.msra.mxu1 %v423_v6 }
 0xa3c   :  { %8272 = vmatmul.mubr.msk.f32.gmra.mrb[34].mxu1 %vm832_vm3, %v2541_v61 }
 0xa3d   :  { %8274 = vmatprep.mubr.msk.f32.mxu1 %vm832_vm3, %v2542_v2 }
 0xa40   :  { %8275 = vmatmul.mubr.msk.f32.gmra.mrb[36].mxu1 %vm832_vm3, %v2543_v15 }
 0xa5a   :  { %v2529_v18 = vpop.xlane.xlu0 %2528 }
 0xa5b   :  { %9594 = vrcp.f32 %v2529_v18 }
 0xa5c   :  { %v2526_v38 = vpop.xlane.xlu1 %2525 }
 0xa5d   :  { %9596 = vrcp.f32 %v2526_v38 }
 0xa65   :  { %v9595_v26 = vpop.eup %9594 }
 0xa66   :  { %v2545_v21 = vmul.f32 %v9595_v26, %v11441_v51  ;;  %v430_v51 = vld [vmem:[%s12347_s22 + $0x28] sm:$0xff]  ;;  %v11546_v26 = vrot.slane %v434_v31, %v11529_v37 }
 0xa67   :  { %v9597_v14 = vpop.eup %9596 }
 0xa68   :  { %v2544_v62 = vmul.f32 %v9597_v14, %v11443_v43  ;;  %v432_v43 = vld [vmem:[%s12347_s22 + $0x38] sm:$0xff]  ;;  %v11549_v14 = vrot.slane %v434_v31, %v11531_v12 }
 0xa69   :  { %v8869_v0 = vpack.c.bf16 %v432_v43, %v430_v51 }
 0xa6a   :  { %8277 = vmatprep.mubr.msk.f32.mxu1 %vm832_vm3, %v2544_v62 }
 0xa6b   :  { %8278 = vmatmul.mubr.msk.f32.gmra.mrb[38].mxu1 %vm832_vm3, %v2545_v21  ;;  %8870 = vmatprep.subr.bf16.mxu0 %v8869_v0 }
 0xa6c   :  { %8872 = vmatpush1.bf16.msra.mxu0 %v8871_v10 }
 0xb0b   :  { %v8270_v41 = vpop.f32.mrb[32].mxu1 }
 0xb0c   :  { %v2660_v1 = vpop.f32.mrb[33].mxu1 }
 0xb0d   :  { %8282 = vmatprep.mubr.msk.f32.mxu1 %vm686_vm1, %v2660_v1 }
 0xb0e   :  { %8283 = vmatmul.mubr.msk.f32.vlgmr.msra.gmra.mrb[16].mxu1 %vm686_vm1, %v8270_v41 }
 0xb0f   :  { %v8273_v11 = vpop.f32.mrb[34].mxu1 }
 0xb10   :  { %v2670_v7 = vpop.f32.mrb[35].mxu1 }
 0xb11   :  { %8285 = vmatprep.mubr.msk.f32.mxu1 %vm686_vm1, %v2670_v7 }
 0xb12   :  { %8286 = vmatmul.mubr.msk.f32.gmra.mrb[18].mxu1 %vm686_vm1, %v8273_v11 }
 0xb13   :  { %v8276_v45 = vpop.f32.mrb[36].mxu1 }
 0xb14   :  { %v2680_v49 = vpop.f32.mrb[37].mxu1 }
 0xb15   :  { %8288 = vmatprep.mubr.msk.f32.mxu1 %vm686_vm1, %v2680_v49 }
 0xb16   :  { %8289 = vmatmul.mubr.msk.f32.gmra.mrb[20].mxu1 %vm686_vm1, %v8276_v45 }
 0xb3e   :  { %v8279_v52 = vpop.f32.mrb[38].mxu1 }
 0xb3f   :  { %v2690_v40 = vpop.f32.mrb[39].mxu1 }
 0xb40   :  { %8291 = vmatprep.mubr.msk.f32.mxu1 %vm686_vm1, %v2690_v40 }
 0xb41   :  { %8292 = vmatmul.mubr.msk.f32.gmra.mrb[22].mxu1 %vm686_vm1, %v8279_v52 }
 0xbe1   :  { %v8284_v54 = vpop.f32.mrb[16].mxu1 }
 0xbe2   :  { %v2789_v4 = vpop.f32.mrb[17].mxu1  ;;  %v11495_v59 = vadd.f32 %v8284_v54, %v7442_v48 }
 0xbe3   :  { %v11490_v42 = vadd.f32 %v7442_v48, %v2789_v4 }
 0xbe5   :  { %v8287_v13 = vpop.f32.mrb[18].mxu1  ;;  %7443 = vmatmul.mubr.msk.f32.vlgmr.msra.gmra.mrb[40].mxu0 %vm524_vm0, %v11490_v42 }
 0xbe6   :  { %v2799_v55 = vpop.f32.mrb[19].mxu1  ;;  %2955 = vmatprep.mubr.f32.mxu0 %v10439_v47  ;;  %v11505_v8 = vadd.f32 %v8287_v13, %v7442_v48 }
 0xbe7   :  { %v11500_v20 = vadd.f32 %v7442_v48, %v2799_v55 }
 0xbe9   :  { %v8290_v46 = vpop.f32.mrb[20].mxu1  ;;  %7444 = vmatmul.mubr.msk.f32.gmra.mrb[42].mxu0 %vm524_vm0, %v11495_v59 }
 0xbea   :  { %v2809_v53 = vpop.f32.mrb[21].mxu1  ;;  %2961 = vmatprep.mubr.f32.mxu0 %v10439_v47  ;;  %v11515_v9 = vadd.f32 %v8290_v46, %v7442_v48 }
 0xbeb   :  { %v11510_v28 = vadd.f32 %v7442_v48, %v2809_v53 }
 0xbed   :  { %7445 = vmatmul.mubr.msk.f32.gmra.mrb[44].mxu0 %vm524_vm0, %v11500_v20 }
 0xbee   :  { %2967 = vmatprep.mubr.f32.mxu0 %v10439_v47 }
 0xbf1   :  { %7446 = vmatmul.mubr.msk.f32.gmra.mrb[46].mxu0 %vm524_vm0, %v11505_v8 }
 0xbf2   :  { %2973 = vmatprep.mubr.f32.mxu0 %v10439_v47 }
 0xbf5   :  { %7447 = vmatmul.mubr.msk.f32.gmra.mrb[48].mxu0 %vm524_vm0, %v11510_v28 }
 0xbf6   :  { %2979 = vmatprep.mubr.f32.mxu0 %v10439_v47 }
 0xbf9   :  { %7448 = vmatmul.mubr.msk.f32.gmra.mrb[50].mxu0 %vm524_vm0, %v11515_v9 }
 0xbfa   :  { %2985 = vmatprep.mubr.f32.mxu0 %v10439_v47 }
 0xc14   :  { %v8293_v24 = vpop.f32.mrb[22].mxu1 }
 0xc15   :  { %v2819_v27 = vpop.f32.mrb[23].mxu1  ;;  %v11525_v32 = vadd.f32 %v8293_v24, %v7442_v48 }
 0xc16   :  { %v11520_v17 = vadd.f32 %v7442_v48, %v2819_v27 }
 0xc18   :  { %7449 = vmatmul.mubr.msk.f32.gmra.mrb[52].mxu0 %vm524_vm0, %v11520_v17 }
 0xc19   :  { %2991 = vmatprep.mubr.f32.mxu0 %v10439_v47 }
 0xc1c   :  { %7450 = vmatmul.mubr.msk.f32.gmra.mrb[54].mxu0 %vm524_vm0, %v11525_v32 }
 0xc1d   :  { %8338 = vmatprep.mubr.msk.f32.mxu0 %vm10442_vm4, %v10439_v47 }
 0xcb8   :  { %v2951_v44 = vpop.f32.mrb[40].mxu0 }
 0xcb9   :  { %v2952_v22 = vadd.f32 %v2951_v44, %v11534_v60  ;;  %v2953_v5 = vpop.f32.mrb[41].mxu0 }
 0xcba   :  { %v2954_v23 = vadd.f32 %v2953_v5, %v11537_v19 }
 0xcbb   :  { %9598 = vtanh.f32 %v2952_v22 }
 0xcbc   :  { %9600 = vtanh.f32 %v2954_v23  ;;  %v2957_v25 = vpop.f32.mrb[42].mxu0 }
 0xcbd   :  { %v2958_v58 = vadd.f32 %v2957_v25, %v11534_v60  ;;  %v2959_v57 = vpop.f32.mrb[43].mxu0 }
 0xcbe   :  { %v2960_v61 = vadd.f32 %v2959_v57, %v11537_v19 }
 0xcbf   :  { %9602 = vtanh.f32 %v2958_v58 }
 0xcc0   :  { %9604 = vtanh.f32 %v2960_v61  ;;  %v2963_v2 = vpop.f32.mrb[44].mxu0 }
 0xcc1   :  { %v2964_v15 = vadd.f32 %v2963_v2, %v11534_v60  ;;  %v2965_v18 = vpop.f32.mrb[45].mxu0 }
 0xcc2   :  { %v2966_v38 = vadd.f32 %v2965_v18, %v11537_v19 }
 0xcc3   :  { %9606 = vtanh.f32 %v2964_v15 }
 0xcc4   :  { %9608 = vtanh.f32 %v2966_v38  ;;  %v2969_v62 = vpop.f32.mrb[46].mxu0 }
 0xcc5   :  { %v9599_v21 = vpop.eup %9598  ;;  %v2970_v6 = vadd.f32 %v2969_v62, %v11534_v60  ;;  %v2971_v3 = vpop.f32.mrb[47].mxu0 }
 0xcc6   :  { %v9601_v63 = vpop.eup %9600  ;;  %v2972_v36 = vadd.f32 %v2971_v3, %v11537_v19  ;;  %v3025_v50 = vmul.f32 %v9599_v21, %v11546_v26 }
 0xcc7   :  { %9610 = vtanh.f32 %v2970_v6  ;;  %v3026_v29 = vmul.f32 %v9601_v63, %v11549_v14 }
 0xcc8   :  { %9612 = vtanh.f32 %v2972_v36  ;;  %v2975_v34 = vpop.f32.mrb[48].mxu0 }
 0xcc9   :  { %v9603_v41 = vpop.eup %9602  ;;  %v2976_v1 = vadd.f32 %v2975_v34, %v11534_v60  ;;  %v2977_v11 = vpop.f32.mrb[49].mxu0  ;;  %v3041_v7 = vadd.f32 %v3026_v29, %v3025_v50 }
 0xcca   :  { %v9605_v45 = vpop.eup %9604  ;;  %v2978_v49 = vadd.f32 %v2977_v11, %v11537_v19  ;;  %v3027_v52 = vmul.f32 %v9603_v41, %v11546_v26  ;;  %v483_v11 = vld [vmem:[#allocation29] sm:$0xff] }
 0xccb   :  { %9614 = vtanh.f32 %v2976_v1  ;;  %3042 = vadd.xlane.f32.xlu1 %v3041_v7  ;;  %v3028_v40 = vmul.f32 %v9605_v45, %v11549_v14  ;;  %8310 = vmatprep.mubr.msk.f32.mxu1 %vm832_vm3, %v483_v11  ;;  %v486_v11 = vld [vmem:[#allocation29 + $0x18] sm:$0xff] }
 0xccc   :  { %9616 = vtanh.f32 %v2978_v49  ;;  %v2981_v51 = vpop.f32.mrb[50].mxu0 }
 0xccd   :  { %v9607_v43 = vpop.eup %9606  ;;  %v2982_v0 = vadd.f32 %v2981_v51, %v11534_v60  ;;  %v2983_v30 = vpop.f32.mrb[51].mxu0  ;;  %v3044_v35 = vadd.f32 %v3028_v40, %v3027_v52 }
 0xcce   :  { %v9609_v10 = vpop.eup %9608  ;;  %v2984_v48 = vadd.f32 %v2983_v30, %v11537_v19  ;;  %v3029_v54 = vmul.f32 %v9607_v43, %v11546_v26 }
 0xccf   :  { %9618 = vtanh.f32 %v2982_v0  ;;  %3045 = vadd.xlane.f32.xlu0 %v3044_v35  ;;  %v3030_v4 = vmul.f32 %v9609_v10, %v11549_v14 }
 0xcd0   :  { %9620 = vtanh.f32 %v2984_v48 }
 0xcd1   :  { %v9611_v13 = vpop.eup %9610  ;;  %v3047_v55 = vadd.f32 %v3030_v4, %v3029_v54 }
 0xcd2   :  { %v9613_v46 = vpop.eup %9612  ;;  %v3031_v53 = vmul.f32 %v9611_v13, %v11546_v26 }
 0xcd3   :  { %3048 = vadd.xlane.f32.xlu1 %v3047_v55  ;;  %v3032_v24 = vmul.f32 %v9613_v46, %v11549_v14 }
 0xcd5   :  { %v9615_v27 = vpop.eup %9614  ;;  %v3050_v33 = vadd.f32 %v3032_v24, %v3031_v53 }
 0xcd6   :  { %v9617_v16 = vpop.eup %9616  ;;  %v3033_v56 = vmul.f32 %v9615_v27, %v11546_v26 }
 0xcd7   :  { %3051 = vadd.xlane.f32.xlu0 %v3050_v33  ;;  %v3034_v44 = vmul.f32 %v9617_v16, %v11549_v14 }
 0xcd9   :  { %v9619_v22 = vpop.eup %9618  ;;  %v3053_v5 = vadd.f32 %v3034_v44, %v3033_v56 }
 0xcda   :  { %v9621_v23 = vpop.eup %9620  ;;  %v3035_v25 = vmul.f32 %v9619_v22, %v11546_v26 }
 0xcdb   :  { %3054 = vadd.xlane.f32.xlu1 %v3053_v5  ;;  %v3036_v58 = vmul.f32 %v9621_v23, %v11549_v14 }
 0xcdd   :  { %v3056_v57 = vadd.f32 %v3036_v58, %v3035_v25 }
 0xcdf   :  { %3057 = vadd.xlane.f32.xlu0 %v3056_v57 }
 0xceb   :  { %v2987_v61 = vpop.f32.mrb[52].mxu0 }
 0xcec   :  { %v2988_v31 = vadd.f32 %v2987_v61, %v11534_v60  ;;  %v2989_v2 = vpop.f32.mrb[53].mxu0 }
 0xced   :  { %v2990_v15 = vadd.f32 %v2989_v2, %v11537_v19 }
 0xcee   :  { %9622 = vtanh.f32 %v2988_v31 }
 0xcef   :  { %9624 = vtanh.f32 %v2990_v15  ;;  %v2993_v18 = vpop.f32.mrb[54].mxu0 }
 0xcf0   :  { %v2994_v38 = vadd.f32 %v2993_v18, %v11534_v60  ;;  %v2995_v62 = vpop.f32.mrb[55].mxu0 }
 0xcf1   :  { %v2996_v21 = vadd.f32 %v2995_v62, %v11537_v19 }
 0xcf2   :  { %9626 = vtanh.f32 %v2994_v38 }
 0xcf3   :  { %9628 = vtanh.f32 %v2996_v21 }
 0xcf8   :  { %v9623_v6 = vpop.eup %9622 }
 0xcf9   :  { %v9625_v3 = vpop.eup %9624  ;;  %v3037_v63 = vmul.f32 %v9623_v6, %v11546_v26 }
 0xcfa   :  { %v3038_v36 = vmul.f32 %v9625_v3, %v11549_v14 }
 0xcfc   :  { %v9627_v50 = vpop.eup %9626  ;;  %v3059_v29 = vadd.f32 %v3038_v36, %v3037_v63 }
 0xcfd   :  { %v9629_v34 = vpop.eup %9628  ;;  %v3039_v41 = vmul.f32 %v9627_v50, %v11546_v26 }
 0xcfe   :  { %3060 = vadd.xlane.f32.xlu1 %v3059_v29  ;;  %v3040_v1 = vmul.f32 %v9629_v34, %v11549_v14 }
 0xd00   :  { %v3062_v60 = vadd.f32 %v3040_v1, %v3039_v41  ;;  %v484_v1 = vld [vmem:[#allocation29 + $0x8] sm:$0xff] }
 0xd02   :  { %3063 = vadd.xlane.f32.xlu0 %v3062_v60  ;;  %v485_v60 = vld [vmem:[#allocation29 + $0x10] sm:$0xff] }
 0xd58   :  { %v3043_v19 = vpop.xlane.xlu1 %3042 }
 0xd5c   :  { %v3046_v7 = vpop.xlane.xlu0 %3045 }
 0xd60   :  { %v3049_v45 = vpop.xlane.xlu1 %3048 }
 0xd64   :  { %v3052_v49 = vpop.xlane.xlu0 %3051 }
 0xd68   :  { %v3055_v52 = vpop.xlane.xlu1 %3054 }
 0xd69   :  { %v3065_v30 = vmax.f32 %v3043_v19, %v3055_v52 }
 0xd6c   :  { %v3058_v40 = vpop.xlane.xlu0 %3057 }
 0xd6d   :  { %v3066_v43 = vmax.f32 %v3046_v7, %v3058_v40 }
 0xd6f   :  { %v3069_v10 = vmax.f32 %v3065_v30, %v3066_v43 }
 0xd8b   :  { %v3061_v51 = vpop.xlane.xlu1 %3060 }
 0xd8c   :  { %v3067_v35 = vmax.f32 %v3049_v45, %v3061_v51 }
 0xd8f   :  { %v3064_v0 = vpop.xlane.xlu0 %3063 }
 0xd90   :  { %v3068_v26 = vmax.f32 %v3052_v49, %v3064_v0 }
 0xd92   :  { %v3070_v48 = vmax.f32 %v3067_v35, %v3068_v26 }
 0xd94   :  { %v3071_v14 = vmax.f32 %v3069_v10, %v3070_v48 }
 0xd96   :  { %v3072_v54 = vrot.slane %v3071_v14, 4 }
 0xd98   :  { %v3073_v4 = vmax.f32 %v3071_v14, %v3072_v54 }
 0xd9a   :  { %v3074_v13 = vrot.slane %v3073_v4, 2 }
 0xd9c   :  { %v3075_v55 = vmax.f32 %v3073_v4, %v3074_v13 }
 0xd9e   :  { %v3076_v46 = vrot.slane %v3075_v55, 1 }
 0xda0   :  { %v3077_v53 = vmax.f32 %v3075_v55, %v3076_v46 }
 0xda2   :  { %v3078_v24 = vsub.f32 %v3043_v19, %v3077_v53  ;;  %v3079_v27 = vsub.f32 %v3046_v7, %v3077_v53  ;;  %v3080_v33 = vsub.f32 %v3049_v45, %v3077_v53  ;;  %v3081_v16 = vsub.f32 %v3052_v49, %v3077_v53  ;;  %v487_v19 = vld [vmem:[#allocation29 + $0x20] sm:$0xff]  ;;  %v488_v7 = vld [vmem:[#allocation29 + $0x28] sm:$0xff]  ;;  %v489_v45 = vld [vmem:[#allocation29 + $0x30] sm:$0xff] }
 0xda3   :  { %v3082_v56 = vsub.f32 %v3055_v52, %v3077_v53  ;;  %v3083_v5 = vsub.f32 %v3058_v40, %v3077_v53  ;;  %v3085_v58 = vsub.f32 %v3064_v0, %v3077_v53  ;;  %v3084_v31 = vsub.f32 %v3061_v51, %v3077_v53  ;;  %v490_v49 = vld [vmem:[#allocation29 + $0x38] sm:$0xff] }
 0xda4   :  { %v3086_v44 = vmul.f32 1.442695, %v3078_v24  ;;  %v3088_v22 = vmul.f32 1.442695, %v3079_v27  ;;  %v3090_v23 = vmul.f32 1.442695, %v3080_v33 }
 0xda5   :  { %v3092_v25 = vmul.f32 1.442695, %v3081_v16  ;;  %v3094_v57 = vmul.f32 1.442695, %v3082_v56  ;;  %v3096_v61 = vmul.f32 1.442695, %v3083_v5 }
 0xda6   :  { %9630 = vpow2.f32 %v3086_v44  ;;  %v3100_v2 = vmul.f32 1.442695, %v3085_v58  ;;  %v3098_v15 = vmul.f32 1.442695, %v3084_v31  ;;  %v10440_v52 = vmov 0  }
 0xda7   :  { %9632 = vpow2.f32 %v3088_v22  ;;  %9348 = vset.pattern.permute.xlu0 %v10440_v52  ;;  %9349 = vset.pattern.permute.xlu1 %v10440_v52  ;;  %v10441_v53 = vmov 0.0|0.0  }
 0xda8   :  { %9634 = vpow2.f32 %v3090_v23  ;;  %8889 = vmatprep.subr.bf16.mxu0 %v10441_v53 }
 0xda9   :  { %9636 = vpow2.f32 %v3092_v25 }
 0xdaa   :  { %9638 = vpow2.f32 %v3094_v57 }
 0xdab   :  { %9640 = vpow2.f32 %v3096_v61 }
 0xdac   :  { %9642 = vpow2.f32 %v3100_v2 }
 0xdad   :  { %9644 = vpow2.f32 %v3098_v15 }
 0xdb0   :  { %v9631_v18 = vpop.eup %9630 }
 0xdb1   :  { %v9633_v38 = vpop.eup %9632 }
 0xdb2   :  { %v9635_v62 = vpop.eup %9634  ;;  %v8873_v21 = vpack.c.bf16 %v9633_v38, %v9631_v18 }
 0xdb3   :  { %v9637_v6 = vpop.eup %9636 }
 0xdb4   :  { %v11578_v3 = vpop.eup %9638  ;;  %8874 = vmatprep.subr.bf16.mxu1 %v8873_v21  ;;  %v8877_v63 = vpack.c.bf16 %v9637_v6, %v9635_v62 }
 0xdb5   :  { %v9641_v36 = vpop.eup %9640  ;;  %8876 = vmatpush3.bf16.msra.mxu1 %v8873_v21 }
 0xdb6   :  { %8878 = vmatprep.subr.bf16.mxu1 %v8877_v63  ;;  %v11580_v50 = vpop.eup %9642  ;;  %v8881_v29 = vpack.c.bf16 %v9641_v36, %v11578_v3 }
 0xdb7   :  { %v9645_v34 = vpop.eup %9644 }
 0xdb8   :  { %v8885_v41 = vpack.c.bf16 %v11580_v50, %v9645_v34 }
 0xdb9   :  { %8880 = vmatpush3.bf16.msra.mxu1 %v8877_v63 }
 0xdba   :  { %8882 = vmatprep.subr.bf16.mxu1 %v8881_v29 }
 0xdbd   :  { %8884 = vmatpush3.bf16.msra.mxu1 %v8881_v29 }
 0xdbe   :  { %8886 = vmatprep.subr.bf16.mxu1 %v8885_v41 }
 0xdc1   :  { %8888 = vmatpush3.bf16.msra.mxu1 %v8885_v41  ;;  %v437_v41 = vld [vmem:[#allocation11 + $0x10] sm:$0xff] }
 0xdc4   :  { %8311 = vmatmul.mubr.msk.f32.vlgmr.msra.gmra.mrb[40].mxu1 %vm832_vm3, %v484_v1  ;;  %v491_v1 = vld [vmem:[%s12348_s8] sm:$0xff] }
 0xdc5   :  { %8313 = vmatprep.mubr.msk.f32.mxu1 %vm832_vm3, %v485_v60 }
 0xdc8   :  { %8314 = vmatmul.mubr.msk.f32.gmra.mrb[42].mxu1 %vm832_vm3, %v486_v11  ;;  %v3368_v11 = vld [vmem:[%s12349_s23] sm:$0xff] }
 0xdc9   :  { %8316 = vmatprep.mubr.msk.f32.mxu1 %vm832_vm3, %v487_v19  ;;  %v3371_v19 = vld [vmem:[%s12349_s23 + $0x18] sm:$0xff] }
 0xdcc   :  { %8317 = vmatmul.mubr.msk.f32.gmra.mrb[44].mxu1 %vm832_vm3, %v488_v7  ;;  %v3372_v7 = vld [vmem:[%s12349_s23 + $0x20] sm:$0xff] }
 0xdcd   :  { %8319 = vmatprep.mubr.msk.f32.mxu1 %vm832_vm3, %v489_v45  ;;  %v3373_v45 = vld [vmem:[%s12349_s23 + $0x28] sm:$0xff] }
 0xdd0   :  { %8320 = vmatmul.mubr.msk.f32.gmra.mrb[46].mxu1 %vm832_vm3, %v490_v49 }
 0xe97   :  { %v8312_v40 = vpop.f32.mrb[40].mxu1 }
 0xe98   :  { %9646 = vrcp.f32 %v8312_v40  ;;  %v3192_v51 = vpop.f32.mrb[41].mxu1  ;;  %v7460_v40 = vld [vmem:[#allocation13] ss:$0 sm:$0xff] }
 0xe99   :  { %9648 = vrcp.f32 %v3192_v51 }
 0xe9b   :  { %v8315_v43 = vpop.f32.mrb[42].mxu1 }
 0xe9c   :  { %9650 = vrcp.f32 %v8315_v43  ;;  %v3202_v0 = vpop.f32.mrb[43].mxu1 }
 0xe9d   :  { %9652 = vrcp.f32 %v3202_v0 }
 0xe9f   :  { %v8318_v30 = vpop.f32.mrb[44].mxu1 }
 0xea0   :  { %v3212_v35 = vpop.f32.mrb[45].mxu1  ;;  %9654 = vrcp.f32 %v8318_v30 }
 0xea1   :  { %9656 = vrcp.f32 %v3212_v35 }
 0xea2   :  { %v9647_v26 = vpop.eup %9646 }
 0xea3   :  { %v9649_v10 = vpop.eup %9648  ;;  %v8321_v48 = vpop.f32.mrb[46].mxu1  ;;  %v3240_v14 = vmul.f32 %v9647_v26, %v9633_v38 }
 0xea4   :  { %v3222_v54 = vpop.f32.mrb[47].mxu1  ;;  %v3239_v4 = vmul.f32 %v9649_v10, %v9631_v18 }
 0xea5   :  { %3254 = vperm.xlu0 %9348, %v3240_v14   ;;  %9658 = vrcp.f32 %v3222_v54 }
 0xea6   :  { %v9651_v13 = vpop.eup %9650  ;;  %3249 = vperm.xlu1 %9349, %v3239_v4   ;;  %9660 = vrcp.f32 %v8321_v48 }
 0xea7   :  { %v3242_v55 = vmul.f32 %v9651_v13, %v9637_v6  ;;  %v9653_v46 = vpop.eup %9652 }
 0xea8   :  { %v3241_v24 = vmul.f32 %v9653_v46, %v9635_v62 }
 0xeaa   :  { %3264 = vperm.xlu1 %9349, %v3242_v55   ;;  %v9655_v27 = vpop.eup %9654 }
 0xeab   :  { %v3244_v33 = vmul.f32 %v9655_v27, %v9641_v36  ;;  %v9657_v16 = vpop.eup %9656  ;;  %v436_v36 = vld [vmem:[#allocation11 + $0x8] sm:$0xff] }
 0xeac   :  { %v3243_v56 = vmul.f32 %v9657_v16, %v11578_v3 }
 0xeae   :  { %3259 = vperm.xlu1 %9349, %v3241_v24  }
 0xeaf   :  { %v9659_v44 = vpop.eup %9658 }
 0xeb0   :  { %v3245_v22 = vmul.f32 %v9659_v44, %v9645_v34  ;;  %v9661_v5 = vpop.eup %9660 }
 0xeb1   :  { %v3246_v23 = vmul.f32 %v9661_v5, %v11580_v50 }
 0xeb2   :  { %3274 = vperm.xlu1 %9349, %v3244_v33  }
 0xeb6   :  { %3269 = vperm.xlu1 %9349, %v3243_v56  }
 0xeba   :  { %3279 = vperm.xlu1 %9349, %v3245_v22  }
 0xebe   :  { %3284 = vperm.xlu1 %9349, %v3246_v23  }
 0xf24   :  { %v3255_v25 = vpop.permute.xlu0 %3254 }
 0xf25   :  { %v3288_v58 = vmul.f32 %v3255_v25, %v11495_v59  ;;  %v3250_v57 = vpop.permute.xlu1 %3249 }
 0xf26   :  { %v3287_v61 = vmul.f32 %v3250_v57, %v11490_v42 }
 0xf28   :  { %v8890_v31 = vpack.c.bf16 %v3288_v58, %v3287_v61 }
 0xf29   :  { %v3265_v2 = vpop.permute.xlu1 %3264 }
 0xf2a   :  { %8891 = vmatpush3.bf16.msra.mxu0 %v8890_v31  ;;  %v3290_v18 = vmul.f32 %v3265_v2, %v11505_v8  ;;  %v435_v8 = vld [vmem:[#allocation11] sm:$0xff] }
 0xf2b   :  { %8892 = vmatprep.subr.bf16.mxu0 %v10441_v53  ;;  %v8901_v34 = vpack.c.bf16 %v436_v36, %v435_v8 }
 0xf2d   :  { %v3260_v15 = vpop.permute.xlu1 %3259 }
 0xf2e   :  { %v3289_v38 = vmul.f32 %v3260_v15, %v11500_v20 }
 0xf30   :  { %v8893_v62 = vpack.c.bf16 %v3290_v18, %v3289_v38 }
 0xf31   :  { %v3275_v21 = vpop.permute.xlu1 %3274 }
 0xf32   :  { %8894 = vmatpush3.bf16.msra.mxu0 %v8893_v62  ;;  %v3292_v59 = vmul.f32 %v3275_v21, %v11515_v9 }
 0xf33   :  { %8895 = vmatprep.subr.bf16.mxu0 %v10441_v53 }
 0xf35   :  { %v3270_v6 = vpop.permute.xlu1 %3269 }
 0xf36   :  { %v3291_v42 = vmul.f32 %v3270_v6, %v11510_v28  ;;  %v438_v28 = vld [vmem:[#allocation11 + $0x18] sm:$0xff] }
 0xf37   :  { %v8905_v60 = vpack.c.bf16 %v438_v28, %v437_v41 }
 0xf38   :  { %v8896_v3 = vpack.c.bf16 %v3292_v59, %v3291_v42 }
 0xf39   :  { %v3280_v63 = vpop.permute.xlu1 %3279 }
 0xf3a   :  { %8897 = vmatpush3.bf16.msra.mxu0 %v8896_v3  ;;  %v3293_v50 = vmul.f32 %v3280_v63, %v11520_v17  ;;  %v3369_v17 = vld [vmem:[%s12349_s23 + $0x8] sm:$0xff] }
 0xf3b   :  { %8898 = vmatprep.subr.bf16.mxu0 %v10441_v53 }
 0xf3d   :  { %v3285_v20 = vpop.permute.xlu1 %3284 }
 0xf3e   :  { %v3294_v29 = vmul.f32 %v3285_v20, %v11525_v32  ;;  %v3370_v32 = vld [vmem:[%s12349_s23 + $0x10] sm:$0xff] }
 0xf40   :  { %v8899_v9 = vpack.c.bf16 %v3294_v29, %v3293_v50 }
 0xf42   :  { %8900 = vmatpush3.bf16.msra.mxu0 %v8899_v9 }
 0xf43   :  { %8902 = vmatprep.subr.bf16.mxu0 %v8901_v34 }
 0xf45   :  { %8339 = vmatmul.mubr.msk.f32.vlgmr.msra.gmra.mrb[56].mxu0 %vm832_vm3, %v491_v1 }
 0xf46   :  { %8904 = vmatpush3.bf16.msra.mxu0 %v8901_v34  ;;  %8349 = vmatprep.mubr.msk.f32.mxu0 %vm524_vm0, %v3368_v11 }
 0xf47   :  { %8906 = vmatprep.subr.bf16.mxu0 %v8905_v60 }
 0xf4a   :  { %8908 = vmatpush3.bf16.msra.mxu0 %v8905_v60 }
 0xf4d   :  { %8350 = vmatmul.mubr.msk.f32.vlgmr.msra.gmra.mrb[58].mxu0 %vm524_vm0, %v3369_v17 }
 0xf4e   :  { %8352 = vmatprep.mubr.msk.f32.mxu0 %vm524_vm0, %v3370_v32 }
 0xf51   :  { %8353 = vmatmul.mubr.msk.f32.gmra.mrb[60].mxu0 %vm524_vm0, %v3371_v19 }
 0xf52   :  { %8355 = vmatprep.mubr.msk.f32.mxu0 %vm524_vm0, %v3372_v7 }
 0xf55   :  { %8356 = vmatmul.mubr.msk.f32.gmra.mrb[62].mxu0 %vm524_vm0, %v3373_v45 }
0x1018   :  { %v11621_v49 = vpop.f32.mrb[56].mxu0 }
0x1019   :  { %v8340_v52 = vpop.f32.mrb[57].mxu0 }
0x1020   :  { %v8351_v51 = vpop.f32.mrb[58].mxu0 }
0x1021   :  { %v3470_v43 = vadd.f32 %v8351_v51, %v7460_v40  ;;  %v3464_v0 = vpop.f32.mrb[59].mxu0 }
0x1022   :  { %v3465_v30 = vadd.f32 %v7460_v40, %v3464_v0 }
0x1023   :  { %v11645_v33 = vmul.f32 0.35355338, %v3470_v43 }
0x1024   :  { %v8354_v35 = vpop.f32.mrb[60].mxu0  ;;  %v11623_v26 = vpack.i.bf16 %v3470_v43, %v3465_v30  ;;  %v11625_v10 = vmul.f32 0.35355338, %v3465_v30 }
0x1025   :  { %v3480_v48 = vadd.f32 %v8354_v35, %v7460_v40  ;;  %v3474_v14 = vpop.f32.mrb[61].mxu0 }
0x1026   :  { %v3475_v54 = vadd.f32 %v7460_v40, %v3474_v14  ;;  %9351 = vrot.lane.b32.xlu1 %v11623_v26, %s10428_s21  ;;  %8370 = vmatprep.mubr.msk.f32.mxu1 %vm686_vm1, %v11625_v10 }
0x1027   :  { %v11651_v16 = vmul.f32 0.35355338, %v3480_v48 }
0x1028   :  { %v8357_v4 = vpop.f32.mrb[62].mxu0  ;;  %v11631_v13 = vpack.i.bf16 %v3480_v48, %v3475_v54  ;;  %v11653_v56 = vmul.f32 0.35355338, %v3475_v54 }
0x1029   :  { %v3490_v55 = vadd.f32 %v8357_v4, %v7460_v40  ;;  %v3484_v46 = vpop.f32.mrb[63].mxu0 }
0x102a   :  { %v3485_v24 = vadd.f32 %v7460_v40, %v3484_v46  ;;  %9356 = vrot.lane.b32.xlu1 %v11631_v13, %s10428_s21 }
0x102b   :  { %v11659_v44 = vmul.f32 0.35355338, %v3490_v55 }
0x102c   :  { %v11635_v27 = vpack.i.bf16 %v3490_v55, %v3485_v24  ;;  %v11661_v22 = vmul.f32 0.35355338, %v3485_v24 }
0x102e   :  { %9361 = vrot.lane.b32.xlu0 %v11635_v27, %s10428_s21  ;;  %9366 = vrot.lane.b32.xlu1 %v11623_v26, %s10430_s13 }
0x1032   :  { %9371 = vrot.lane.b32.xlu0 %v11631_v13, %s10430_s13  ;;  %9376 = vrot.lane.b32.xlu1 %v11635_v27, %s10430_s13 }
0x1036   :  { %3842 = vrot.lane.b32.xlu1 %v11645_v33, %s10431_s16  ;;  %3840 = vrot.lane.b32.xlu0 %v11625_v10, %s10431_s16 }
0x103a   :  { %3846 = vrot.lane.b32.xlu1 %v11651_v16, %s10431_s16  ;;  %3844 = vrot.lane.b32.xlu0 %v11653_v56, %s10431_s16 }
0x103e   :  { %3850 = vrot.lane.b32.xlu1 %v11659_v44, %s10431_s16  ;;  %3848 = vrot.lane.b32.xlu0 %v11661_v22, %s10431_s16 }
0x1042   :  { %9386 = vrot.lane.b32.xlu1 %v11631_v13, %s10432_s27  ;;  %9381 = vrot.lane.b32.xlu0 %v11623_v26, %s10432_s27 }
0x1046   :  { %4406 = vrot.lane.b32.xlu1 %v11625_v10, %s10433_s3  ;;  %9391 = vrot.lane.b32.xlu0 %v11635_v27, %s10432_s27 }
0x104a   :  { %4410 = vrot.lane.b32.xlu1 %v11653_v56, %s10433_s3  ;;  %4408 = vrot.lane.b32.xlu0 %v11645_v33, %s10433_s3 }
0x104e   :  { %4414 = vrot.lane.b32.xlu1 %v11661_v22, %s10433_s3  ;;  %4412 = vrot.lane.b32.xlu0 %v11651_v16, %s10433_s3 }
0x1052   :  { %4416 = vrot.lane.b32.xlu0 %v11659_v44, %s10433_s3 }
0x1056   :  { %9396 = vrot.lane.b32.xlu0 %v11623_v26, %s10429_s15 }
0x1098   :  { %v9352_v5 = vpop.permute.xlu1 %9351 }
0x1099   :  { %v9354_v23 = vunpack.i.h.bf16 %v9352_v5  ;;  %v9353_v25 = vunpack.i.l.bf16 %v9352_v5 }
0x109b   :  { %v8909_v58 = vpack.c.bf16 %v9354_v23, %v9353_v25 }
0x109c   :  { %v9357_v57 = vpop.permute.xlu1 %9356 }
0x109d   :  { %v9359_v61 = vunpack.i.h.bf16 %v9357_v57  ;;  %v9358_v31 = vunpack.i.l.bf16 %v9357_v57  ;;  %8911 = vmatprep.subr.msk.bf16.mxu1 %vm10806_vm2, %v8909_v58  ;;  %v11747_v57 = vld [vmem:[#allocation31] sm:$0xff] }
0x109e   :  { %8914 = vmatpush3.bf16.xpose.msk.msra.mxu1 %vm10806_vm2, %v8909_v58  ;;  %v11745_v58 = vld [vmem:[#allocation31 + $0x8] sm:$0xff] }
0x109f   :  { %v8915_v2 = vpack.c.bf16 %v9359_v61, %v9358_v31 }
0x10a0   :  { %v9362_v15 = vpop.permute.xlu0 %9361  ;;  %v9367_v6 = vpop.permute.xlu1 %9366 }
0x10a1   :  { %v9364_v18 = vunpack.i.h.bf16 %v9362_v15  ;;  %v9363_v38 = vunpack.i.l.bf16 %v9362_v15  ;;  %8917 = vmatprep.subr.msk.bf16.mxu1 %vm10806_vm2, %v8915_v2  ;;  %v9369_v42 = vunpack.i.h.bf16 %v9367_v6  ;;  %v9368_v3 = vunpack.i.l.bf16 %v9367_v6 }
0x10a3   :  { %v8921_v62 = vpack.c.bf16 %v9364_v18, %v9363_v38  ;;  %v8939_v8 = vpack.c.bf16 %v9369_v42, %v9368_v3  ;;  %v11753_v18 = vld [vmem:[#allocation31 + $0x18] sm:$0xff] }
0x10a4   :  { %v9372_v21 = vpop.permute.xlu0 %9371  ;;  %v9377_v36 = vpop.permute.xlu1 %9376 }
0x10a5   :  { %v9374_v50 = vunpack.i.h.bf16 %v9372_v21  ;;  %v9373_v29 = vunpack.i.l.bf16 %v9372_v21  ;;  %v9379_v1 = vunpack.i.h.bf16 %v9377_v36  ;;  %v9378_v60 = vunpack.i.l.bf16 %v9377_v36 }
0x10a6   :  { %8920 = vmatpush3.bf16.xpose.msk.msra.mxu1 %vm10806_vm2, %v8915_v2 }
0x10a7   :  { %8923 = vmatprep.subr.msk.bf16.mxu1 %vm10806_vm2, %v8921_v62  ;;  %v8945_v9 = vpack.c.bf16 %v9374_v50, %v9373_v29  ;;  %v8951_v32 = vpack.c.bf16 %v9379_v1, %v9378_v60 }
0x10a8   :  { %v3841_v59 = vpop.permute.xlu0 %3840  ;;  %v3843_v41 = vpop.permute.xlu1 %3842 }
0x10ac   :  { %v3845_v63 = vpop.permute.xlu0 %3844  ;;  %v3847_v11 = vpop.permute.xlu1 %3846 }
0x10ae   :  { %8926 = vmatpush3.bf16.xpose.msk.msra.mxu1 %vm10806_vm2, %v8921_v62  ;;  %v11757_v62 = vld [vmem:[#allocation31 + $0x10] sm:$0xff] }
0x10af   :  { %8941 = vmatprep.subr.msk.bf16.mxu1 %vm10806_vm2, %v8939_v8 }
0x10b0   :  { %v3849_v20 = vpop.permute.xlu0 %3848  ;;  %v3851_v7 = vpop.permute.xlu1 %3850 }
0x10b4   :  { %v9382_v34 = vpop.permute.xlu0 %9381  ;;  %v9387_v43 = vpop.permute.xlu1 %9386 }
0x10b5   :  { %8371 = vmatmul.mubr.msk.f32.vlgmr.msra.gmra.mrb[48].mxu1 %vm686_vm1, %v11645_v33  ;;  %v9384_v45 = vunpack.i.h.bf16 %v9382_v34  ;;  %v9383_v52 = vunpack.i.l.bf16 %v9382_v34  ;;  %v9389_v48 = vunpack.i.h.bf16 %v9387_v43  ;;  %v9388_v14 = vunpack.i.l.bf16 %v9387_v43 }
0x10b6   :  { %8373 = vmatprep.mubr.msk.f32.mxu1 %vm686_vm1, %v11653_v56  ;;  %8944 = vmatpush3.bf16.xpose.msk.msra.mxu1 %vm10806_vm2, %v8939_v8  ;;  %v11766_v8 = vld [vmem:[#allocation31 + $0x20] sm:$0xff] }
0x10b7   :  { %8947 = vmatprep.subr.msk.bf16.mxu1 %vm10806_vm2, %v8945_v9  ;;  %v8969_v51 = vpack.c.bf16 %v9384_v45, %v9383_v52  ;;  %v8975_v4 = vpack.c.bf16 %v9389_v48, %v9388_v14 }
0x10b8   :  { %v9392_v28 = vpop.permute.xlu0 %9391  ;;  %v4407_v24 = vpop.permute.xlu1 %4406 }
0x10b9   :  { %8374 = vmatmul.mubr.msk.f32.gmra.mrb[50].mxu1 %vm686_vm1, %v11651_v16  ;;  %v9394_v55 = vunpack.i.h.bf16 %v9392_v28  ;;  %v9393_v46 = vunpack.i.l.bf16 %v9392_v28 }
0x10ba   :  { %8376 = vmatprep.mubr.msk.f32.mxu1 %vm686_vm1, %v11661_v22 }
0x10bb   :  { %v8981_v5 = vpack.c.bf16 %v9394_v55, %v9393_v46 }
0x10bc   :  { %v4409_v17 = vpop.permute.xlu0 %4408  ;;  %v4411_v23 = vpop.permute.xlu1 %4410 }
0x10bd   :  { %8377 = vmatmul.mubr.msk.f32.gmra.mrb[52].mxu1 %vm686_vm1, %v11659_v44 }
0x10be   :  { %8950 = vmatpush3.bf16.xpose.msk.msra.mxu1 %vm10806_vm2, %v8945_v9  ;;  %8412 = vmatprep.mubr.msk.f32.mxu1 %vm686_vm1, %v3841_v59 }
0x10bf   :  { %8953 = vmatprep.subr.msk.bf16.mxu1 %vm10806_vm2, %v8951_v32 }
0x10c0   :  { %v4413_v19 = vpop.permute.xlu0 %4412  ;;  %v4415_v25 = vpop.permute.xlu1 %4414 }
0x10c4   :  { %v4417_v40 = vpop.permute.xlu0 %4416 }
0x10c6   :  { %8956 = vmatpush3.bf16.xpose.msk.msra.mxu1 %vm10806_vm2, %v8951_v32 }
0x10c7   :  { %8971 = vmatprep.subr.msk.bf16.mxu1 %vm10806_vm2, %v8969_v51 }
0x10c8   :  { %v9397_v0 = vpop.permute.xlu0 %9396 }
0x10c9   :  { %v9399_v30 = vunpack.i.h.bf16 %v9397_v0  ;;  %v9398_v35 = vunpack.i.l.bf16 %v9397_v0 }
0x10cb   :  { %v8927_v54 = vpack.c.bf16 %v9399_v30, %v9398_v35 }
0x10cd   :  { %8928 = vmatprep.subr.bf16.mxu0 %v8927_v54  ;;  %8413 = vmatmul.mubr.msk.f32.vlgmr.msra.gmra.mrb[54].mxu1 %vm686_vm1, %v3843_v41 }
0x10ce   :  { %8930 = vmatpush3.bf16.msra.mxu0 %v8927_v54  ;;  %8415 = vmatprep.mubr.msk.f32.mxu1 %vm686_vm1, %v3845_v63  ;;  %v11764_v63 = vld [vmem:[#allocation31 + $0x28] sm:$0xff] }
0x10cf   :  { %8974 = vmatpush3.bf16.xpose.msk.msra.mxu1 %vm10806_vm2, %v8969_v51 }
0x10d0   :  { %8977 = vmatprep.subr.msk.bf16.mxu1 %vm10806_vm2, %v8975_v4 }
0x10d1   :  { %8416 = vmatmul.mubr.msk.f32.gmra.mrb[56].mxu1 %vm686_vm1, %v3847_v11 }
0x10d2   :  { %8418 = vmatprep.mubr.msk.f32.mxu1 %vm686_vm1, %v3849_v20 }
0x10d5   :  { %8419 = vmatmul.mubr.msk.f32.gmra.mrb[58].mxu1 %vm686_vm1, %v3851_v7 }
0x10d6   :  { %8476 = vmatprep.mubr.msk.f32.mxu1 %vm686_vm1, %v4407_v24 }
0x10d7   :  { %8980 = vmatpush3.bf16.xpose.msk.msra.mxu1 %vm10806_vm2, %v8975_v4 }
0x10d8   :  { %8983 = vmatprep.subr.msk.bf16.mxu1 %vm10806_vm2, %v8981_v5 }
0x10df   :  { %8986 = vmatpush3.bf16.xpose.msk.msra.mxu1 %vm10806_vm2, %v8981_v5 }
0x10e6   :  { %8477 = vmatmul.mubr.msk.f32.vlgmr.msra.gmra.mrb[60].mxu1 %vm686_vm1, %v4409_v17 }
0x10e7   :  { %8479 = vmatprep.mubr.msk.f32.mxu1 %vm686_vm1, %v4411_v23 }
0x10ea   :  { %8480 = vmatmul.mubr.msk.f32.gmra.mrb[62].mxu1 %vm686_vm1, %v4413_v19 }
0x10eb   :  { %8482 = vmatprep.mubr.msk.f32.mxu1 %vm686_vm1, %v4415_v25 }
0x10ee   :  { %8483 = vmatmul.mubr.msk.f32.gmra.mrb[64].mxu1 %vm686_vm1, %v4417_v40 }
0x1188   :  { %v8372_v61 = vpop.f32.mrb[48].mxu1 }
0x1189   :  { %v11750_v31 = vadd.f32 %v8372_v61, %v11745_v58  ;;  %v3613_v2 = vpop.f32.mrb[49].mxu1 }
0x118a   :  { %v3614_v15 = vadd.f32 %v3613_v2, %v11747_v57 }
0x118b   :  { %v3646_v38 = vsel %vm3642_vm5, %v11750_v31, -inf }
0x118c   :  { %3647 = vmax.xlane.f32.xlu0 %v3646_v38  ;;  %v8375_v21 = vpop.f32.mrb[50].mxu1  ;;  %v3643_v6 = vsel %vm3642_vm5, %v3614_v15, -inf }
0x118d   :  { %v11761_v59 = vadd.f32 %v8375_v21, %v11753_v18  ;;  %v3623_v42 = vpop.f32.mrb[51].mxu1  ;;  %3644 = vmax.xlane.f32.xlu1 %v3643_v6 }
0x118e   :  { %v3624_v3 = vadd.f32 %v3623_v42, %v11757_v62 }
0x118f   :  { %v3652_v36 = vsel %vm3642_vm5, %v11761_v59, -inf }
0x1190   :  { %v8378_v20 = vpop.f32.mrb[52].mxu1  ;;  %v3649_v50 = vsel %vm3642_vm5, %v3624_v3, -inf }
0x1191   :  { %v3639_v29 = vadd.f32 %v8378_v20, %v11764_v63  ;;  %v3633_v34 = vpop.f32.mrb[53].mxu1  ;;  %3650 = vmax.xlane.f32.xlu0 %v3649_v50  ;;  %3653 = vmax.xlane.f32.xlu1 %v3652_v36 }
0x1192   :  { %v3634_v9 = vadd.f32 %v3633_v34, %v11766_v8 }
0x1193   :  { %v3658_v41 = vsel %vm3642_vm5, %v3639_v29, -inf }
0x1194   :  { %v3655_v28 = vsel %vm3642_vm5, %v3634_v9, -inf }
0x1195   :  { %3656 = vmax.xlane.f32.xlu0 %v3655_v28  ;;  %3659 = vmax.xlane.f32.xlu1 %v3658_v41 }
0x11a0   :  { %v8414_v1 = vpop.f32.mrb[54].mxu1 }
0x11a1   :  { %v11776_v60 = vadd.f32 %v8414_v1, %v11745_v58  ;;  %v3954_v11 = vpop.f32.mrb[55].mxu1 }
0x11a2   :  { %v11779_v17 = vadd.f32 %v3954_v11, %v11747_v57 }
0x11a3   :  { %v3986_v32 = vsel %vm3642_vm5, %v11776_v60, -inf }
0x11a4   :  { %v8417_v19 = vpop.f32.mrb[56].mxu1  ;;  %3987 = vmax.xlane.f32.xlu1 %v3986_v32  ;;  %v3983_v7 = vsel %vm3642_vm5, %v11779_v17, -inf }
0x11a5   :  { %v11786_v45 = vadd.f32 %v8417_v19, %v11753_v18  ;;  %v3964_v52 = vpop.f32.mrb[57].mxu1  ;;  %3984 = vmax.xlane.f32.xlu0 %v3983_v7 }
0x11a6   :  { %v11789_v40 = vadd.f32 %v3964_v52, %v11757_v62 }
0x11a7   :  { %v3992_v51 = vsel %vm3642_vm5, %v11786_v45, -inf }
0x11a8   :  { %v8420_v43 = vpop.f32.mrb[58].mxu1  ;;  %3993 = vmax.xlane.f32.xlu1 %v3992_v51  ;;  %v3989_v0 = vsel %vm3642_vm5, %v11789_v40, -inf }
0x11a9   :  { %v11796_v30 = vadd.f32 %v8420_v43, %v11764_v63  ;;  %v3974_v35 = vpop.f32.mrb[59].mxu1  ;;  %3990 = vmax.xlane.f32.xlu0 %v3989_v0 }
0x11aa   :  { %v11799_v48 = vadd.f32 %v3974_v35, %v11766_v8 }
0x11ab   :  { %v3998_v14 = vsel %vm3642_vm5, %v11796_v30, -inf }
0x11ac   :  { %3999 = vmax.xlane.f32.xlu1 %v3998_v14  ;;  %v3995_v54 = vsel %vm3642_vm5, %v11799_v48, -inf }
0x11ad   :  { %3996 = vmax.xlane.f32.xlu0 %v3995_v54 }
0x11b9   :  { %v11805_v4 = vpop.f32.mrb[60].mxu1 }
0x11ba   :  { %v11807_v55 = vpop.f32.mrb[61].mxu1 }
0x11bd   :  { %v11809_v46 = vpop.f32.mrb[62].mxu1  ;;  %9401 = vrot.lane.b32.xlu1 %v11631_v13, %s10429_s15 }
0x11be   :  { %v11813_v24 = vpop.f32.mrb[63].mxu1 }
0x11c1   :  { %v11815_v5 = vpop.f32.mrb[64].mxu1 }
0x11c2   :  { %v11817_v23 = vpop.f32.mrb[65].mxu1 }
0x11c3   :  { %9406 = vrot.lane.b32.xlu0 %v11635_v27, %s10429_s15 }
0x1219   :  { %v3648_v25 = vpop.xlane.xlu0 %3647 }
0x121a   :  { %v3662_v61 = vsub.f32 %v11750_v31, %v3648_v25  ;;  %v3645_v2 = vpop.xlane.xlu1 %3644 }
0x121b   :  { %v3661_v38 = vsub.f32 %v3614_v15, %v3645_v2 }
0x121c   :  { %v3669_v21 = vmul.f32 1.442695, %v3662_v61 }
0x121d   :  { %v3667_v6 = vmul.f32 1.442695, %v3661_v38 }
0x121e   :  { %9662 = vpow2.f32 %v3669_v21  ;;  %v3651_v42 = vpop.xlane.xlu0 %3650  ;;  %v3654_v36 = vpop.xlane.xlu1 %3653 }
0x121f   :  { %9664 = vpow2.f32 %v3667_v6  ;;  %v3663_v20 = vsub.f32 %v3624_v3, %v3651_v42  ;;  %v3664_v50 = vsub.f32 %v11761_v59, %v3654_v36 }
0x1221   :  { %v3671_v34 = vmul.f32 1.442695, %v3663_v20  ;;  %v3673_v41 = vmul.f32 1.442695, %v3664_v50 }
0x1222   :  { %v3657_v28 = vpop.xlane.xlu0 %3656  ;;  %v3660_v1 = vpop.xlane.xlu1 %3659 }
0x1223   :  { %9666 = vpow2.f32 %v3671_v34  ;;  %v3665_v11 = vsub.f32 %v3634_v9, %v3657_v28  ;;  %v3666_v32 = vsub.f32 %v3639_v29, %v3660_v1 }
0x1224   :  { %9668 = vpow2.f32 %v3673_v41 }
0x1225   :  { %v3675_v31 = vmul.f32 1.442695, %v3665_v11  ;;  %v3677_v19 = vmul.f32 1.442695, %v3666_v32 }
0x1227   :  { %9670 = vpow2.f32 %v3675_v31 }
0x1228   :  { %v11823_v15 = vpop.eup %9662  ;;  %9672 = vpow2.f32 %v3677_v19 }
0x1229   :  { %v11825_v7 = vpop.eup %9664  ;;  %v3682_v3 = vsel %vm3642_vm5, %v11823_v15, 0.0 }
0x122a   :  { %3683 = vadd.xlane.f32.xlu1 %v3682_v3  ;;  %v3679_v59 = vsel %vm3642_vm5, %v11825_v7, 0.0 }
0x122b   :  { %3680 = vadd.xlane.f32.xlu0 %v3679_v59 }
0x122d   :  { %v11831_v52 = vpop.eup %9666 }
0x122e   :  { %v11833_v29 = vpop.eup %9668  ;;  %v3685_v9 = vsel %vm3642_vm5, %v11831_v52, 0.0 }
0x122f   :  { %3686 = vadd.xlane.f32.xlu0 %v3685_v9  ;;  %v3688_v51 = vsel %vm3642_vm5, %v11833_v29, 0.0 }
0x1230   :  { %3689 = vadd.xlane.f32.xlu1 %v3688_v51 }
0x1231   :  { %v11839_v43 = vpop.eup %9670  ;;  %v3988_v0 = vpop.xlane.xlu1 %3987 }
0x1232   :  { %v11841_v35 = vpop.eup %9672  ;;  %v4002_v14 = vsub.f32 %v11776_v60, %v3988_v0  ;;  %v3985_v54 = vpop.xlane.xlu0 %3984  ;;  %v3691_v25 = vsel %vm3642_vm5, %v11839_v43, 0.0 }
0x1233   :  { %v4001_v61 = vsub.f32 %v11779_v17, %v3985_v54  ;;  %3692 = vadd.xlane.f32.xlu0 %v3691_v25  ;;  %v3694_v2 = vsel %vm3642_vm5, %v11841_v35, 0.0 }
0x1234   :  { %v4009_v38 = vmul.f32 1.442695, %v4002_v14  ;;  %3695 = vadd.xlane.f32.xlu1 %v3694_v2 }
0x1235   :  { %v4007_v21 = vmul.f32 1.442695, %v4001_v61  ;;  %v3994_v6 = vpop.xlane.xlu1 %3993 }
0x1236   :  { %9674 = vpow2.f32 %v4009_v38  ;;  %v4004_v42 = vsub.f32 %v11786_v45, %v3994_v6  ;;  %v3991_v36 = vpop.xlane.xlu0 %3990 }
0x1237   :  { %9676 = vpow2.f32 %v4007_v21  ;;  %v4003_v60 = vsub.f32 %v11789_v40, %v3991_v36 }
0x1238   :  { %v4013_v20 = vmul.f32 1.442695, %v4004_v42  ;;  %v11895_v42 = vadd.f32 %v11805_v4, %v11745_v58 }
0x1239   :  { %v4011_v50 = vmul.f32 1.442695, %v4003_v60  ;;  %v4000_v34 = vpop.xlane.xlu1 %3999 }
0x123a   :  { %9678 = vpow2.f32 %v4013_v20  ;;  %v4006_v17 = vsub.f32 %v11796_v30, %v4000_v34  ;;  %v3997_v41 = vpop.xlane.xlu0 %3996  ;;  %v11927_v20 = vadd.f32 %v11809_v46, %v11753_v18 }
0x123b   :  { %9680 = vpow2.f32 %v4011_v50  ;;  %v4005_v38 = vsub.f32 %v11799_v48, %v3997_v41  ;;  %v11933_v41 = vadd.f32 %v11815_v5, %v11764_v63 }
0x123c   :  { %v4017_v28 = vmul.f32 1.442695, %v4006_v17 }
0x123d   :  { %v9402_v1 = vpop.permute.xlu1 %9401  ;;  %v4015_v21 = vmul.f32 1.442695, %v4005_v38 }
0x123e   :  { %v9404_v11 = vunpack.i.h.bf16 %v9402_v1  ;;  %v9403_v32 = vunpack.i.l.bf16 %v9402_v1  ;;  %v9407_v31 = vpop.permute.xlu0 %9406  ;;  %9682 = vpow2.f32 %v4017_v28  ;;  %v4558_v28 = vsel %vm3642_vm5, %v11927_v20, -inf }
0x123f   :  { %v9409_v19 = vunpack.i.h.bf16 %v9407_v31  ;;  %v9408_v3 = vunpack.i.l.bf16 %v9407_v31  ;;  %9684 = vpow2.f32 %v4015_v21  ;;  %v4564_v31 = vsel %vm3642_vm5, %v11933_v41, -inf }
0x1240   :  { %v11852_v45 = vpop.eup %9674  ;;  %v8931_v59 = vpack.c.bf16 %v9404_v11, %v9403_v32 }
0x1241   :  { %v11854_v40 = vpop.eup %9676  ;;  %v8935_v9 = vpack.c.bf16 %v9409_v19, %v9408_v3  ;;  %v4022_v51 = vsel %vm3642_vm5, %v11852_v45, 0.0 }
0x1242   :  { %4023 = vadd.xlane.f32.xlu1 %v4022_v51  ;;  %8932 = vmatprep.subr.bf16.mxu0 %v8931_v59  ;;  %v4019_v30 = vsel %vm3642_vm5, %v11854_v40, 0.0 }
0x1243   :  { %4020 = vadd.xlane.f32.xlu0 %v4019_v30  ;;  %8934 = vmatpush3.bf16.msra.mxu0 %v8931_v59 }
0x1244   :  { %v11860_v0 = vpop.eup %9678  ;;  %8936 = vmatprep.subr.bf16.mxu0 %v8935_v9 }
0x1245   :  { %v4028_v14 = vsel %vm3642_vm5, %v11860_v0, 0.0  ;;  %v11864_v54 = vpop.eup %9680 }
0x1246   :  { %4029 = vadd.xlane.f32.xlu1 %v4028_v14  ;;  %v4025_v25 = vsel %vm3642_vm5, %v11864_v54, 0.0 }
0x1247   :  { %8938 = vmatpush3.bf16.msra.mxu0 %v8935_v9 }
0x1248   :  { %v11868_v61 = vpop.eup %9682 }
0x1249   :  { %v4034_v2 = vsel %vm3642_vm5, %v11868_v61, 0.0  ;;  %v11887_v6 = vpop.eup %9684 }
0x124a   :  { %4026 = vadd.xlane.f32.xlu1 %v4025_v25  ;;  %v4031_v48 = vsel %vm3642_vm5, %v11887_v6, 0.0 }
0x124e   :  { %4035 = vadd.xlane.f32.xlu1 %v4034_v2 }
0x1259   :  { %9416 = vrot.lane.b32.xlu0 %v11631_v13, %s10434_s0 }
0x125f   :  { %9411 = vrot.lane.b32.xlu1 %v11623_v26, %s10434_s0 }
0x1263   :  { %9426 = vrot.lane.b32.xlu1 %v11623_v26, %s10435_s25 }
0x1267   :  { %9436 = vrot.lane.b32.xlu1 %v11635_v27, %s10435_s25 }
0x126b   :  { %4867 = vrot.lane.b32.xlu1 %v11645_v33, %s10436_s14  ;;  %v11901_v33 = vadd.f32 %v11817_v23, %v11766_v8 }
0x126f   :  { %4871 = vrot.lane.b32.xlu1 %v11651_v16, %s10436_s14  ;;  %v4552_v16 = vsel %vm3642_vm5, %v11895_v42, -inf }
0x1273   :  { %4875 = vrot.lane.b32.xlu1 %v11659_v44, %s10436_s14  ;;  %v4561_v44 = vsel %vm3642_vm5, %v11901_v33, -inf }
0x1278   :  { %4032 = vadd.xlane.f32.xlu0 %v4031_v48 }
0x128e   :  { %9421 = vrot.lane.b32.xlu0 %v11635_v27, %s10434_s0 }
0x1292   :  { %9431 = vrot.lane.b32.xlu0 %v11631_v13, %s10435_s25 }
0x1296   :  { %4865 = vrot.lane.b32.xlu0 %v11625_v10, %s10436_s14  ;;  %v11917_v10 = vadd.f32 %v11807_v55, %v11747_v57 }
0x1297   :  { %4553 = vmax.xlane.f32.xlu1 %v4552_v16 }
0x1298   :  { %v4549_v60 = vsel %vm3642_vm5, %v11917_v10, -inf }
0x129a   :  { %4869 = vrot.lane.b32.xlu0 %v11653_v56, %s10436_s14  ;;  %v11921_v56 = vadd.f32 %v11813_v24, %v11757_v62 }
0x129b   :  { %4562 = vmax.xlane.f32.xlu1 %v4561_v44 }
0x129c   :  { %v4555_v50 = vsel %vm3642_vm5, %v11921_v56, -inf }
0x129e   :  { %4873 = vrot.lane.b32.xlu0 %v11661_v22, %s10436_s14 }
0x12ac   :  { %9441 = vrot.lane.b32.xlu1 %v11623_v26, %s10437_s6 }
0x12b7   :  { %v3684_v4 = vpop.xlane.xlu1 %3683 }
0x12b8   :  { %9686 = vrcp.f32 %v3684_v4  ;;  %v3681_v23 = vpop.xlane.xlu0 %3680 }
0x12b9   :  { %9688 = vrcp.f32 %v3681_v23 }
0x12bc   :  { %v3687_v36 = vpop.xlane.xlu0 %3686 }
0x12bd   :  { %9690 = vrcp.f32 %v3687_v36  ;;  %v3690_v22 = vpop.xlane.xlu1 %3689  ;;  %4550 = vmax.xlane.f32.xlu0 %v4549_v60 }
0x12be   :  { %9692 = vrcp.f32 %v3690_v22 }
0x12c0   :  { %v3693_v55 = vpop.xlane.xlu0 %3692 }
0x12c1   :  { %9694 = vrcp.f32 %v3693_v55  ;;  %v3696_v34 = vpop.xlane.xlu1 %3695  ;;  %4556 = vmax.xlane.f32.xlu0 %v4555_v50 }
0x12c2   :  { %v9687_v24 = vpop.eup %9686  ;;  %9696 = vrcp.f32 %v3696_v34 }
0x12c3   :  { %v9689_v17 = vpop.eup %9688  ;;  %v3704_v1 = vmul.f32 %v9687_v24, %v11823_v15 }
0x12c4   :  { %v3703_v46 = vmul.f32 %v9689_v17, %v11825_v7 }
0x12c5   :  { %4559 = vmax.xlane.f32.xlu0 %v4558_v28 }
0x12c6   :  { %8391 = vmatprep.mubr.msk.f32.mxu0 %vm3642_vm5, %v3703_v46 }
0x12c7   :  { %v9691_v11 = vpop.eup %9690  ;;  %8392 = vmatmul.mubr.msk.f32.vlgmr.msra.gmra.mrb[64].mxu0 %vm3642_vm5, %v3704_v1 }
0x12c8   :  { %v9693_v32 = vpop.eup %9692  ;;  %v3705_v5 = vmul.f32 %v9691_v11, %v11831_v52 }
0x12c9   :  { %4565 = vmax.xlane.f32.xlu0 %v4564_v31  ;;  %v3706_v19 = vmul.f32 %v9693_v32, %v11833_v29 }
0x12ca   :  { %8394 = vmatprep.mubr.msk.f32.mxu0 %vm3642_vm5, %v3705_v5 }
0x12cb   :  { %v9695_v7 = vpop.eup %9694  ;;  %8395 = vmatmul.mubr.msk.f32.gmra.mrb[66].mxu0 %vm3642_vm5, %v3706_v19 }
0x12cc   :  { %v9697_v15 = vpop.eup %9696  ;;  %v3707_v3 = vmul.f32 %v9695_v7, %v11839_v43 }
0x12cd   :  { %v3708_v59 = vmul.f32 %v9697_v15, %v11841_v35 }
0x12ce   :  { %8397 = vmatprep.mubr.msk.f32.mxu0 %vm3642_vm5, %v3707_v3 }
0x12cf   :  { %v4024_v9 = vpop.xlane.xlu1 %4023  ;;  %8398 = vmatmul.mubr.msk.f32.gmra.mrb[68].mxu0 %vm3642_vm5, %v3708_v59 }
0x12d0   :  { %v4021_v51 = vpop.xlane.xlu0 %4020 }
0x12d1   :  { %9698 = vrcp.f32 %v4021_v51 }
0x12d2   :  { %9700 = vrcp.f32 %v4024_v9 }
0x12d3   :  { %v4030_v52 = vpop.xlane.xlu1 %4029 }
0x12d4   :  { %v9417_v2 = vpop.permute.xlu0 %9416 }
0x12d5   :  { %v9419_v43 = vunpack.i.h.bf16 %v9417_v2  ;;  %v9418_v21 = vunpack.i.l.bf16 %v9417_v2 }
0x12d7   :  { %v4027_v30 = vpop.xlane.xlu1 %4026  ;;  %v8961_v4 = vpack.c.bf16 %v9419_v43, %v9418_v21 }
0x12d8   :  { %9702 = vrcp.f32 %v4027_v30 }
0x12d9   :  { %9704 = vrcp.f32 %v4030_v52 }
0x12db   :  { %v9699_v29 = vpop.eup %9698  ;;  %v4036_v14 = vpop.xlane.xlu1 %4035 }
0x12dc   :  { %v4043_v25 = vmul.f32 %v9699_v29, %v11854_v40  ;;  %v9701_v17 = vpop.eup %9700 }
0x12dd   :  { %v4044_v5 = vmul.f32 %v9701_v17, %v11852_v45 }
0x12de   :  { %8433 = vmatprep.mubr.msk.f32.mxu0 %vm3642_vm5, %v4043_v25 }
0x12df   :  { %v9412_v38 = vpop.permute.xlu1 %9411 }
0x12e0   :  { %v9414_v35 = vunpack.i.h.bf16 %v9412_v38  ;;  %v9413_v48 = vunpack.i.l.bf16 %v9412_v38 }
0x12e2   :  { %v8957_v16 = vpack.c.bf16 %v9414_v35, %v9413_v48  ;;  %v9703_v46 = vpop.eup %9702 }
0x12e3   :  { %v9427_v44 = vpop.permute.xlu1 %9426  ;;  %v9705_v7 = vpop.eup %9704  ;;  %v4045_v3 = vmul.f32 %v9703_v46, %v11864_v54  ;;  %v441_v46 = vld [vmem:[#allocation14 + $0x8] sm:$0xff] }
0x12e4   :  { %v9429_v23 = vunpack.i.h.bf16 %v9427_v44  ;;  %v9428_v36 = vunpack.i.l.bf16 %v9427_v44  ;;  %8958 = vmatprep.subr.bf16.mxu0 %v8957_v16  ;;  %v4046_v45 = vmul.f32 %v9705_v7, %v11860_v0 }
0x12e5   :  { %8960 = vmatpush3.bf16.msra.mxu0 %v8957_v16 }
0x12e6   :  { %v8999_v60 = vpack.c.bf16 %v9429_v23, %v9428_v36  ;;  %8962 = vmatprep.subr.bf16.mxu0 %v8961_v4 }
0x12e7   :  { %v9437_v34 = vpop.permute.xlu1 %9436 }
0x12e8   :  { %9001 = vmatprep.subr.msk.bf16.mxu1 %vm10806_vm2, %v8999_v60  ;;  %v9439_v32 = vunpack.i.h.bf16 %v9437_v34  ;;  %v9438_v31 = vunpack.i.l.bf16 %v9437_v34 }
0x12e9   :  { %8964 = vmatpush3.bf16.msra.mxu0 %v8961_v4  ;;  %9004 = vmatpush3.bf16.xpose.msk.msra.mxu1 %vm10806_vm2, %v8999_v60 }
0x12ea   :  { %v9011_v9 = vpack.c.bf16 %v9439_v32, %v9438_v31 }
0x12eb   :  { %v4868_v51 = vpop.permute.xlu1 %4867 }
0x12ef   :  { %v4872_v29 = vpop.permute.xlu1 %4871 }
0x1305   :  { %v4033_v40 = vpop.xlane.xlu0 %4032 }
0x1306   :  { %9706 = vrcp.f32 %v4033_v40 }
0x1307   :  { %9708 = vrcp.f32 %v4036_v14  ;;  %v4876_v14 = vpop.permute.xlu1 %4875 }
0x1309   :  { %v9422_v22 = vpop.permute.xlu0 %9421 }
0x130a   :  { %v9424_v55 = vunpack.i.h.bf16 %v9422_v22  ;;  %v9423_v50 = vunpack.i.l.bf16 %v9422_v22 }
0x130c   :  { %v8965_v24 = vpack.c.bf16 %v9424_v55, %v9423_v50 }
0x130d   :  { %v9432_v28 = vpop.permute.xlu0 %9431 }
0x130e   :  { %v9434_v1 = vunpack.i.h.bf16 %v9432_v28  ;;  %v9433_v11 = vunpack.i.l.bf16 %v9432_v28  ;;  %8966 = vmatprep.subr.bf16.mxu0 %v8965_v24 }
0x130f   :  { %8968 = vmatpush3.bf16.msra.mxu0 %v8965_v24 }
0x1310   :  { %v9005_v19 = vpack.c.bf16 %v9434_v1, %v9433_v11  ;;  %v9707_v59 = vpop.eup %9706  ;;  %8442 = vmatprep.subr.mxu0 %v441_v46  ;;  %v440_v11 = vld [vmem:[#allocation14] sm:$0xff] }
0x1311   :  { %v4866_v15 = vpop.permute.xlu0 %4865  ;;  %v9709_v52 = vpop.eup %9708  ;;  %v4047_v54 = vmul.f32 %v9707_v59, %v11887_v6 }
0x1312   :  { %8434 = vmatmul.mubr.msk.f32.vlgmr.msra.gmra.mrb[70].mxu0 %vm3642_vm5, %v4044_v5  ;;  %9007 = vmatprep.subr.msk.bf16.mxu1 %vm10806_vm2, %v9005_v19  ;;  %v4048_v30 = vmul.f32 %v9709_v52, %v11868_v61 }
0x1313   :  { %8529 = vmatprep.mubr.msk.f32.mxu1 %vm686_vm1, %v4866_v15  ;;  %8436 = vmatprep.mubr.msk.f32.mxu0 %vm3642_vm5, %v4045_v3 }
0x1314   :  { %9010 = vmatpush3.bf16.xpose.msk.msra.mxu1 %vm10806_vm2, %v9005_v19  ;;  %8443 = vmatpush3.msra.mxu0 %v441_v46 }
0x1315   :  { %9013 = vmatprep.subr.msk.bf16.mxu1 %vm10806_vm2, %v9011_v9  ;;  %v4870_v0 = vpop.permute.xlu0 %4869  ;;  %8453 = vmatprep.subr.mxu0 %v440_v11 }
0x1316   :  { %8437 = vmatmul.mubr.msk.f32.gmra.mrb[72].mxu0 %vm3642_vm5, %v4046_v45 }
0x1317   :  { %8439 = vmatprep.mubr.msk.f32.mxu0 %vm3642_vm5, %v4047_v54 }
0x1319   :  { %v4874_v2 = vpop.permute.xlu0 %4873 }
0x131a   :  { %8440 = vmatmul.mubr.msk.f32.gmra.mrb[74].mxu0 %vm3642_vm5, %v4048_v30 }
0x131c   :  { %9016 = vmatpush3.bf16.xpose.msk.msra.mxu1 %vm10806_vm2, %v9011_v9 }
0x1323   :  { %8530 = vmatmul.mubr.msk.f32.vlgmr.msra.gmra.mrb[66].mxu1 %vm686_vm1, %v4868_v51 }
0x1324   :  { %8532 = vmatprep.mubr.msk.f32.mxu1 %vm686_vm1, %v4870_v0  ;;  %v4554_v25 = vpop.xlane.xlu1 %4553 }
0x1325   :  { %v4568_v6 = vsub.f32 %v11895_v42, %v4554_v25 }
0x1327   :  { %v4575_v38 = vmul.f32 1.442695, %v4568_v6  ;;  %8533 = vmatmul.mubr.msk.f32.gmra.mrb[68].mxu1 %vm686_vm1, %v4872_v29 }
0x1328   :  { %8535 = vmatprep.mubr.msk.f32.mxu1 %vm686_vm1, %v4874_v2  ;;  %v4563_v43 = vpop.xlane.xlu1 %4562 }
0x1329   :  { %9710 = vpow2.f32 %v4575_v38  ;;  %v4571_v35 = vsub.f32 %v11901_v33, %v4563_v43 }
0x132b   :  { %8536 = vmatmul.mubr.msk.f32.gmra.mrb[70].mxu1 %vm686_vm1, %v4876_v14  ;;  %v4581_v4 = vmul.f32 1.442695, %v4571_v35 }
0x132c   :  { %5429 = vmatprep.mubr.f32.mxu1 %v10439_v47  ;;  %v9442_v3 = vpop.permute.xlu1 %9441 }
0x132d   :  { %v9444_v59 = vunpack.i.h.bf16 %v9442_v3  ;;  %v9443_v9 = vunpack.i.l.bf16 %v9442_v3 }
0x132f   :  { %v8987_v52 = vpack.c.bf16 %v9444_v59, %v9443_v9  ;;  %v442_v9 = vld [vmem:[#allocation14 + $0x10] sm:$0xff] }
0x1333   :  { %v11983_v39 = vpop.eup %9710 }
0x1334   :  { %v4588_v61 = vsel %vm3642_vm5, %v11983_v39, 0.0 }
0x1335   :  { %4589 = vadd.xlane.f32.xlu0 %v4588_v61 }
0x134a   :  { %v4551_v21 = vpop.xlane.xlu0 %4550 }
0x134b   :  { %v4567_v42 = vsub.f32 %v11917_v10, %v4551_v21 }
0x134d   :  { %v4573_v48 = vmul.f32 1.442695, %v4567_v42 }
0x134e   :  { %v4557_v16 = vpop.xlane.xlu0 %4556 }
0x134f   :  { %9712 = vpow2.f32 %v4573_v48  ;;  %v4569_v44 = vsub.f32 %v11921_v56, %v4557_v16 }
0x1351   :  { %v4577_v23 = vmul.f32 1.442695, %v4569_v44 }
0x1352   :  { %v4560_v36 = vpop.xlane.xlu0 %4559 }
0x1353   :  { %9714 = vpow2.f32 %v4577_v23  ;;  %v4570_v60 = vsub.f32 %v11927_v20, %v4560_v36 }
0x1354   :  { %9716 = vpow2.f32 %v4581_v4 }
0x1355   :  { %v4579_v40 = vmul.f32 1.442695, %v4570_v60 }
0x1356   :  { %v4566_v22 = vpop.xlane.xlu0 %4565 }
0x1357   :  { %9718 = vpow2.f32 %v4579_v40  ;;  %v4572_v55 = vsub.f32 %v11933_v41, %v4566_v22 }
0x1359   :  { %v11992_v10 = vpop.eup %9712  ;;  %v4583_v33 = vmul.f32 1.442695, %v4572_v55 }
0x135a   :  { %v4585_v50 = vsel %vm3642_vm5, %v11992_v10, 0.0 }
0x135b   :  { %9720 = vpow2.f32 %v4583_v33  ;;  %4586 = vadd.xlane.f32.xlu1 %v4585_v50 }
0x135d   :  { %v11996_v56 = vpop.eup %9714 }
0x135e   :  { %v4591_v34 = vsel %vm3642_vm5, %v11996_v56, 0.0  ;;  %v12000_v20 = vpop.eup %9716 }
0x135f   :  { %4592 = vadd.xlane.f32.xlu1 %v4591_v34  ;;  %v4597_v17 = vsel %vm3642_vm5, %v12000_v20, 0.0 }
0x1361   :  { %v12002_v24 = vpop.eup %9718 }
0x1362   :  { %v4594_v41 = vsel %vm3642_vm5, %v12002_v24, 0.0 }
0x1363   :  { %4595 = vadd.xlane.f32.xlu0 %v4594_v41  ;;  %4598 = vadd.xlane.f32.xlu1 %v4597_v17 }
0x1365   :  { %v12008_v28 = vpop.eup %9720 }
0x1366   :  { %v4600_v1 = vsel %vm3642_vm5, %v12008_v28, 0.0 }
0x1367   :  { %4601 = vadd.xlane.f32.xlu0 %v4600_v1 }
0x1374   :  { %9451 = vrot.lane.b32.xlu1 %v11635_v27, %s10437_s6 }
0x137d   :  { %9446 = vrot.lane.b32.xlu0 %v11631_v13, %s10437_s6 }
0x139a   :  { %v8393_v32 = vpop.f32.mrb[64].mxu0 }
0x139b   :  { %v3811_v31 = vpop.f32.mrb[65].mxu0 }
0x139e   :  { %v8396_v5 = vpop.f32.mrb[66].mxu0 }
0x139f   :  { %v3821_v19 = vpop.f32.mrb[67].mxu0 }
0x13a2   :  { %v8399_v7 = vpop.f32.mrb[68].mxu0 }
0x13a3   :  { %v3831_v15 = vpop.f32.mrb[69].mxu0 }
0x13c2   :  { %v4590_v14 = vpop.xlane.xlu0 %4589 }
0x13e5   :  { %v8435_v51 = vpop.f32.mrb[70].mxu0 }
0x13e6   :  { %v4151_v45 = vpop.f32.mrb[71].mxu0 }
0x13e7   :  { %8444 = vmatprep.mubr.msk.f32.mxu0 %vm686_vm1, %v4151_v45 }
0x13e8   :  { %v4587_v54 = vpop.xlane.xlu1 %4586  ;;  %8445 = vmatmul.mubr.msk.f32.vlgmr.msra.gmra.mrb[76].mxu0 %vm686_vm1, %v8435_v51 }
0x13e9   :  { %8454 = vmatpush3.msra.mxu0 %v440_v11  ;;  %v8438_v30 = vpop.f32.mrb[72].mxu0  ;;  %9722 = vrcp.f32 %v4587_v54 }
0x13ea   :  { %8988 = vmatprep.subr.bf16.mxu0 %v8987_v52  ;;  %v4161_v29 = vpop.f32.mrb[73].mxu0  ;;  %9724 = vrcp.f32 %v4590_v14 }
0x13eb   :  { %8447 = vmatprep.mubr.msk.f32.mxu0 %vm686_vm1, %v4161_v29 }
0x13ec   :  { %v4593_v0 = vpop.xlane.xlu1 %4592  ;;  %8448 = vmatmul.mubr.msk.f32.gmra.mrb[78].mxu0 %vm686_vm1, %v8438_v30 }
0x13ed   :  { %v8441_v25 = vpop.f32.mrb[74].mxu0  ;;  %9726 = vrcp.f32 %v4593_v0 }
0x13ee   :  { %v4171_v6 = vpop.f32.mrb[75].mxu0 }
0x13ef   :  { %8450 = vmatprep.mubr.msk.f32.mxu0 %vm686_vm1, %v4171_v6 }
0x13f0   :  { %v4596_v2 = vpop.xlane.xlu0 %4595  ;;  %8451 = vmatmul.mubr.msk.f32.gmra.mrb[80].mxu0 %vm686_vm1, %v8441_v25  ;;  %v4599_v38 = vpop.xlane.xlu1 %4598 }
0x13f1   :  { %8455 = vmatprep.mubr.msk.f32.mxu0 %vm686_vm1, %v3811_v31  ;;  %9728 = vrcp.f32 %v4596_v2 }
0x13f2   :  { %9730 = vrcp.f32 %v4599_v38 }
0x13f3   :  { %v9723_v48 = vpop.eup %9722 }
0x13f4   :  { %v4602_v61 = vpop.xlane.xlu0 %4601  ;;  %8456 = vmatmul.mubr.msk.f32.vlgmr.msra.gmra.mrb[76].mxu0 %vm686_vm1, %v8393_v32  ;;  %v9452_v21 = vpop.permute.xlu1 %9451  ;;  %v4609_v50 = vmul.f32 %v9723_v48, %v11992_v10 }
0x13f5   :  { %8990 = vmatpush3.bf16.msra.mxu0 %v8987_v52  ;;  %8458 = vmatprep.mubr.msk.f32.mxu0 %vm686_vm1, %v3821_v19  ;;  %v9454_v60 = vunpack.i.h.bf16 %v9452_v21  ;;  %v9453_v40 = vunpack.i.l.bf16 %v9452_v21  ;;  %9732 = vrcp.f32 %v4602_v61  ;;  %v9725_v10 = vpop.eup %9724 }
0x13f6   :  { %v8531_v43 = vpop.f32.mrb[66].mxu1  ;;  %v4610_v19 = vmul.f32 %v9725_v10, %v11983_v39 }
0x13f7   :  { %v12026_v42 = vadd.f32 %v8531_v43, %v11745_v58  ;;  %v4979_v35 = vpop.f32.mrb[67].mxu1  ;;  %v8995_v17 = vpack.c.bf16 %v9454_v60, %v9453_v40  ;;  %v9727_v32 = vpop.eup %9726 }
0x13f8   :  { %v12029_v16 = vadd.f32 %v4979_v35, %v11747_v57  ;;  %v9447_v44 = vpop.permute.xlu0 %9446  ;;  %8459 = vmatmul.mubr.msk.f32.gmra.mrb[78].mxu0 %vm686_vm1, %v8396_v5 }
0x13f9   :  { %v9449_v4 = vunpack.i.h.bf16 %v9447_v44  ;;  %v9448_v23 = vunpack.i.l.bf16 %v9447_v44  ;;  %v5011_v36 = vsel %vm3642_vm5, %v12026_v42, -inf  ;;  %8461 = vmatprep.mubr.msk.f32.mxu0 %vm686_vm1, %v3831_v15 }
0x13fa   :  { %5012 = vmax.xlane.f32.xlu0 %v5011_v36  ;;  %v8534_v58 = vpop.f32.mrb[68].mxu1  ;;  %v5008_v22 = vsel %vm3642_vm5, %v12029_v16, -inf }
0x13fb   :  { %v8991_v57 = vpack.c.bf16 %v9449_v4, %v9448_v23  ;;  %v4995_v55 = vadd.f32 %v8534_v58, %v11753_v18  ;;  %v4989_v33 = vpop.f32.mrb[69].mxu1  ;;  %5009 = vmax.xlane.f32.xlu1 %v5008_v22 }
0x13fc   :  { %v4990_v34 = vadd.f32 %v4989_v33, %v11757_v62  ;;  %8462 = vmatmul.mubr.msk.f32.gmra.mrb[80].mxu0 %vm686_vm1, %v8399_v7  ;;  %v9729_v7 = vpop.eup %9728 }
0x13fd   :  { %8992 = vmatprep.subr.bf16.mxu0 %v8991_v57  ;;  %8497 = vmatprep.mubr.msk.f32.mxu0 %vm3642_vm5, %v4609_v50  ;;  %v5017_v41 = vsel %vm3642_vm5, %v4995_v55, -inf  ;;  %v9731_v15 = vpop.eup %9730 }
0x13fe   :  { %v8537_v46 = vpop.f32.mrb[70].mxu1  ;;  %v5014_v1 = vsel %vm3642_vm5, %v4990_v34, -inf  ;;  %8994 = vmatpush3.bf16.msra.mxu0 %v8991_v57  ;;  %v4613_v59 = vmul.f32 %v9731_v15, %v12000_v20 }
0x13ff   :  { %v5005_v18 = vadd.f32 %v8537_v46, %v11764_v63  ;;  %v4999_v11 = vpop.f32.mrb[71].mxu1  ;;  %5015 = vmax.xlane.f32.xlu0 %v5014_v1  ;;  %5018 = vmax.xlane.f32.xlu1 %v5017_v41  ;;  %v4611_v63 = vmul.f32 %v9727_v32, %v11996_v56  ;;  %v9733_v3 = vpop.eup %9732 }
0x1400   :  { %v5000_v62 = vadd.f32 %v4999_v11, %v11766_v8  ;;  %8996 = vmatprep.subr.bf16.mxu0 %v8995_v17  ;;  %v4612_v8 = vmul.f32 %v9729_v7, %v12002_v24  ;;  %v4614_v39 = vmul.f32 %v9733_v3, %v12008_v28 }
0x1401   :  { %v5023_v31 = vsel %vm3642_vm5, %v5005_v18, -inf }
0x1402   :  { %v5020_v5 = vsel %vm3642_vm5, %v5000_v62, -inf  ;;  %8998 = vmatpush3.bf16.msra.mxu0 %v8995_v17 }
0x1403   :  { %5021 = vmax.xlane.f32.xlu0 %v5020_v5  ;;  %5024 = vmax.xlane.f32.xlu1 %v5023_v31 }
0x1404   :  { %8506 = vmatprep.subr.mxu0 %v442_v9 }
0x1405   :  { %8498 = vmatmul.mubr.msk.f32.vlgmr.msra.gmra.mrb[82].mxu0 %vm3642_vm5, %v4610_v19 }
0x1406   :  { %8500 = vmatprep.mubr.msk.f32.mxu0 %vm3642_vm5, %v4611_v63  ;;  %8507 = vmatpush3.msra.mxu0 %v442_v9 }
0x1409   :  { %8501 = vmatmul.mubr.msk.f32.gmra.mrb[84].mxu0 %vm3642_vm5, %v4612_v8 }
0x140a   :  { %8503 = vmatprep.mubr.msk.f32.mxu0 %vm3642_vm5, %v4613_v59 }
0x140d   :  { %8504 = vmatmul.mubr.msk.f32.gmra.mrb[86].mxu0 %vm3642_vm5, %v4614_v39  ;;  %v443_v39 = vld [vmem:[#allocation14 + $0x18] sm:$0xff] }
0x1419   :  { %9456 = vrot.lane.b32.xlu0 %v11623_v26, %s10438_s18 }
0x1487   :  { %v5013_v56 = vpop.xlane.xlu0 %5012 }
0x1488   :  { %v5027_v24 = vsub.f32 %v12026_v42, %v5013_v56  ;;  %v5010_v51 = vpop.xlane.xlu1 %5009 }
0x1489   :  { %v5026_v20 = vsub.f32 %v12029_v16, %v5010_v51 }
0x148a   :  { %v5034_v45 = vmul.f32 1.442695, %v5027_v24 }
0x148b   :  { %v5032_v52 = vmul.f32 1.442695, %v5026_v20 }
0x148c   :  { %9734 = vpow2.f32 %v5034_v45  ;;  %v5016_v54 = vpop.xlane.xlu0 %5015  ;;  %v5019_v30 = vpop.xlane.xlu1 %5018 }
0x148d   :  { %9736 = vpow2.f32 %v5032_v52  ;;  %v5028_v28 = vsub.f32 %v4990_v34, %v5016_v54  ;;  %v5029_v29 = vsub.f32 %v4995_v55, %v5019_v30 }
0x148f   :  { %v5036_v14 = vmul.f32 1.442695, %v5028_v28  ;;  %v5038_v0 = vmul.f32 1.442695, %v5029_v29  ;;  %v446_v28 = vld [vmem:[%s12350_s17 + $0x8] sm:$0xff]  ;;  %v448_v29 = vld [vmem:[%s12350_s17 + $0x18] sm:$0xff] }
0x1490   :  { %v5022_v25 = vpop.xlane.xlu0 %5021  ;;  %v5025_v6 = vpop.xlane.xlu1 %5024 }
0x1491   :  { %9738 = vpow2.f32 %v5036_v14  ;;  %v5030_v26 = vsub.f32 %v5000_v62, %v5022_v25  ;;  %v5031_v2 = vsub.f32 %v5005_v18, %v5025_v6  ;;  %v445_v14 = vld [vmem:[%s12350_s17] sm:$0xff]  ;;  %v447_v25 = vld [vmem:[%s12350_s17 + $0x10] sm:$0xff] }
0x1492   :  { %9740 = vpow2.f32 %v5038_v0  ;;  %v9029_v0 = vpack.c.bf16 %v448_v29, %v446_v28  ;;  %v9031_v6 = vpack.c.bf16 %v447_v25, %v445_v14 }
0x1493   :  { %v5042_v38 = vmul.f32 1.442695, %v5031_v2  ;;  %v5040_v61 = vmul.f32 1.442695, %v5030_v26 }
0x1494   :  { %v9457_v43 = vpop.permute.xlu0 %9456  ;;  %9030 = vmatprep.subr.bf16.mxu1 %v9029_v0 }
0x1495   :  { %v9459_v21 = vunpack.i.h.bf16 %v9457_v43  ;;  %v9458_v42 = vunpack.i.l.bf16 %v9457_v43  ;;  %9742 = vpow2.f32 %v5042_v38  ;;  %9032 = vmatpush1.bf16.msra.mxu1 %v9031_v6 }
0x1496   :  { %v12062_v35 = vpop.eup %9734  ;;  %9744 = vpow2.f32 %v5040_v61 }
0x1497   :  { %v9737_v48 = vpop.eup %9736  ;;  %v9017_v16 = vpack.c.bf16 %v9459_v21, %v9458_v42  ;;  %v5047_v44 = vsel %vm3642_vm5, %v12062_v35, 0.0  ;;  %v450_v42 = vld [vmem:[%s12350_s17 + $0x28] sm:$0xff] }
0x1498   :  { %5048 = vadd.xlane.f32.xlu1 %v5047_v44  ;;  %v5044_v4 = vsel %vm3642_vm5, %v9737_v48, 0.0  ;;  %v451_v44 = vld [vmem:[%s12350_s17 + $0x30] sm:$0xff] }
0x1499   :  { %5045 = vadd.xlane.f32.xlu0 %v5044_v4  ;;  %9018 = vmatprep.subr.bf16.mxu0 %v9017_v16 }
0x149b   :  { %v9739_v23 = vpop.eup %9738 }
0x149c   :  { %v12067_v36 = vpop.eup %9740  ;;  %v5050_v60 = vsel %vm3642_vm5, %v9739_v23, 0.0 }
0x149d   :  { %5051 = vadd.xlane.f32.xlu0 %v5050_v60  ;;  %v5053_v40 = vsel %vm3642_vm5, %v12067_v36, 0.0 }
0x149e   :  { %5054 = vadd.xlane.f32.xlu1 %v5053_v40 }
0x149f   :  { %v12072_v58 = vpop.eup %9742 }
0x14a0   :  { %v5059_v22 = vsel %vm3642_vm5, %v12072_v58, 0.0  ;;  %v9745_v57 = vpop.eup %9744 }
0x14a1   :  { %v5056_v55 = vsel %vm3642_vm5, %v9745_v57, 0.0 }
0x14a2   :  { %5060 = vadd.xlane.f32.xlu1 %v5059_v22 }
0x14a6   :  { %5057 = vadd.xlane.f32.xlu1 %v5056_v55 }
0x14b3   :  { %9466 = vrot.lane.b32.xlu0 %v11635_v27, %s10438_s18 }
0x14b7   :  { %9461 = vrot.lane.b32.xlu1 %v11631_v13, %s10438_s18 }
0x14d8   :  { %v8499_v33 = vpop.f32.mrb[82].mxu0 }
0x14d9   :  { %v4717_v50 = vpop.f32.mrb[83].mxu0 }
0x14da   :  { %8508 = vmatprep.mubr.msk.f32.mxu0 %vm686_vm1, %v4717_v50 }
0x14db   :  { %8509 = vmatmul.mubr.msk.f32.vlgmr.msra.gmra.mrb[76].mxu0 %vm686_vm1, %v8499_v33 }
0x14dc   :  { %9020 = vmatpush3.bf16.msra.mxu0 %v9017_v16  ;;  %v8502_v34 = vpop.f32.mrb[84].mxu0  ;;  %v449_v16 = vld [vmem:[%s12350_s17 + $0x20] sm:$0xff] }
0x14dd   :  { %v4727_v41 = vpop.f32.mrb[85].mxu0  ;;  %v9035_v4 = vpack.c.bf16 %v451_v44, %v449_v16 }
0x14de   :  { %8511 = vmatprep.mubr.msk.f32.mxu0 %vm686_vm1, %v4727_v41 }
0x14df   :  { %8512 = vmatmul.mubr.msk.f32.gmra.mrb[78].mxu0 %vm686_vm1, %v8502_v34 }
0x14e0   :  { %v8505_v17 = vpop.f32.mrb[86].mxu0 }
0x14e1   :  { %v4737_v46 = vpop.f32.mrb[87].mxu0 }
0x14e2   :  { %8514 = vmatprep.mubr.msk.f32.mxu0 %vm686_vm1, %v4737_v46  ;;  %v453_v46 = vld [vmem:[#allocation17] sm:$0x3] }
0x14e3   :  { %8515 = vmatmul.mubr.msk.f32.gmra.mrb[80].mxu0 %vm686_vm1, %v8505_v17 }
0x1525   :  { %v5049_v13 = vpop.xlane.xlu1 %5048 }
0x1526   :  { %v5046_v27 = vpop.xlane.xlu0 %5045 }
0x1527   :  { %9746 = vrcp.f32 %v5046_v27  ;;  %v5344_v27 = vrot.slane %v453_v46, %v11531_v12 }
0x1528   :  { %9748 = vrcp.f32 %v5049_v13  ;;  %v5340_v13 = vrot.slane %v453_v46, %v11529_v37 }
0x152a   :  { %v5052_v18 = vpop.xlane.xlu0 %5051 }
0x152b   :  { %v5055_v1 = vpop.xlane.xlu1 %5054  ;;  %9750 = vrcp.f32 %v5052_v18 }
0x152c   :  { %9752 = vrcp.f32 %v5055_v1 }
0x152e   :  { %v9467_v31 = vpop.permute.xlu0 %9466 }
0x152f   :  { %v5061_v11 = vpop.xlane.xlu1 %5060  ;;  %v9469_v19 = vunpack.i.h.bf16 %v9467_v31  ;;  %v9468_v7 = vunpack.i.l.bf16 %v9467_v31 }
0x1531   :  { %v9747_v10 = vpop.eup %9746  ;;  %v9025_v3 = vpack.c.bf16 %v9469_v19, %v9468_v7  ;;  %v454_v19 = vld [vmem:[#allocation19] sm:$0x3] }
0x1532   :  { %v5068_v62 = vmul.f32 %v9747_v10, %v9737_v48  ;;  %v9749_v59 = vpop.eup %9748 }
0x1533   :  { %v5058_v32 = vpop.xlane.xlu1 %5057  ;;  %v5069_v56 = vmul.f32 %v9749_v59, %v12062_v35  ;;  %v452_v35 = vld [vmem:[%s12350_s17 + $0x38] sm:$0xff]  ;;  %v5486_v59 = vrot.slane %v454_v19, %v11531_v12 }
0x1534   :  { %8550 = vmatprep.mubr.msk.f32.mxu0 %vm3642_vm5, %v5068_v62  ;;  %9754 = vrcp.f32 %v5058_v32  ;;  %v9033_v48 = vpack.c.bf16 %v452_v35, %v450_v42 }
0x1535   :  { %9756 = vrcp.f32 %v5061_v11  ;;  %v9751_v9 = vpop.eup %9750 }
0x1536   :  { %v9753_v24 = vpop.eup %9752  ;;  %v5070_v51 = vmul.f32 %v9751_v9, %v9739_v23  ;;  %9034 = vmatprep.subr.bf16.mxu1 %v9033_v48  ;;  %v7563_v23 = vld [vmem:[#allocation16] ss:$0 sm:$0xff] }
0x1537   :  { %v9462_v5 = vpop.permute.xlu1 %9461  ;;  %v5071_v45 = vmul.f32 %v9753_v24, %v12067_v36  ;;  %9036 = vmatpush1.bf16.msra.mxu1 %v9035_v4 }
0x1538   :  { %v9464_v63 = vunpack.i.h.bf16 %v9462_v5  ;;  %v9463_v15 = vunpack.i.l.bf16 %v9462_v5  ;;  %9049 = vmatprep.subr.bf16.mxu1 %v10441_v53 }
0x153a   :  { %v9021_v8 = vpack.c.bf16 %v9464_v63, %v9463_v15 }
0x153c   :  { %9022 = vmatprep.subr.bf16.mxu0 %v9021_v8 }
0x153d   :  { %9024 = vmatpush3.bf16.msra.mxu0 %v9021_v8 }
0x153e   :  { %9026 = vmatprep.subr.bf16.mxu0 %v9025_v3  ;;  %v9755_v20 = vpop.eup %9754 }
0x153f   :  { %v9757_v52 = vpop.eup %9756  ;;  %v5072_v54 = vmul.f32 %v9755_v20, %v9745_v57 }
0x1540   :  { %v5073_v30 = vmul.f32 %v9757_v52, %v12072_v58 }
0x1541   :  { %9028 = vmatpush3.bf16.msra.mxu0 %v9025_v3  ;;  %v5482_v3 = vrot.slane %v454_v19, %v11529_v37 }
0x1542   :  { %8559 = vmatprep.subr.mxu0 %v443_v39 }
0x1544   :  { %8551 = vmatmul.mubr.msk.f32.vlgmr.msra.gmra.mrb[88].mxu0 %vm3642_vm5, %v5069_v56 }
0x1545   :  { %8553 = vmatprep.mubr.msk.f32.mxu0 %vm3642_vm5, %v5070_v51  ;;  %8560 = vmatpush3.msra.mxu0 %v443_v39 }
0x1548   :  { %8554 = vmatmul.mubr.msk.f32.gmra.mrb[90].mxu0 %vm3642_vm5, %v5071_v45 }
0x1549   :  { %8556 = vmatprep.mubr.msk.f32.mxu0 %vm3642_vm5, %v5072_v54 }
0x154c   :  { %8557 = vmatmul.mubr.msk.f32.gmra.mrb[92].mxu0 %vm3642_vm5, %v5073_v30 }
0x1617   :  { %v8552_v26 = vpop.f32.mrb[88].mxu0 }
0x1618   :  { %v5176_v2 = vpop.f32.mrb[89].mxu0 }
0x1619   :  { %8561 = vmatprep.mubr.msk.f32.mxu0 %vm686_vm1, %v5176_v2 }
0x161a   :  { %8562 = vmatmul.mubr.msk.f32.vlgmr.msra.gmra.mrb[76].mxu0 %vm686_vm1, %v8552_v26 }
0x161b   :  { %v8555_v38 = vpop.f32.mrb[90].mxu0 }
0x161c   :  { %v5186_v61 = vpop.f32.mrb[91].mxu0 }
0x161d   :  { %8564 = vmatprep.mubr.msk.f32.mxu0 %vm686_vm1, %v5186_v61 }
0x161e   :  { %8565 = vmatmul.mubr.msk.f32.gmra.mrb[78].mxu0 %vm686_vm1, %v8555_v38 }
0x161f   :  { %v8558_v43 = vpop.f32.mrb[92].mxu0 }
0x1620   :  { %v5196_v21 = vpop.f32.mrb[93].mxu0 }
0x1621   :  { %8567 = vmatprep.mubr.msk.f32.mxu0 %vm686_vm1, %v5196_v21 }
0x1622   :  { %8568 = vmatmul.mubr.msk.f32.gmra.mrb[80].mxu0 %vm686_vm1, %v8558_v43 }
0x16ed   :  { %v8563_v36 = vpop.f32.mrb[76].mxu0 }
0x16ee   :  { %v5289_v60 = vpop.f32.mrb[77].mxu0  ;;  %v12116_v57 = vadd.f32 %v8563_v36, %v7563_v23 }
0x16ef   :  { %v12111_v40 = vadd.f32 %v7563_v23, %v5289_v60 }
0x16f1   :  { %v8566_v58 = vpop.f32.mrb[78].mxu0  ;;  %7564 = vmatmul.mubr.msk.f32.vlgmr.msra.gmra.mrb[72].mxu1 %vm524_vm0, %v12111_v40 }
0x16f2   :  { %v5299_v22 = vpop.f32.mrb[79].mxu0  ;;  %5435 = vmatprep.mubr.f32.mxu1 %v10439_v47  ;;  %v12126_v34 = vadd.f32 %v8566_v58, %v7563_v23 }
0x16f3   :  { %v12121_v50 = vadd.f32 %v7563_v23, %v5299_v22 }
0x16f5   :  { %v8569_v55 = vpop.f32.mrb[80].mxu0  ;;  %7565 = vmatmul.mubr.msk.f32.gmra.mrb[74].mxu1 %vm524_vm0, %v12116_v57 }
0x16f6   :  { %v5309_v33 = vpop.f32.mrb[81].mxu0  ;;  %5441 = vmatprep.mubr.f32.mxu1 %v10439_v47  ;;  %v12136_v17 = vadd.f32 %v8569_v55, %v7563_v23 }
0x16f7   :  { %v12131_v41 = vadd.f32 %v7563_v23, %v5309_v33 }
0x16f9   :  { %7566 = vmatmul.mubr.msk.f32.gmra.mrb[76].mxu1 %vm524_vm0, %v12121_v50 }
0x16fa   :  { %5447 = vmatprep.mubr.f32.mxu1 %v10439_v47 }
0x16fd   :  { %7567 = vmatmul.mubr.msk.f32.gmra.mrb[78].mxu1 %vm524_vm0, %v12126_v34 }
0x16fe   :  { %5453 = vmatprep.mubr.f32.mxu1 %v10439_v47 }
0x1701   :  { %7568 = vmatmul.mubr.msk.f32.gmra.mrb[80].mxu1 %vm524_vm0, %v12131_v41 }
0x1702   :  { %5459 = vmatprep.mubr.f32.mxu1 %v10439_v47 }
0x1705   :  { %7569 = vmatmul.mubr.msk.f32.gmra.mrb[82].mxu1 %vm524_vm0, %v12136_v17 }
0x1706   :  { %8603 = vmatprep.mubr.msk.f32.mxu1 %vm10442_vm4, %v10439_v47 }
0x17c4   :  { %v5431_v1 = vpop.f32.mrb[72].mxu1 }
0x17c5   :  { %v5432_v18 = vadd.f32 %v5431_v1, %v5340_v13  ;;  %v5433_v11 = vpop.f32.mrb[73].mxu1 }
0x17c6   :  { %v5434_v10 = vadd.f32 %v5433_v11, %v5344_v27 }
0x17c7   :  { %9758 = vtanh.f32 %v5432_v18 }
0x17c8   :  { %9760 = vtanh.f32 %v5434_v10  ;;  %v5437_v62 = vpop.f32.mrb[74].mxu1 }
0x17c9   :  { %v5438_v32 = vadd.f32 %v5437_v62, %v5340_v13  ;;  %v5439_v31 = vpop.f32.mrb[75].mxu1  ;;  %v498_v62 = vld [vmem:[#allocation32] sm:$0xff] }
0x17ca   :  { %v5440_v5 = vadd.f32 %v5439_v31, %v5344_v27  ;;  %8582 = vmatprep.mubr.msk.f32.mxu0 %vm3642_vm5, %v498_v62 }
0x17cb   :  { %9762 = vtanh.f32 %v5438_v32 }
0x17cc   :  { %9764 = vtanh.f32 %v5440_v5  ;;  %v5443_v7 = vpop.f32.mrb[76].mxu1 }
0x17cd   :  { %v5444_v63 = vadd.f32 %v5443_v7, %v5340_v13  ;;  %v5445_v15 = vpop.f32.mrb[77].mxu1 }
0x17ce   :  { %v5446_v8 = vadd.f32 %v5445_v15, %v5344_v27 }
0x17cf   :  { %9766 = vtanh.f32 %v5444_v63 }
0x17d0   :  { %9768 = vtanh.f32 %v5446_v8  ;;  %v5449_v39 = vpop.f32.mrb[78].mxu1 }
0x17d1   :  { %v9759_v9 = vpop.eup %9758  ;;  %v5450_v56 = vadd.f32 %v5449_v39, %v5340_v13  ;;  %v5451_v24 = vpop.f32.mrb[79].mxu1 }
0x17d2   :  { %v9761_v51 = vpop.eup %9760  ;;  %v5452_v20 = vadd.f32 %v5451_v24, %v5344_v27  ;;  %v5489_v45 = vmul.f32 %v9759_v9, %v5482_v3 }
0x17d3   :  { %9770 = vtanh.f32 %v5450_v56  ;;  %v5490_v52 = vmul.f32 %v9761_v51, %v5486_v59 }
0x17d4   :  { %9772 = vtanh.f32 %v5452_v20  ;;  %v5455_v54 = vpop.f32.mrb[80].mxu1 }
0x17d5   :  { %v9763_v30 = vpop.eup %9762  ;;  %v5456_v28 = vadd.f32 %v5455_v54, %v5340_v13  ;;  %v5457_v29 = vpop.f32.mrb[81].mxu1  ;;  %v5501_v14 = vadd.f32 %v5490_v52, %v5489_v45 }
0x17d6   :  { %v9765_v0 = vpop.eup %9764  ;;  %v5458_v25 = vadd.f32 %v5457_v29, %v5344_v27  ;;  %v5491_v6 = vmul.f32 %v9763_v30, %v5482_v3 }
0x17d7   :  { %9774 = vtanh.f32 %v5456_v28  ;;  %5502 = vadd.xlane.f32.xlu0 %v5501_v14  ;;  %v5492_v26 = vmul.f32 %v9765_v0, %v5486_v59 }
0x17d8   :  { %9776 = vtanh.f32 %v5458_v25  ;;  %v5461_v2 = vpop.f32.mrb[82].mxu1 }
0x17d9   :  { %v9767_v38 = vpop.eup %9766  ;;  %v5462_v61 = vadd.f32 %v5461_v2, %v5340_v13  ;;  %v5463_v43 = vpop.f32.mrb[83].mxu1  ;;  %v5504_v21 = vadd.f32 %v5492_v26, %v5491_v6 }
0x17da   :  { %v9769_v42 = vpop.eup %9768  ;;  %v5464_v35 = vadd.f32 %v5463_v43, %v5344_v27  ;;  %v5493_v48 = vmul.f32 %v9767_v38, %v5482_v3 }
0x17db   :  { %9778 = vtanh.f32 %v5462_v61  ;;  %5505 = vadd.xlane.f32.xlu1 %v5504_v21  ;;  %v5494_v16 = vmul.f32 %v9769_v42, %v5486_v59 }
0x17dc   :  { %9780 = vtanh.f32 %v5464_v35 }
0x17dd   :  { %v9771_v44 = vpop.eup %9770  ;;  %v5507_v4 = vadd.f32 %v5494_v16, %v5493_v48 }
0x17de   :  { %v9773_v23 = vpop.eup %9772  ;;  %v5495_v36 = vmul.f32 %v9771_v44, %v5482_v3 }
0x17df   :  { %5508 = vadd.xlane.f32.xlu1 %v5507_v4  ;;  %v5496_v60 = vmul.f32 %v9773_v23, %v5486_v59  ;;  %v455_v23 = vld [vmem:[#allocation20] sm:$0xff] }
0x17e1   :  { %v9775_v58 = vpop.eup %9774  ;;  %v5510_v22 = vadd.f32 %v5496_v60, %v5495_v36  ;;  %v456_v36 = vld [vmem:[#allocation20 + $0x8] sm:$0xff]  ;;  %v499_v60 = vld [vmem:[#allocation32 + $0x8] sm:$0xff] }
0x17e2   :  { %v9777_v55 = vpop.eup %9776  ;;  %v5497_v33 = vmul.f32 %v9775_v58, %v5482_v3  ;;  %v9059_v58 = vpack.c.bf16 %v456_v36, %v455_v23 }
0x17e3   :  { %v5498_v46 = vmul.f32 %v9777_v55, %v5486_v59  ;;  %v457_v55 = vld [vmem:[#allocation20 + $0x10] sm:$0xff] }
0x17e5   :  { %v9779_v13 = vpop.eup %9778  ;;  %v5513_v1 = vadd.f32 %v5498_v46, %v5497_v33  ;;  %v458_v33 = vld [vmem:[#allocation20 + $0x18] sm:$0xff]  ;;  %v501_v46 = vld [vmem:[#allocation32 + $0x18] sm:$0xff] }
0x17e6   :  { %v9781_v18 = vpop.eup %9780  ;;  %v5499_v27 = vmul.f32 %v9779_v13, %v5482_v3  ;;  %v9062_v13 = vpack.c.bf16 %v458_v33, %v457_v55 }
0x17e7   :  { %5514 = vadd.xlane.f32.xlu0 %v5513_v1  ;;  %v5500_v11 = vmul.f32 %v9781_v18, %v5486_v59  ;;  %v502_v1 = vld [vmem:[#allocation32 + $0x20] sm:$0xff]  ;;  %v503_v18 = vld [vmem:[#allocation32 + $0x28] sm:$0xff] }
0x17e9   :  { %v5516_v10 = vadd.f32 %v5500_v11, %v5499_v27 }
0x17eb   :  { %5517 = vadd.xlane.f32.xlu0 %v5516_v10 }
0x17ef   :  { %5511 = vadd.xlane.f32.xlu0 %v5510_v22  ;;  %v500_v22 = vld [vmem:[#allocation32 + $0x10] sm:$0xff] }
0x1864   :  { %v5503_v32 = vpop.xlane.xlu0 %5502 }
0x1868   :  { %v5506_v5 = vpop.xlane.xlu1 %5505 }
0x186c   :  { %v5509_v15 = vpop.xlane.xlu1 %5508 }
0x1874   :  { %v5515_v31 = vpop.xlane.xlu0 %5514 }
0x1875   :  { %v5519_v63 = vmax.f32 %v5503_v32, %v5515_v31 }
0x1878   :  { %v5518_v19 = vpop.xlane.xlu0 %5517 }
0x1879   :  { %v5520_v7 = vmax.f32 %v5506_v5, %v5518_v19 }
0x187b   :  { %v5521_v39 = vmax.f32 %v5519_v63, %v5520_v7 }
0x187c   :  { %v5512_v8 = vpop.xlane.xlu0 %5511 }
0x187d   :  { %v5522_v9 = vmax.f32 %v5509_v15, %v5512_v8 }
0x187f   :  { %v5523_v56 = vmax.f32 %v5521_v39, %v5522_v9 }
0x1881   :  { %v5524_v3 = vrot.slane %v5523_v56, 4 }
0x1883   :  { %v5525_v24 = vmax.f32 %v5523_v56, %v5524_v3 }
0x1885   :  { %v5526_v59 = vrot.slane %v5525_v24, 2 }
0x1887   :  { %v5527_v51 = vmax.f32 %v5525_v24, %v5526_v59 }
0x1889   :  { %v5528_v20 = vrot.slane %v5527_v51, 1 }
0x188b   :  { %v5529_v45 = vmax.f32 %v5527_v51, %v5528_v20  ;;  %v7577_v51 = vld [vmem:[#allocation22] ss:$0 sm:$0xff] }
0x188d   :  { %v5533_v52 = vsub.f32 %v5512_v8, %v5529_v45  ;;  %v5530_v54 = vsub.f32 %v5503_v32, %v5529_v45  ;;  %v5531_v30 = vsub.f32 %v5506_v5, %v5529_v45  ;;  %v5532_v28 = vsub.f32 %v5509_v15, %v5529_v45 }
0x188e   :  { %v5534_v29 = vsub.f32 %v5515_v31, %v5529_v45  ;;  %v5535_v6 = vsub.f32 %v5518_v19, %v5529_v45 }
0x188f   :  { %v5542_v14 = vmul.f32 1.442695, %v5533_v52  ;;  %v5536_v0 = vmul.f32 1.442695, %v5530_v54  ;;  %v5538_v25 = vmul.f32 1.442695, %v5531_v30 }
0x1890   :  { %v5540_v26 = vmul.f32 1.442695, %v5532_v28  ;;  %v5544_v2 = vmul.f32 1.442695, %v5534_v29  ;;  %v5546_v38 = vmul.f32 1.442695, %v5535_v6 }
0x1891   :  { %9782 = vpow2.f32 %v5542_v14 }
0x1892   :  { %9784 = vpow2.f32 %v5536_v0 }
0x1893   :  { %9786 = vpow2.f32 %v5538_v25 }
0x1894   :  { %9788 = vpow2.f32 %v5540_v26 }
0x1895   :  { %9790 = vpow2.f32 %v5544_v2 }
0x1896   :  { %9792 = vpow2.f32 %v5546_v38 }
0x189b   :  { %v9783_v61 = vpop.eup %9782 }
0x189c   :  { %v9785_v43 = vpop.eup %9784 }
0x189d   :  { %v9787_v21 = vpop.eup %9786 }
0x189e   :  { %v9789_v42 = vpop.eup %9788  ;;  %v9037_v35 = vpack.c.bf16 %v9787_v21, %v9785_v43 }
0x189f   :  { %v9791_v48 = vpop.eup %9790  ;;  %v9041_v16 = vpack.c.bf16 %v9783_v61, %v9789_v42 }
0x18a0   :  { %9038 = vmatprep.subr.bf16.mxu0 %v9037_v35  ;;  %v12147_v44 = vpop.eup %9792 }
0x18a1   :  { %9040 = vmatpush3.bf16.msra.mxu0 %v9037_v35  ;;  %v9045_v4 = vpack.c.bf16 %v12147_v44, %v9791_v48 }
0x18a2   :  { %9042 = vmatprep.subr.bf16.mxu0 %v9041_v16 }
0x18a5   :  { %9044 = vmatpush3.bf16.msra.mxu0 %v9041_v16 }
0x18a6   :  { %9046 = vmatprep.subr.bf16.mxu0 %v9045_v4 }
0x18a9   :  { %9048 = vmatpush3.bf16.msra.mxu0 %v9045_v4 }
0x18aa   :  { %9058 = vmatprep.subr.bf16.mxu0 %v10441_v53 }
0x18ac   :  { %8583 = vmatmul.mubr.msk.f32.vlgmr.msra.gmra.mrb[94].mxu0 %vm3642_vm5, %v499_v60 }
0x18ad   :  { %8585 = vmatprep.mubr.msk.f32.mxu0 %vm3642_vm5, %v500_v22  ;;  %9060 = vmatpush3.bf16.msra.mxu0 %v9059_v58 }
0x18ae   :  { %9061 = vmatprep.subr.bf16.mxu0 %v10441_v53 }
0x18b0   :  { %8586 = vmatmul.mubr.msk.f32.gmra.mrb[96].mxu0 %vm3642_vm5, %v501_v46 }
0x18b1   :  { %8588 = vmatprep.mubr.msk.f32.mxu0 %vm3642_vm5, %v502_v1  ;;  %9063 = vmatpush3.bf16.msra.mxu0 %v9062_v13 }
0x18b2   :  { %8622 = vmatprep.subr.mxu0 %v10439_v47 }
0x18b4   :  { %8589 = vmatmul.mubr.msk.f32.gmra.mrb[98].mxu0 %vm3642_vm5, %v503_v18 }
0x18b5   :  { %8614 = vmatprep.mubr.msk.f32.mxu0 %vm10442_vm4, %v10439_v47 }
0x18b8   :  { %8615 = vmatmul.mubr.msk.f32.vlgmr.msra.gmra.mrb[100].mxu0 %vm524_vm0, %v11621_v49 }
0x18b9   :  { %8624 = vmatprep.mubr.msk.f32.mxu0 %vm10442_vm4, %v10439_v47 }
0x197f   :  { %v8584_v27 = vpop.f32.mrb[94].mxu0 }
0x1980   :  { %9794 = vrcp.f32 %v8584_v27  ;;  %v5632_v11 = vpop.f32.mrb[95].mxu0 }
0x1981   :  { %9796 = vrcp.f32 %v5632_v11 }
0x1983   :  { %v8587_v10 = vpop.f32.mrb[96].mxu0 }
0x1984   :  { %9798 = vrcp.f32 %v8587_v10  ;;  %v5642_v62 = vpop.f32.mrb[97].mxu0  ;;  %v461_v10 = vld [vmem:[#allocation23 + $0x8] sm:$0xff] }
0x1985   :  { %9800 = vrcp.f32 %v5642_v62 }
0x1987   :  { %v8590_v32 = vpop.f32.mrb[98].mxu0 }
0x1988   :  { %v5652_v31 = vpop.f32.mrb[99].mxu0 }
0x1989   :  { %9802 = vrcp.f32 %v5652_v31 }
0x198a   :  { %v9795_v5 = vpop.eup %9794  ;;  %9804 = vrcp.f32 %v8590_v32 }
0x198b   :  { %v9797_v19 = vpop.eup %9796  ;;  %v5857_v7 = vpop.f32.mrb[100].mxu0  ;;  %v5668_v63 = vmul.f32 %v9795_v5, %v9787_v21  ;;  %v504_v21 = vld [vmem:[%s12351_s1] sm:$0x3f] }
0x198c   :  { %v8616_v49 = vpop.f32.mrb[101].mxu0  ;;  %v5667_v15 = vmul.f32 %v9797_v19, %v9785_v43  ;;  %v12164_v20 = vadd.f32 %v7577_v51, %v5857_v7 }
0x198d   :  { %5680 = vperm.xlu0 %9348, %v5668_v63  }
0x198e   :  { %v9799_v8 = vpop.eup %9798  ;;  %5675 = vperm.xlu1 %9349, %v5667_v15   ;;  %v12170_v52 = vmul.f32 0.35355338, %v12164_v20  ;;  %v460_v15 = vld [vmem:[#allocation23] sm:$0xff] }
0x198f   :  { %v5670_v39 = vmul.f32 %v9799_v8, %v9783_v61  ;;  %v9801_v9 = vpop.eup %9800 }
0x1990   :  { %v5669_v3 = vmul.f32 %v9801_v9, %v9789_v42  ;;  %v12203_v42 = vld [vmem:[%s12352_s29] sm:$0xff] }
0x1992   :  { %5690 = vperm.xlu1 %9349, %v5670_v39  }
0x1993   :  { %v9803_v56 = vpop.eup %9802 }
0x1994   :  { %v5671_v24 = vmul.f32 %v9803_v56, %v9791_v48  ;;  %v9805_v59 = vpop.eup %9804 }
0x1995   :  { %v5672_v45 = vmul.f32 %v9805_v59, %v12147_v44 }
0x1996   :  { %5685 = vperm.xlu1 %9349, %v5669_v3   ;;  %5695 = vperm.xlu0 %9348, %v5671_v24  }
0x199a   :  { %5700 = vperm.xlu1 %9349, %v5672_v45   ;;  %5863 = vrot.lane.b32.xlu0 %v12164_v20, %s10428_s21 }
0x199e   :  { %6029 = vrot.lane.b32.xlu1 %v12164_v20, %s10430_s13  ;;  %6027 = vrot.lane.b32.xlu0 %v12170_v52, %s10431_s16 }
0x1a0c   :  { %v5681_v54 = vpop.permute.xlu0 %5680 }
0x1a0d   :  { %v5704_v30 = vmul.f32 %v5681_v54, %v12116_v57  ;;  %v5676_v28 = vpop.permute.xlu1 %5675 }
0x1a0e   :  { %v5703_v29 = vmul.f32 %v5676_v28, %v12111_v40 }
0x1a10   :  { %v9050_v14 = vpack.c.bf16 %v5704_v30, %v5703_v29 }
0x1a11   :  { %v5691_v0 = vpop.permute.xlu1 %5690 }
0x1a12   :  { %9051 = vmatpush3.bf16.msra.mxu1 %v9050_v14  ;;  %v5706_v6 = vmul.f32 %v5691_v0, %v12126_v34 }
0x1a13   :  { %9052 = vmatprep.subr.bf16.mxu1 %v10441_v53 }
0x1a15   :  { %v5686_v25 = vpop.permute.xlu1 %5685  ;;  %v5696_v2 = vpop.permute.xlu0 %5695 }
0x1a16   :  { %v5705_v26 = vmul.f32 %v5686_v25, %v12121_v50  ;;  %v5707_v43 = vmul.f32 %v5696_v2, %v12131_v41 }
0x1a18   :  { %v9053_v38 = vpack.c.bf16 %v5706_v6, %v5705_v26 }
0x1a19   :  { %v5701_v61 = vpop.permute.xlu1 %5700  ;;  %v5864_v50 = vpop.permute.xlu0 %5863 }
0x1a1a   :  { %v5708_v57 = vmul.f32 %v5701_v61, %v12136_v17  ;;  %9054 = vmatpush3.bf16.msra.mxu1 %v9053_v38 }
0x1a1b   :  { %9055 = vmatprep.subr.bf16.mxu1 %v10441_v53 }
0x1a1c   :  { %v9056_v40 = vpack.c.bf16 %v5708_v57, %v5707_v43 }
0x1a1d   :  { %v6030_v34 = vpop.permute.xlu1 %6029  ;;  %v6028_v53 = vpop.permute.xlu0 %6027 }
0x1a1e   :  { %9057 = vmatpush3.bf16.msra.mxu1 %v9056_v40 }
0x1a1f   :  { %8617 = vmatprep.subr.mxu1 %v10439_v47 }
0x1a21   :  { %8604 = vmatmul.mubr.msk.f32.vlgmr.msra.gmra.mrb[84].mxu1 %vm3642_vm5, %v504_v21 }
0x1a22   :  { %8619 = vmatprep.mubr.msk.f32.mxu1 %vm10442_vm4, %v10439_v47 }
0x1a27   :  { %8618 = vmatpush3.xpose.msk.msra.mxu1 %vm686_vm1, %v5864_v50  ;;  %v462_v50 = vld [vmem:[#allocation23 + $0x10] sm:$0xff] }
0x1a28   :  { %8627 = vmatprep.subr.mxu1 %v10439_v47 }
0x1a2a   :  { %8620 = vmatmul.mubr.msk.f32.vlgmr.msra.gmra.mrb[86].mxu1 %vm686_vm1, %v12170_v52 }
0x1a2b   :  { %8628 = vmatpush3.xpose.msk.msra.mxu1 %vm686_vm1, %v6030_v34  ;;  %8629 = vmatprep.mubr.msk.f32.mxu1 %vm10442_vm4, %v10439_v47 }
0x1a2c   :  { %8637 = vmatprep.subr.mxu1 %v10439_v47 }
0x1a2e   :  { %8630 = vmatmul.mubr.msk.f32.vlgmr.msra.gmra.mrb[88].mxu1 %vm686_vm1, %v6028_v53 }
0x1a2f   :  { %8639 = vmatprep.mubr.msk.f32.mxu1 %vm10442_vm4, %v10439_v47  ;;  %8638 = vmatpush3.msra.mxu1 %v461_v10  ;;  %v467_v10 = vld [vmem:[%s12353_s2 + $0x10] sm:$0xff] }
0x1a30   :  { %8647 = vmatprep.subr.mxu1 %v10439_v47 }
0x1af4   :  { %v12200_v41 = vpop.f32.mrb[84].mxu1 }
0x1af5   :  { %v8605_v17 = vpop.f32.mrb[85].mxu1 }
0x1afd   :  { %v5936_v35 = vpop.f32.mrb[86].mxu1 }
0x1afe   :  { %v5937_v48 = vadd.f32 %v5936_v35, %v12203_v42  ;;  %v8621_v16 = vpop.f32.mrb[87].mxu1 }
0x1b00   :  { %v5940_v44 = vsel %vm686_vm1, %v5937_v48, -inf }
0x1b01   :  { %5941 = vmax.xlane.f32.xlu1 %v5940_v44  ;;  %v6101_v4 = vpop.f32.mrb[88].mxu1 }
0x1b02   :  { %v6102_v23 = vadd.f32 %v6101_v4, %v12203_v42  ;;  %v8631_v36 = vpop.f32.mrb[89].mxu1 }
0x1b04   :  { %v6105_v60 = vsel %vm686_vm1, %v6102_v23, -inf }
0x1b05   :  { %6106 = vmax.xlane.f32.xlu0 %v6105_v60 }
0x1b8e   :  { %v5942_v58 = vpop.xlane.xlu1 %5941 }
0x1b8f   :  { %v5943_v22 = vsub.f32 %v5937_v48, %v5942_v58 }
0x1b91   :  { %v5944_v55 = vmul.f32 1.442695, %v5943_v22 }
0x1b92   :  { %v6107_v33 = vpop.xlane.xlu0 %6106 }
0x1b93   :  { %9806 = vpow2.f32 %v5944_v55  ;;  %v6108_v46 = vsub.f32 %v6102_v23, %v6107_v33 }
0x1b95   :  { %v6109_v13 = vmul.f32 1.442695, %v6108_v46 }
0x1b97   :  { %9808 = vpow2.f32 %v6109_v13  ;;  %v463_v13 = vld [vmem:[#allocation23 + $0x18] sm:$0xff] }
0x1b9d   :  { %v9807_v1 = vpop.eup %9806 }
0x1b9e   :  { %v5946_v18 = vsel %vm686_vm1, %v9807_v1, 0.0 }
0x1b9f   :  { %5947 = vadd.xlane.f32.xlu0 %v5946_v18  ;;  %v468_v18 = vld [vmem:[%s12353_s2 + $0x18] sm:$0xff] }
0x1ba1   :  { %v9809_v27 = vpop.eup %9808 }
0x1ba2   :  { %v6111_v11 = vsel %vm686_vm1, %v9809_v27, 0.0 }
0x1ba3   :  { %6112 = vadd.xlane.f32.xlu1 %v6111_v11 }
0x1bb4   :  { %6116 = vrot.lane.b32.xlu1 %v12164_v20, %s10434_s0 }
0x1bb5   :  { %5951 = vrot.lane.b32.xlu0 %v12164_v20, %s10429_s15 }
0x1bb8   :  { %6340 = vrot.lane.b32.xlu1 %v12164_v20, %s10432_s27 }
0x1bb9   :  { %6338 = vrot.lane.b32.xlu0 %v12170_v52, %s10433_s3 }
0x1c2c   :  { %v5948_v62 = vpop.xlane.xlu0 %5947 }
0x1c2d   :  { %9810 = vrcp.f32 %v5948_v62  ;;  %v470_v62 = vld [vmem:[%s12353_s2 + $0x28] sm:$0xff] }
0x1c30   :  { %v6113_v32 = vpop.xlane.xlu1 %6112  ;;  %v5952_v31 = vpop.permute.xlu0 %5951 }
0x1c31   :  { %9812 = vrcp.f32 %v6113_v32  ;;  %8623 = vmatpush3.msra.mxu0 %v5952_v31  ;;  %v472_v32 = vld [vmem:[%s12353_s2 + $0x38] sm:$0xff] }
0x1c32   :  { %8632 = vmatprep.subr.mxu0 %v10439_v47 }
0x1c34   :  { %v6117_v7 = vpop.permute.xlu1 %6116  ;;  %v6339_v24 = vpop.permute.xlu0 %6338 }
0x1c37   :  { %v9811_v5 = vpop.eup %9810 }
0x1c38   :  { %v5950_v19 = vmul.f32 %v9811_v5, %v9807_v1  ;;  %v6341_v56 = vpop.permute.xlu1 %6340  ;;  %v466_v1 = vld [vmem:[%s12353_s2 + $0x8] sm:$0xff]  ;;  %v9068_v5 = vpack.c.bf16 %v472_v32, %v470_v62 }
0x1c39   :  { %v9064_v11 = vpack.c.bf16 %v468_v18, %v466_v1 }
0x1c3a   :  { %8625 = vmatmul.mubr.msk.f32.vlgmr.msra.gmra.mrb[102].mxu0 %vm686_vm1, %v5950_v19  ;;  %v469_v19 = vld [vmem:[%s12353_s2 + $0x20] sm:$0xff] }
0x1c3b   :  { %v9813_v63 = vpop.eup %9812  ;;  %8633 = vmatpush3.msra.mxu0 %v6117_v7  ;;  %8634 = vmatprep.mubr.msk.f32.mxu0 %vm10442_vm4, %v10439_v47  ;;  %v471_v7 = vld [vmem:[%s12353_s2 + $0x30] sm:$0xff] }
0x1c3c   :  { %v6115_v49 = vmul.f32 %v9813_v63, %v9809_v27  ;;  %8642 = vmatprep.subr.mxu0 %v10439_v47  ;;  %v465_v27 = vld [vmem:[%s12353_s2] sm:$0xff]  ;;  %v9070_v63 = vpack.c.bf16 %v471_v7, %v469_v19 }
0x1c3d   :  { %v9066_v31 = vpack.c.bf16 %v467_v10, %v465_v27 }
0x1c3e   :  { %8635 = vmatmul.mubr.msk.f32.vlgmr.msra.gmra.mrb[104].mxu0 %vm686_vm1, %v6115_v49 }
0x1c3f   :  { %8644 = vmatprep.mubr.msk.f32.mxu0 %vm10442_vm4, %v10439_v47  ;;  %8643 = vmatpush3.msra.mxu0 %v460_v15 }
0x1c40   :  { %8652 = vmatprep.subr.mxu0 %v10439_v47 }
0x1d0d   :  { %v6023_v8 = vpop.f32.mrb[102].mxu0 }
0x1d0e   :  { %v8626_v39 = vpop.f32.mrb[103].mxu0  ;;  %8645 = vmatmul.mubr.msk.f32.vlgmr.msra.gmra.mrb[106].mxu0 %vm686_vm1, %v6023_v8  ;;  %v7595_v8 = vld [vmem:[#allocation25] ss:$0 sm:$0xff] }
0x1d0f   :  { %8654 = vmatprep.mubr.msk.f32.mxu0 %vm10442_vm4, %v10439_v47 }
0x1d11   :  { %v6188_v9 = vpop.f32.mrb[104].mxu0 }
0x1d12   :  { %v8636_v3 = vpop.f32.mrb[105].mxu0  ;;  %8640 = vmatmul.mubr.msk.f32.vlgmr.msra.gmra.mrb[90].mxu1 %vm686_vm1, %v6188_v9 }
0x1d13   :  { %8648 = vmatpush3.xpose.msk.msra.mxu1 %vm686_vm1, %v6341_v56  ;;  %8649 = vmatprep.mubr.msk.f32.mxu1 %vm10442_vm4, %v10439_v47 }
0x1d14   :  { %8657 = vmatprep.subr.mxu1 %v10439_v47 }
0x1d16   :  { %8650 = vmatmul.mubr.msk.f32.vlgmr.msra.gmra.mrb[92].mxu1 %vm686_vm1, %v6339_v24  ;;  %v473_v24 = vld [vmem:[#allocation26] sm:$0x3] }
0x1d17   :  { %8659 = vmatprep.mubr.msk.f32.mxu1 %vm10442_vm4, %v10439_v47  ;;  %8658 = vmatpush3.msra.mxu1 %v462_v50 }
0x1d18   :  { %8667 = vmatprep.subr.mxu1 %v10439_v47 }
0x1de1   :  { %v6334_v59 = vpop.f32.mrb[106].mxu0 }
0x1de2   :  { %v8646_v51 = vpop.f32.mrb[107].mxu0 }
0x1de3   :  { %v6831_v51 = vrot.slane %v473_v24, %v11531_v12 }
0x1de5   :  { %v6261_v45 = vpop.f32.mrb[90].mxu1 }
0x1de6   :  { %v6335_v54 = vadd.f32 %v6334_v59, %v6261_v45  ;;  %v8641_v30 = vpop.f32.mrb[91].mxu1  ;;  %v6827_v59 = vrot.slane %v473_v24, %v11529_v37 }
0x1de9   :  { %v6412_v28 = vpop.f32.mrb[92].mxu1 }
0x1dea   :  { %v6413_v29 = vadd.f32 %v6412_v28, %v12203_v42  ;;  %v8651_v14 = vpop.f32.mrb[93].mxu1 }
0x1dec   :  { %v6416_v0 = vsel %vm686_vm1, %v6413_v29, -inf }
0x1ded   :  { %6417 = vmax.xlane.f32.xlu1 %v6416_v0 }
0x1dfe   :  { %6579 = vrot.lane.b32.xlu1 %v12164_v20, %s10435_s25 }
0x1e02   :  { %6577 = vrot.lane.b32.xlu1 %v12170_v52, %s10436_s14 }
0x1e7a   :  { %v6418_v25 = vpop.xlane.xlu1 %6417 }
0x1e7b   :  { %v6419_v6 = vsub.f32 %v6413_v29, %v6418_v25  ;;  %v474_v29 = vld [vmem:[#allocation28] sm:$0x3] }
0x1e7c   :  { %v6914_v14 = vrot.slane %v474_v29, %v11529_v37  ;;  %v6918_v0 = vrot.slane %v474_v29, %v11531_v12  ;;  %v506_v37 = vld [vmem:[%s12354_s19] sm:$0xff] }
0x1e7d   :  { %v6420_v26 = vmul.f32 1.442695, %v6419_v6 }
0x1e7e   :  { %v6580_v40 = vpop.permute.xlu1 %6579 }
0x1e7f   :  { %9814 = vpow2.f32 %v6420_v26 }
0x1e82   :  { %v6578_v21 = vpop.permute.xlu1 %6577 }
0x1e89   :  { %v9815_v2 = vpop.eup %9814 }
0x1e8a   :  { %v6422_v38 = vsel %vm686_vm1, %v9815_v2, 0.0 }
0x1e8b   :  { %6423 = vadd.xlane.f32.xlu0 %v6422_v38 }
0x1ea1   :  { %6427 = vrot.lane.b32.xlu0 %v12164_v20, %s10437_s6 }
0x1f18   :  { %v6424_v61 = vpop.xlane.xlu0 %6423 }
0x1f19   :  { %9816 = vrcp.f32 %v6424_v61 }
0x1f1c   :  { %v6428_v43 = vpop.permute.xlu0 %6427 }
0x1f1d   :  { %8653 = vmatpush3.msra.mxu0 %v6428_v43 }
0x1f1e   :  { %8662 = vmatprep.subr.mxu0 %v10439_v47 }
0x1f23   :  { %v9817_v57 = vpop.eup %9816 }
0x1f24   :  { %v6426_v52 = vmul.f32 %v9817_v57, %v9815_v2 }
0x1f26   :  { %8655 = vmatmul.mubr.msk.f32.vlgmr.msra.gmra.mrb[108].mxu0 %vm686_vm1, %v6426_v52 }
0x1f27   :  { %8663 = vmatpush3.xpose.msk.msra.mxu0 %vm686_vm1, %v6580_v40  ;;  %8664 = vmatprep.mubr.msk.f32.mxu0 %vm10442_vm4, %v10439_v47 }
0x1f28   :  { %8672 = vmatprep.subr.mxu0 %v10439_v47 }
0x1f2a   :  { %8665 = vmatmul.mubr.msk.f32.vlgmr.msra.gmra.mrb[110].mxu0 %vm686_vm1, %v6578_v21 }
0x1f2b   :  { %8674 = vmatprep.mubr.msk.f32.mxu0 %vm10442_vm4, %v10439_v47  ;;  %8673 = vmatpush3.msra.mxu0 %v463_v13 }
0x1f2c   :  { %8677 = vmatprep.subr.mxu0 %v10439_v47 }
0x1ff9   :  { %v6499_v34 = vpop.f32.mrb[108].mxu0 }
0x1ffa   :  { %v8656_v53 = vpop.f32.mrb[109].mxu0  ;;  %8660 = vmatmul.mubr.msk.f32.vlgmr.msra.gmra.mrb[94].mxu1 %vm686_vm1, %v6499_v34 }
0x1ffb   :  { %8669 = vmatprep.mubr.msk.f32.mxu1 %vm10442_vm4, %v10439_v47 }
0x1ffd   :  { %v6651_v17 = vpop.f32.mrb[110].mxu0 }
0x1ffe   :  { %v6652_v35 = vadd.f32 %v6651_v17, %v12203_v42  ;;  %v8666_v48 = vpop.f32.mrb[111].mxu0 }
0x2000   :  { %v6655_v16 = vsel %vm686_vm1, %v6652_v35, -inf }
0x2001   :  { %6656 = vmax.xlane.f32.xlu0 %v6655_v16 }
0x2017   :  { %6666 = vrot.lane.b32.xlu0 %v12164_v20, %s10438_s18 }
0x208e   :  { %v6657_v44 = vpop.xlane.xlu0 %6656 }
0x208f   :  { %v6658_v4 = vsub.f32 %v6652_v35, %v6657_v44 }
0x2091   :  { %v6659_v23 = vmul.f32 1.442695, %v6658_v4  ;;  %v507_v4 = vld [vmem:[#allocation34] sm:$0x3] }
0x2092   :  { %v6667_v36 = vpop.permute.xlu0 %6666 }
0x2093   :  { %9818 = vpow2.f32 %v6659_v23  ;;  %8668 = vmatpush3.msra.mxu1 %v6667_v36 }
0x2094   :  { %9065 = vmatprep.subr.bf16.mxu1 %v9064_v11 }
0x209d   :  { %v9819_v60 = vpop.eup %9818 }
0x209e   :  { %v6661_v58 = vsel %vm686_vm1, %v9819_v60, 0.0 }
0x209f   :  { %6662 = vadd.xlane.f32.xlu1 %v6661_v58  ;;  %v508_v58 = vld [vmem:[#allocation35] sm:$0x3] }
0x20cd   :  { %v6572_v42 = vpop.f32.mrb[94].mxu1 }
0x20ce   :  { %v6576_v22 = vadd.f32 %v6572_v42, %v6335_v54  ;;  %v8661_v55 = vpop.f32.mrb[95].mxu1 }
0x212c   :  { %v6663_v20 = vpop.xlane.xlu1 %6662 }
0x212d   :  { %9820 = vrcp.f32 %v6663_v20 }
0x2137   :  { %v9821_v33 = vpop.eup %9820 }
0x2138   :  { %v6665_v46 = vmul.f32 %v9821_v33, %v9819_v60  ;;  %v509_v60 = vld [vmem:[%s10617_s4] sm:$0x3f] }
0x213a   :  { %8670 = vmatmul.mubr.msk.f32.vlgmr.msra.gmra.mrb[96].mxu1 %vm686_vm1, %v6665_v46 }
0x213b   :  { %6901 = vmatprep.mubr.f32.mxu1 %v10439_v47  ;;  %9067 = vmatpush1.bf16.msra.mxu1 %v9066_v31 }
0x213c   :  { %9069 = vmatprep.subr.bf16.mxu1 %v9068_v5 }
0x213f   :  { %9071 = vmatpush1.bf16.msra.mxu1 %v9070_v63 }
0x2140   :  { %8687 = vmatprep.subr.mxu1 %v10439_v47 }
0x220d   :  { %v6738_v49 = vpop.f32.mrb[96].mxu1 }
0x220e   :  { %v8671_v15 = vpop.f32.mrb[97].mxu1  ;;  %8675 = vmatmul.mubr.msk.f32.vlgmr.msra.gmra.mrb[112].mxu0 %vm686_vm1, %v6738_v49 }
0x220f   :  { %8679 = vmatprep.mubr.msk.f32.mxu0 %vm10442_vm4, %v10439_v47 }
0x22e1   :  { %v6811_v39 = vpop.f32.mrb[112].mxu0 }
0x22e2   :  { %v6815_v9 = vadd.f32 %v6811_v39, %v6576_v22  ;;  %v8676_v56 = vpop.f32.mrb[113].mxu0 }
0x22e4   :  { %v6822_v3 = vadd.f32 %v7595_v8, %v6815_v9 }
0x22e6   :  { %7596 = vmatmul.mubr.msk.f32.vlgmr.msra.gmra.mrb[98].mxu1 %vm524_vm0, %v6822_v3 }
0x22e7   :  { %8688 = vmatpush3.xpose.msk.msra.mxu1 %vm524_vm0, %v12200_v41  ;;  %8689 = vmatprep.mubr.msk.f32.mxu1 %vm10442_vm4, %v10439_v47 }
0x23b9   :  { %v6903_v45 = vpop.f32.mrb[98].mxu1 }
0x23ba   :  { %v6904_v54 = vadd.f32 %v6903_v45, %v6827_v59  ;;  %v6905_v30 = vpop.f32.mrb[99].mxu1 }
0x23bb   :  { %v6906_v28 = vadd.f32 %v6905_v30, %v6831_v51 }
0x23bc   :  { %9822 = vtanh.f32 %v6904_v54 }
0x23bd   :  { %9824 = vtanh.f32 %v6906_v28 }
0x23c6   :  { %v9823_v41 = vpop.eup %9822 }
0x23c7   :  { %v9825_v25 = vpop.eup %9824  ;;  %v6921_v6 = vmul.f32 %v9823_v41, %v6914_v14 }
0x23c8   :  { %v6922_v26 = vmul.f32 %v9825_v25, %v6918_v0 }
0x23ca   :  { %v6923_v2 = vadd.f32 %v6922_v26, %v6921_v6 }
0x23cc   :  { %6924 = vadd.xlane.f32.xlu1 %v6923_v2 }
0x2459   :  { %v6925_v38 = vpop.xlane.xlu1 %6924 }
0x245a   :  { %v6926_v61 = vrot.slane %v6925_v38, 4 }
0x245c   :  { %v6927_v43 = vmax.f32 %v6925_v38, %v6926_v61 }
0x245e   :  { %v6928_v57 = vrot.slane %v6927_v43, 2 }
0x2460   :  { %v6929_v40 = vmax.f32 %v6927_v43, %v6928_v57 }
0x2462   :  { %v6930_v52 = vrot.slane %v6929_v40, 1 }
0x2464   :  { %v6931_v21 = vmax.f32 %v6929_v40, %v6930_v52 }
0x2466   :  { %v6932_v50 = vsub.f32 %v6925_v38, %v6931_v21 }
0x2468   :  { %v6933_v34 = vmul.f32 1.442695, %v6932_v50 }
0x246a   :  { %9826 = vpow2.f32 %v6933_v34 }
0x2474   :  { %v9827_v53 = vpop.eup %9826 }
0x2475   :  { %8678 = vmatpush3.msra.mxu0 %v9827_v53 }
0x2476   :  { %8680 = vmatmul.mubr.msk.f32.vlgmr.msra.gmra.mrb[114].mxu0 %vm686_vm1, %v506_v37  ;;  %8682 = vmatprep.subr.mxu0 %v10439_v47 }
0x2477   :  { %8684 = vmatprep.mubr.msk.f32.mxu0 %vm10442_vm4, %v10439_v47 }
0x2549   :  { %v7004_v12 = vpop.f32.mrb[114].mxu0 }
0x254a   :  { %9828 = vrcp.f32 %v7004_v12  ;;  %v8681_v17 = vpop.f32.mrb[115].mxu0 }
0x2554   :  { %v9829_v35 = vpop.eup %9828 }
0x2555   :  { %v7009_v48 = vmul.f32 %v9829_v35, %v9827_v53 }
0x2557   :  { %7012 = vperm.xlu1 %9349, %v7009_v48  }
0x25d6   :  { %v7013_v16 = vpop.permute.xlu1 %7012 }
0x25d7   :  { %v7015_v44 = vmul.f32 %v7013_v16, %v6822_v3 }
0x25d9   :  { %8683 = vmatpush3.msra.mxu0 %v7015_v44 }
0x25da   :  { %8685 = vmatmul.mubr.msk.f32.vlgmr.msra.gmra.mrb[116].mxu0 %vm686_vm1, %v507_v4  ;;  %8692 = vmatprep.subr.mxu0 %v10439_v47 }
0x25db   :  { %8694 = vmatprep.mubr.msk.f32.mxu0 %vm10442_vm4, %v10439_v47  ;;  %8693 = vmatpush3.msk.msra.mxu0 %vm7170_vm6, %v509_v60 }
0x26ad   :  { %v7085_v23 = vpop.f32.mrb[116].mxu0 }
0x26ae   :  { %v8686_v36 = vpop.f32.mrb[117].mxu0  ;;  %8690 = vmatmul.mubr.msk.f32.vlgmr.msra.gmra.mrb[100].mxu1 %vm524_vm0, %v7085_v23 }
0x2781   :  { %v7161_v42 = vpop.f32.mrb[100].mxu1 }
0x2782   :  { %v7165_v22 = vmul.f32 %v7161_v42, %v508_v58  ;;  %v8691_v55 = vpop.f32.mrb[101].mxu1 }
0x2784   :  { %8695 = vmatmul.mubr.msk.f32.vlgmr.msra.gmra.mrb[118].mxu0 %vm7166_vm7, %v7165_v22 }
0x2857   :  { %v7240_v20 = vpop.f32.mrb[118].mxu0 }
0x2858   :  { %7244 = vst [vmem:[#allocation37] sm:$0x3] %v7240_v20  ;;  %v8696_v33 = vpop.f32.mrb[119].mxu0 }
0x2859   :  { %10333 = shalt.err (!%p10330_p12)
}
0x285a   :  { %s10334_s4 = scalar_lea.hbm %s10622_s5, 32 }
0x285b   :  { %p10335_p13 = scmp.ne.s32.totalorder %s10622_s5, %s10334_s4  ;;  %p10338_p0 = scmp.lt.u32.totalorder %s10334_s4, %s10622_s5 }
0x285d   :  { %p10340_p1 = pnand %p10338_p0, %p10335_p13 }
0x285f   :  { %10343 = shalt.err (!%p10340_p1)
}
0x2860   :  { %7254 = dma.vmem_to_hbm [thread:$0]  %s7252_s7, 32, %s10622_s5, [#allocation4]  }
0x2861   :  { %10368 = dma.done.wait [#allocation4], 32  }
0x2862   :  { %10369 = vsyncadd [#allocation4], 4294967264 }
0x2863   :  { %7258 = vsyncpa [#allocation3], 1 }
0x2864   :  { %7259 = vsyncpa [#allocation6], 1 }
0x2865   :  { %7260 = vsyncpa [#allocation9], 1 }
0x2866   :  { %7261 = vsyncpa [#allocation12], 1 }
0x2867   :  { %7262 = vsyncpa [#allocation15], 1 }
0x2868   :  { %7263 = vsyncpa [#allocation18], 1 }
0x2869   :  { %7264 = vsyncpa [#allocation21], 1 }
0x286a   :  { %7265 = vsyncpa [#allocation24], 1 }
0x286b   :  { %7266 = vsyncpa [#allocation27], 1 }
0x286c   :  { %7267 = vsyncpa [#allocation30], 1 }
0x286d   :  { %7268 = vsyncpa [#allocation33], 1 }
0x286e   :  { %7269 = vsyncpa [#allocation36], 1 }
0x286f   :  { %7270 = vsyncpa [#allocation4], 1 }

</bundles_post_ra>
